<compile_context>
chip_gen: v5e
topology: v5e:2x2
jax: 0.10.0
libtpu: 0.0.40
codegen_flags: <defaults>
</compile_context>

<pallas_src>
import functools

import jax
import jax.numpy as jnp
from jax import lax
from jax.experimental import pallas as pl
from jax.experimental.pallas import tpu as pltpu


# ----------------------------- in-kernel helpers -----------------------------

def _add_layernorm(x, res, gamma, beta, eps=1e-5):
    """LayerNorm(x + res) over the last dim (nn.LayerNorm default eps)."""
    y = x + res
    mean = jnp.mean(y, axis=-1, keepdims=True)
    var = jnp.mean(jnp.square(y - mean), axis=-1, keepdims=True)
    return (y - mean) * lax.rsqrt(var + eps) * gamma + beta


def _project_heads(x16, w_ref, b_ref, start, num_heads):
    """Per-head linear projections.

    x16: (S, D) bf16.  w_ref: (..., D, dh) bf16, b_ref: (..., 1, dh) f32, indexed
    along the leading head axis.  Returns a list of num_heads (S, dh) f32 arrays.
    """
    return [jnp.dot(x16, w_ref[start + h], preferred_element_type=jnp.float32)
            + b_ref[start + h]
            for h in range(num_heads)]


def _attend(q_heads, k_heads, v_heads, mask, wo_ref, bo, attn_w_ref):
    """Scaled-dot-product attention (scale pre-folded into Wq) + output proj.

    q_heads/k_heads/v_heads: lists of (Sq, dh)/(Sk, dh) f32.
    mask: (Sq, Sk) f32 with 1.0 = masked out.
    wo_ref: (H, dh, D) bf16 — summing per-head projections == concat(heads) @ Wo.
    Writes per-head attention probabilities to attn_w_ref[0, h].
    Returns the (Sq, D) f32 attention output (after Wo + bo).
    """
    neg = mask * (-1e9)
    out = None
    for h, (qh, kh, vh) in enumerate(zip(q_heads, k_heads, v_heads)):
        # logits = q @ k^T without materializing k^T (contract last dims).
        logits = lax.dot_general(qh.astype(jnp.bfloat16), kh.astype(jnp.bfloat16),
                                 (((1,), (1,)), ((), ())),
                                 preferred_element_type=jnp.float32)
        logits = logits + neg
        logits = logits - jnp.max(logits, axis=-1, keepdims=True)
        e = jnp.exp(logits)
        attn = e * pl.reciprocal(jnp.sum(e, axis=-1, keepdims=True), approx=True)
        attn_w_ref[0, h] = attn
        ctx = jnp.dot(attn.astype(jnp.bfloat16), vh.astype(jnp.bfloat16),
                      preferred_element_type=jnp.float32)            # (Sq, dh)
        proj = jnp.dot(ctx.astype(jnp.bfloat16), wo_ref[h],
                       preferred_element_type=jnp.float32)           # (Sq, D)
        out = proj if out is None else out + proj
    return out + bo


def _ffn(x, w1_ref, b1_ref, w2_ref, b2_ref):
    h = jnp.dot(x.astype(jnp.bfloat16), w1_ref[...],
                preferred_element_type=jnp.float32) + b1_ref[...]
    h = jnp.maximum(h, 0.0)
    return jnp.dot(h.astype(jnp.bfloat16), w2_ref[...],
                   preferred_element_type=jnp.float32) + b2_ref[...]


# ----------------------------- fused block kernels ----------------------------

def _encoder_block_kernel(x_ref, mask_ref,
                          wqkv_ref, bqkv_ref, wo_ref, bo_ref,
                          ln1g_ref, ln1b_ref,
                          w1_ref, b1_ref, w2_ref, b2_ref,
                          ln2g_ref, ln2b_ref,
                          o_ref, attn_ref, *, num_heads):
    H = num_heads
    x = x_ref[0]                              # (S, D) f32
    x16 = x.astype(jnp.bfloat16)              # read activations once
    mask = mask_ref[0]                        # (S, S)

    q_h = _project_heads(x16, wqkv_ref, bqkv_ref, 0, H)       # Wq pre-scaled
    k_h = _project_heads(x16, wqkv_ref, bqkv_ref, H, H)
    v_h = _project_heads(x16, wqkv_ref, bqkv_ref, 2 * H, H)
    attn_out = _attend(q_h, k_h, v_h, mask, wo_ref, bo_ref[...], attn_ref)

    # TODO(synk): dropout(rate=0.1) is identity at training=False (inference).
    out1 = _add_layernorm(attn_out, x, ln1g_ref[...], ln1b_ref[...])
    f = _ffn(out1, w1_ref, b1_ref, w2_ref, b2_ref)
    o_ref[0] = _add_layernorm(f, out1, ln2g_ref[...], ln2b_ref[...])


def _decoder_block_kernel(x_ref, enc_ref, dmask_ref, mmask_ref,
                          wqkv1_ref, bqkv1_ref, wo1_ref, bo1_ref,
                          ln1g_ref, ln1b_ref,
                          wq2_ref, bq2_ref, wkv2_ref, bkv2_ref, wo2_ref, bo2_ref,
                          ln2g_ref, ln2b_ref,
                          w1_ref, b1_ref, w2_ref, b2_ref,
                          ln3g_ref, ln3b_ref,
                          o_ref, sattn_ref, cattn_ref, *, num_heads):
    H = num_heads
    x = x_ref[0]                              # (St, D)
    x16 = x.astype(jnp.bfloat16)
    enc16 = enc_ref[0].astype(jnp.bfloat16)   # (Sk, D)

    # masked self-attention
    q_h = _project_heads(x16, wqkv1_ref, bqkv1_ref, 0, H)
    k_h = _project_heads(x16, wqkv1_ref, bqkv1_ref, H, H)
    v_h = _project_heads(x16, wqkv1_ref, bqkv1_ref, 2 * H, H)
    sa = _attend(q_h, k_h, v_h, dmask_ref[0], wo1_ref, bo1_ref[...], sattn_ref)
    out1 = _add_layernorm(sa, x, ln1g_ref[...], ln1b_ref[...])

    # cross-attention (queries from decoder, keys/values from encoder output)
    out1_16 = out1.astype(jnp.bfloat16)
    q2_h = _project_heads(out1_16, wq2_ref, bq2_ref, 0, H)
    k2_h = _project_heads(enc16, wkv2_ref, bkv2_ref, 0, H)
    v2_h = _project_heads(enc16, wkv2_ref, bkv2_ref, H, H)
    ca = _attend(q2_h, k2_h, v2_h, mmask_ref[0], wo2_ref, bo2_ref[...], cattn_ref)
    out2 = _add_layernorm(ca, out1, ln2g_ref[...], ln2b_ref[...])

    # position-wise FFN
    f = _ffn(out2, w1_ref, b1_ref, w2_ref, b2_ref)
    o_ref[0] = _add_layernorm(f, out2, ln3g_ref[...], ln3b_ref[...])


def _output_proj_kernel(x_ref, w_ref, b_ref, o_ref):
    o_ref[0] = (jnp.dot(x_ref[0].astype(jnp.bfloat16), w_ref[...],
                        preferred_element_type=jnp.float32) + b_ref[...])


# ------------------------------ pallas_call wrappers ---------------------------

def _rep(arr):
    """Whole-array block replicated across the batch grid."""
    n = arr.ndim
    return pl.BlockSpec(arr.shape, lambda b: (0,) * n)


def encoder_block(p, x, mask3, num_heads):
    B, S, D = x.shape
    H = num_heads
    weights = (p["sa"]["wqkv"], p["sa"]["bqkv"], p["sa"]["wo"], p["sa"]["bo"],
               p["ln1_g"], p["ln1_b"],
               p["w1"], p["b1"], p["w2"], p["b2"],
               p["ln2_g"], p["ln2_b"])
    return pl.pallas_call(
        functools.partial(_encoder_block_kernel, num_heads=H),
        out_shape=(jax.ShapeDtypeStruct((B, S, D), jnp.float32),
                   jax.ShapeDtypeStruct((B, H, S, S), jnp.float32)),
        grid=(B,),
        in_specs=[pl.BlockSpec((1, S, D), lambda b: (b, 0, 0)),
                  pl.BlockSpec((1, S, S), lambda b: (b, 0, 0))]
                 + [_rep(w) for w in weights],
        out_specs=(pl.BlockSpec((1, S, D), lambda b: (b, 0, 0)),
                   pl.BlockSpec((1, H, S, S), lambda b: (b, 0, 0, 0))),
        compiler_params=pltpu.CompilerParams(dimension_semantics=("parallel",)),
    )(x, mask3, *weights)


def decoder_block(p, x, enc_out, dmask3, mmask3, num_heads):
    B, St, D = x.shape
    Sk = enc_out.shape[1]
    H = num_heads
    weights = (p["sa"]["wqkv"], p["sa"]["bqkv"], p["sa"]["wo"], p["sa"]["bo"],
               p["ln1_g"], p["ln1_b"],
               p["ca"]["wq"], p["ca"]["bq"], p["ca"]["wkv"], p["ca"]["bkv"],
               p["ca"]["wo"], p["ca"]["bo"],
               p["ln2_g"], p["ln2_b"],
               p["w1"], p["b1"], p["w2"], p["b2"],
               p["ln3_g"], p["ln3_b"])
    return pl.pallas_call(
        functools.partial(_decoder_block_kernel, num_heads=H),
        out_shape=(jax.ShapeDtypeStruct((B, St, D), jnp.float32),
                   jax.ShapeDtypeStruct((B, H, St, St), jnp.float32),
                   jax.ShapeDtypeStruct((B, H, St, Sk), jnp.float32)),
        grid=(B,),
        in_specs=[pl.BlockSpec((1, St, D), lambda b: (b, 0, 0)),
                  pl.BlockSpec((1, Sk, D), lambda b: (b, 0, 0)),
                  pl.BlockSpec((1, St, St), lambda b: (b, 0, 0)),
                  pl.BlockSpec((1, St, Sk), lambda b: (b, 0, 0))]
                 + [_rep(w) for w in weights],
        out_specs=(pl.BlockSpec((1, St, D), lambda b: (b, 0, 0)),
                   pl.BlockSpec((1, H, St, St), lambda b: (b, 0, 0, 0)),
                   pl.BlockSpec((1, H, St, Sk), lambda b: (b, 0, 0, 0))),
        compiler_params=pltpu.CompilerParams(dimension_semantics=("parallel",)),
    )(x, enc_out, dmask3, mmask3, *weights)


def output_projection(x, w, b):
    B, S, D = x.shape
    V = w.shape[1]
    return pl.pallas_call(
        _output_proj_kernel,
        out_shape=jax.ShapeDtypeStruct((B, S, V), jnp.float32),
        grid=(B,),
        in_specs=[pl.BlockSpec((1, S, D), lambda i: (i, 0, 0)),
                  pl.BlockSpec((D, V), lambda i: (0, 0)),
                  pl.BlockSpec((1, V), lambda i: (0, 0))],
        out_specs=pl.BlockSpec((1, S, V), lambda i: (i, 0, 0)),
        compiler_params=pltpu.CompilerParams(dimension_semantics=("parallel",)),
    )(x, w, b)


# --------------------------- model (glue in JAX) ---------------------------

def encoder_forward(p, input_seqs, training, mask, num_heads, d_model):
    B, S = input_seqs.shape
    # TODO(synk): embedding gather + positional add are left to XLA (tiny,
    # data-dependent gather has no clean dense Pallas equivalent at this scale).
    x = jnp.take(p["embedding"], input_seqs, axis=0) * jnp.sqrt(jnp.float32(d_model))
    x = x + p["pos_encoding"][None, :S, :]
    mask3 = jnp.broadcast_to(mask.astype(jnp.float32)[:, 0], (B, S, S))
    attn_weights = {}
    for i, blk in enumerate(p["blocks"]):
        x, w = encoder_block(blk, x, mask3, num_heads)
        attn_weights[f"encoder_block{i + 1}"] = w
    return x, attn_weights


def decoder_forward(p, enc_out, target_seqs, training, decoder_mask, memory_mask,
                    num_heads, d_model):
    B, St = target_seqs.shape
    Sk = enc_out.shape[1]
    x = jnp.take(p["embedding"], target_seqs, axis=0) * jnp.sqrt(jnp.float32(d_model))
    x = x + p["pos_encoding"][None, :St, :]
    dmask3 = jnp.broadcast_to(decoder_mask.astype(jnp.float32)[:, 0], (B, St, St))
    mmask3 = jnp.broadcast_to(memory_mask.astype(jnp.float32)[:, 0], (B, St, Sk))
    attn_weights = {}
    for i, blk in enumerate(p["blocks"]):
        x, sw, cw = decoder_block(blk, x, enc_out, dmask3, mmask3, num_heads)
        attn_weights[f"decoder_block{i + 1}_self"] = sw
        attn_weights[f"decoder_block{i + 1}_cross"] = cw
    return x, attn_weights


def transformer_forward(params, input_seqs, target_input_seqs, training,
                        encoder_mask, decoder_mask, memory_mask, *,
                        num_heads, d_model):
    enc_out, enc_w = encoder_forward(params["encoder"], input_seqs, training,
                                     encoder_mask, num_heads, d_model)
    dec_out, dec_w = decoder_forward(params["decoder"], enc_out, target_input_seqs,
                                     training, decoder_mask, memory_mask,
                                     num_heads, d_model)
    logits = output_projection(dec_out, params["out_w"], params["out_b"])
    return logits, enc_w, dec_w


# ----------------------------- parameter init -----------------------------

def positional_encoding(max_len, d_model):
    pos = jnp.arange(max_len, dtype=jnp.float32)[:, None]
    i = jnp.arange(d_model, dtype=jnp.float32)[None, :]
    angle_rates = 1.0 / jnp.power(10000.0, (2.0 * jnp.floor(i / 2.0)) / d_model)
    angles = pos * angle_rates
    return jnp.where(jnp.arange(d_model)[None, :] % 2 == 0,
                     jnp.sin(angles), jnp.cos(angles)).astype(jnp.float32)


def _dense(key, d_in, d_out):
    w = jax.random.normal(key, (d_in, d_out), jnp.float32) * 0.02
    b = jnp.zeros((1, d_out), jnp.float32)
    return w, b


def _split_heads_w(w, num_heads):
    # (D, D_out) -> (H, D, dh): head h == columns [h*dh, (h+1)*dh)
    D, Do = w.shape
    dh = Do // num_heads
    return w.reshape(D, num_heads, dh).transpose(1, 0, 2)


def _split_heads_b(b, num_heads):
    # (1, D_out) -> (H, 1, dh)
    dh = b.shape[1] // num_heads
    return b.reshape(num_heads, 1, dh)


def init_self_attention(key, d_model, num_heads):
    dh = d_model // num_heads
    ks = jax.random.split(key, 4)
    wq, bq = _dense(ks[0], d_model, d_model)
    wk, bk = _dense(ks[1], d_model, d_model)
    wv, bv = _dense(ks[2], d_model, d_model)
    wo, bo = _dense(ks[3], d_model, d_model)
    s = 1.0 / float(dh) ** 0.5   # fold attention scale into Wq/bq
    wqkv = jnp.concatenate([_split_heads_w(wq * s, num_heads),
                            _split_heads_w(wk, num_heads),
                            _split_heads_w(wv, num_heads)], axis=0)
    bqkv = jnp.concatenate([_split_heads_b(bq * s, num_heads),
                            _split_heads_b(bk, num_heads),
                            _split_heads_b(bv, num_heads)], axis=0)
    return {"wqkv": wqkv.astype(jnp.bfloat16), "bqkv": bqkv,
            # Wo stored as (H, dh, D): per-head sum == concat(heads) @ Wo.
            "wo": wo.reshape(num_heads, dh, d_model).astype(jnp.bfloat16),
            "bo": bo}


def init_cross_attention(key, d_model, num_heads):
    dh = d_model // num_heads
    ks = jax.random.split(key, 4)
    wq, bq = _dense(ks[0], d_model, d_model)
    wk, bk = _dense(ks[1], d_model, d_model)
    wv, bv = _dense(ks[2], d_model, d_model)
    wo, bo = _dense(ks[3], d_model, d_model)
    s = 1.0 / float(dh) ** 0.5
    return {
        "wq": _split_heads_w(wq * s, num_heads).astype(jnp.bfloat16),
        "bq": _split_heads_b(bq * s, num_heads),
        "wkv": jnp.concatenate([_split_heads_w(wk, num_heads),
                                _split_heads_w(wv, num_heads)],
                               axis=0).astype(jnp.bfloat16),
        "bkv": jnp.concatenate([_split_heads_b(bk, num_heads),
                                _split_heads_b(bv, num_heads)], axis=0),
        "wo": wo.reshape(num_heads, dh, d_model).astype(jnp.bfloat16),
        "bo": bo,
    }


def _ln_params(d_model):
    return jnp.ones((1, d_model), jnp.float32), jnp.zeros((1, d_model), jnp.float32)


def init_encoder_block(key, d_model, num_heads, hidden_dim):
    ks = jax.random.split(key, 3)
    w1, b1 = _dense(ks[1], d_model, hidden_dim)
    w2, b2 = _dense(ks[2], hidden_dim, d_model)
    p = {"sa": init_self_attention(ks[0], d_model, num_heads),
         "w1": w1.astype(jnp.bfloat16), "b1": b1,
         "w2": w2.astype(jnp.bfloat16), "b2": b2}
    p["ln1_g"], p["ln1_b"] = _ln_params(d_model)
    p["ln2_g"], p["ln2_b"] = _ln_params(d_model)
    return p


def init_decoder_block(key, d_model, num_heads, hidden_dim):
    ks = jax.random.split(key, 4)
    w1, b1 = _dense(ks[2], d_model, hidden_dim)
    w2, b2 = _dense(ks[3], hidden_dim, d_model)
    p = {"sa": init_self_attention(ks[0], d_model, num_heads),
         "ca": init_cross_attention(ks[1], d_model, num_heads),
         "w1": w1.astype(jnp.bfloat16), "b1": b1,
         "w2": w2.astype(jnp.bfloat16), "b2": b2}
    p["ln1_g"], p["ln1_b"] = _ln_params(d_model)
    p["ln2_g"], p["ln2_b"] = _ln_params(d_model)
    p["ln3_g"], p["ln3_b"] = _ln_params(d_model)
    return p


def init_transformer(key, num_blocks, d_model, num_heads, hidden_dim,
                     src_vocab, tgt_vocab, max_in, max_tgt):
    keys = jax.random.split(key, 2 * num_blocks + 3)
    out_w, out_b = _dense(keys[-1], d_model, tgt_vocab)
    return {
        "encoder": {
            "embedding": jax.random.normal(keys[0], (src_vocab, d_model),
                                           jnp.float32) * 0.02,
            "pos_encoding": positional_encoding(max_in, d_model),
            "blocks": [init_encoder_block(keys[2 + i], d_model, num_heads, hidden_dim)
                       for i in range(num_blocks)],
        },
        "decoder": {
            "embedding": jax.random.normal(keys[1], (tgt_vocab, d_model),
                                           jnp.float32) * 0.02,
            "pos_encoding": positional_encoding(max_tgt, d_model),
            "blocks": [init_decoder_block(keys[2 + num_blocks + i], d_model,
                                          num_heads, hidden_dim)
                       for i in range(num_blocks)],
        },
        "out_w": out_w.astype(jnp.bfloat16),
        "out_b": out_b,
    }


def padding_mask(seqs):
    # 1.0 where token == 0 (pad), broadcastable to (B, H, Sq, Sk)
    return (seqs == 0).astype(jnp.float32)[:, None, None, :]


# ---------------------------------- main -----------------------------------

if __name__ == "__main__":
    num_blocks, d_model, num_heads, hidden_dim = 2, 32, 4, 64
    src_vocab, tgt_vocab = 50, 48
    max_in, max_tgt = 16, 16
    B, S_in, S_tgt = 2, 8, 8

    key = jax.random.PRNGKey(0)
    kp, ki, kt = jax.random.split(key, 3)
    params = init_transformer(kp, num_blocks, d_model, num_heads, hidden_dim,
                              src_vocab, tgt_vocab, max_in, max_tgt)

    input_seqs = jax.random.randint(ki, (B, S_in), 1, src_vocab, dtype=jnp.int32)
    input_seqs = input_seqs.at[1, -2:].set(0)            # some padding
    target_input_seqs = jax.random.randint(kt, (B, S_tgt), 1, tgt_vocab,
                                           dtype=jnp.int32)

    encoder_mask = padding_mask(input_seqs)                             # (B,1,1,S_in)
    look_ahead = jnp.triu(jnp.ones((S_tgt, S_tgt), jnp.float32), k=1)[None, None]
    decoder_mask = jnp.maximum(look_ahead, padding_mask(target_input_seqs))  # (B,1,S,S)
    memory_mask = encoder_mask                                          # (B,1,1,S_in)

    fwd = jax.jit(functools.partial(transformer_forward,
                                    num_heads=num_heads, d_model=d_model))
    logits, enc_attn, dec_attn = fwd(params, input_seqs, target_input_seqs, False,
                                     encoder_mask, decoder_mask, memory_mask)

    jax.block_until_ready((logits, enc_attn, dec_attn))
    assert logits.shape == (B, S_tgt, tgt_vocab)
    assert enc_attn["encoder_block1"].shape == (B, num_heads, S_in, S_in)
    assert dec_attn["decoder_block1_self"].shape == (B, num_heads, S_tgt, S_tgt)
    assert dec_attn["decoder_block1_cross"].shape == (B, num_heads, S_tgt, S_in)
    print("KERNEL_OK")
</pallas_src>

<mosaic_0001>
module attributes {stable_mosaic.version = 11 : i64} {
  func.func @_encoder_block_kernel(%arg0: i32, %arg1: memref<1x8x32xf32, #tpu.memory_space<vmem>>, %arg2: memref<1x8x8xf32, #tpu.memory_space<vmem>>, %arg3: memref<12x32x8xbf16, #tpu.memory_space<vmem>>, %arg4: memref<12x1x8xf32, #tpu.memory_space<vmem>>, %arg5: memref<4x8x32xbf16, #tpu.memory_space<vmem>>, %arg6: memref<1x32xf32, #tpu.memory_space<vmem>>, %arg7: memref<1x32xf32, #tpu.memory_space<vmem>>, %arg8: memref<1x32xf32, #tpu.memory_space<vmem>>, %arg9: memref<32x64xbf16, #tpu.memory_space<vmem>>, %arg10: memref<1x64xf32, #tpu.memory_space<vmem>>, %arg11: memref<64x32xbf16, #tpu.memory_space<vmem>>, %arg12: memref<1x32xf32, #tpu.memory_space<vmem>>, %arg13: memref<1x32xf32, #tpu.memory_space<vmem>>, %arg14: memref<1x32xf32, #tpu.memory_space<vmem>>, %arg15: memref<1x8x32xf32, #tpu.memory_space<vmem>>, %arg16: memref<1x4x8x8xf32, #tpu.memory_space<vmem>>) attributes {dimension_semantics = [#tpu.dimension_semantics<parallel>], iteration_bounds = array<i64: 2>, scalar_prefetch = 0 : i64, scratch_operands = 0 : i64, tpu.core_type = #tpu.core_type<tc>, window_params = [{transform_indices = @transform_0, window_bounds = array<i64: 1, 8, 32>}, {transform_indices = @transform_1, window_bounds = array<i64: 1, 8, 8>}, {pipeline_mode = #tpu.pipeline_mode<synchronous>, transform_indices = @transform_2, window_bounds = array<i64: 12, 32, 8>}, {pipeline_mode = #tpu.pipeline_mode<synchronous>, transform_indices = @transform_3, window_bounds = array<i64: 12, 1, 8>}, {pipeline_mode = #tpu.pipeline_mode<synchronous>, transform_indices = @transform_4, window_bounds = array<i64: 4, 8, 32>}, {pipeline_mode = #tpu.pipeline_mode<synchronous>, transform_indices = @transform_5, window_bounds = array<i64: 1, 32>}, {pipeline_mode = #tpu.pipeline_mode<synchronous>, transform_indices = @transform_6, window_bounds = array<i64: 1, 32>}, {pipeline_mode = #tpu.pipeline_mode<synchronous>, transform_indices = @transform_7, window_bounds = array<i64: 1, 32>}, {pipeline_mode = #tpu.pipeline_mode<synchronous>, transform_indices = @transform_8, window_bounds = array<i64: 32, 64>}, {pipeline_mode = #tpu.pipeline_mode<synchronous>, transform_indices = @transform_9, window_bounds = array<i64: 1, 64>}, {pipeline_mode = #tpu.pipeline_mode<synchronous>, transform_indices = @transform_10, window_bounds = array<i64: 64, 32>}, {pipeline_mode = #tpu.pipeline_mode<synchronous>, transform_indices = @transform_11, window_bounds = array<i64: 1, 32>}, {pipeline_mode = #tpu.pipeline_mode<synchronous>, transform_indices = @transform_12, window_bounds = array<i64: 1, 32>}, {pipeline_mode = #tpu.pipeline_mode<synchronous>, transform_indices = @transform_13, window_bounds = array<i64: 1, 32>}, {transform_indices = @transform_14, window_bounds = array<i64: 1, 8, 32>}, {transform_indices = @transform_15, window_bounds = array<i64: 1, 4, 8, 8>}]} {
    %c0 = arith.constant 0 : index
    %c0_0 = arith.constant 0 : index
    %c0_1 = arith.constant 0 : index
    %0 = vector.load %arg1[%c0, %c0_0, %c0_1] : memref<1x8x32xf32, #tpu.memory_space<vmem>>, vector<1x8x32xf32>
    %1 = vector.shape_cast %0 : vector<1x8x32xf32> to vector<8x32xf32>
    %2 = arith.truncf %1 : vector<8x32xf32> to vector<8x32xbf16>
    %c0_2 = arith.constant 0 : index
    %c0_3 = arith.constant 0 : index
    %c0_4 = arith.constant 0 : index
    %3 = vector.load %arg2[%c0_2, %c0_3, %c0_4] : memref<1x8x8xf32, #tpu.memory_space<vmem>>, vector<1x8x8xf32>
    %4 = vector.shape_cast %3 : vector<1x8x8xf32> to vector<8x8xf32>
    %c0_5 = arith.constant 0 : index
    %c0_6 = arith.constant 0 : index
    %c0_7 = arith.constant 0 : index
    %5 = vector.load %arg3[%c0_5, %c0_6, %c0_7] : memref<12x32x8xbf16, #tpu.memory_space<vmem>>, vector<1x32x8xbf16>
    %6 = vector.shape_cast %5 : vector<1x32x8xbf16> to vector<32x8xbf16>
    %cst = arith.constant dense<0.000000e+00> : vector<8x8xf32>
    %7 = tpu.matmul %2, %6, %cst {dimension_numbers = #tpu.dot_dimension_numbers<[1], [0], [0], [1], [0, 0, 1, 1], [], []>} : vector<8x32xbf16>, vector<32x8xbf16>, vector<8x8xf32> -> vector<8x8xf32>
    %c0_8 = arith.constant 0 : index
    %c0_9 = arith.constant 0 : index
    %c0_10 = arith.constant 0 : index
    %8 = vector.load %arg4[%c0_8, %c0_9, %c0_10] : memref<12x1x8xf32, #tpu.memory_space<vmem>>, vector<1x1x8xf32>
    %9 = vector.shape_cast %8 : vector<1x1x8xf32> to vector<1x8xf32>
    %10 = vector.broadcast %9 : vector<1x8xf32> to vector<8x8xf32>
    %11 = arith.addf %7, %10 : vector<8x8xf32>
    %c1 = arith.constant 1 : index
    %c0_11 = arith.constant 0 : index
    %c0_12 = arith.constant 0 : index
    %12 = vector.load %arg3[%c1, %c0_11, %c0_12] : memref<12x32x8xbf16, #tpu.memory_space<vmem>>, vector<1x32x8xbf16>
    %13 = vector.shape_cast %12 : vector<1x32x8xbf16> to vector<32x8xbf16>
    %cst_13 = arith.constant dense<0.000000e+00> : vector<8x8xf32>
    %14 = tpu.matmul %2, %13, %cst_13 {dimension_numbers = #tpu.dot_dimension_numbers<[1], [0], [0], [1], [0, 0, 1, 1], [], []>} : vector<8x32xbf16>, vector<32x8xbf16>, vector<8x8xf32> -> vector<8x8xf32>
    %c1_14 = arith.constant 1 : index
    %c0_15 = arith.constant 0 : index
    %c0_16 = arith.constant 0 : index
    %15 = vector.load %arg4[%c1_14, %c0_15, %c0_16] : memref<12x1x8xf32, #tpu.memory_space<vmem>>, vector<1x1x8xf32>
    %16 = vector.shape_cast %15 : vector<1x1x8xf32> to vector<1x8xf32>
    %17 = vector.broadcast %16 : vector<1x8xf32> to vector<8x8xf32>
    %18 = arith.addf %14, %17 : vector<8x8xf32>
    %c2 = arith.constant 2 : index
    %c0_17 = arith.constant 0 : index
    %c0_18 = arith.constant 0 : index
    %19 = vector.load %arg3[%c2, %c0_17, %c0_18] : memref<12x32x8xbf16, #tpu.memory_space<vmem>>, vector<1x32x8xbf16>
    %20 = vector.shape_cast %19 : vector<1x32x8xbf16> to vector<32x8xbf16>
    %cst_19 = arith.constant dense<0.000000e+00> : vector<8x8xf32>
    %21 = tpu.matmul %2, %20, %cst_19 {dimension_numbers = #tpu.dot_dimension_numbers<[1], [0], [0], [1], [0, 0, 1, 1], [], []>} : vector<8x32xbf16>, vector<32x8xbf16>, vector<8x8xf32> -> vector<8x8xf32>
    %c2_20 = arith.constant 2 : index
    %c0_21 = arith.constant 0 : index
    %c0_22 = arith.constant 0 : index
    %22 = vector.load %arg4[%c2_20, %c0_21, %c0_22] : memref<12x1x8xf32, #tpu.memory_space<vmem>>, vector<1x1x8xf32>
    %23 = vector.shape_cast %22 : vector<1x1x8xf32> to vector<1x8xf32>
    %24 = vector.broadcast %23 : vector<1x8xf32> to vector<8x8xf32>
    %25 = arith.addf %21, %24 : vector<8x8xf32>
    %c3 = arith.constant 3 : index
    %c0_23 = arith.constant 0 : index
    %c0_24 = arith.constant 0 : index
    %26 = vector.load %arg3[%c3, %c0_23, %c0_24] : memref<12x32x8xbf16, #tpu.memory_space<vmem>>, vector<1x32x8xbf16>
    %27 = vector.shape_cast %26 : vector<1x32x8xbf16> to vector<32x8xbf16>
    %cst_25 = arith.constant dense<0.000000e+00> : vector<8x8xf32>
    %28 = tpu.matmul %2, %27, %cst_25 {dimension_numbers = #tpu.dot_dimension_numbers<[1], [0], [0], [1], [0, 0, 1, 1], [], []>} : vector<8x32xbf16>, vector<32x8xbf16>, vector<8x8xf32> -> vector<8x8xf32>
    %c3_26 = arith.constant 3 : index
    %c0_27 = arith.constant 0 : index
    %c0_28 = arith.constant 0 : index
    %29 = vector.load %arg4[%c3_26, %c0_27, %c0_28] : memref<12x1x8xf32, #tpu.memory_space<vmem>>, vector<1x1x8xf32>
    %30 = vector.shape_cast %29 : vector<1x1x8xf32> to vector<1x8xf32>
    %31 = vector.broadcast %30 : vector<1x8xf32> to vector<8x8xf32>
    %32 = arith.addf %28, %31 : vector<8x8xf32>
    %c4 = arith.constant 4 : index
    %c0_29 = arith.constant 0 : index
    %c0_30 = arith.constant 0 : index
    %33 = vector.load %arg3[%c4, %c0_29, %c0_30] : memref<12x32x8xbf16, #tpu.memory_space<vmem>>, vector<1x32x8xbf16>
    %34 = vector.shape_cast %33 : vector<1x32x8xbf16> to vector<32x8xbf16>
    %cst_31 = arith.constant dense<0.000000e+00> : vector<8x8xf32>
    %35 = tpu.matmul %2, %34, %cst_31 {dimension_numbers = #tpu.dot_dimension_numbers<[1], [0], [0], [1], [0, 0, 1, 1], [], []>} : vector<8x32xbf16>, vector<32x8xbf16>, vector<8x8xf32> -> vector<8x8xf32>
    %c4_32 = arith.constant 4 : index
    %c0_33 = arith.constant 0 : index
    %c0_34 = arith.constant 0 : index
    %36 = vector.load %arg4[%c4_32, %c0_33, %c0_34] : memref<12x1x8xf32, #tpu.memory_space<vmem>>, vector<1x1x8xf32>
    %37 = vector.shape_cast %36 : vector<1x1x8xf32> to vector<1x8xf32>
    %38 = vector.broadcast %37 : vector<1x8xf32> to vector<8x8xf32>
    %39 = arith.addf %35, %38 : vector<8x8xf32>
    %c5 = arith.constant 5 : index
    %c0_35 = arith.constant 0 : index
    %c0_36 = arith.constant 0 : index
    %40 = vector.load %arg3[%c5, %c0_35, %c0_36] : memref<12x32x8xbf16, #tpu.memory_space<vmem>>, vector<1x32x8xbf16>
    %41 = vector.shape_cast %40 : vector<1x32x8xbf16> to vector<32x8xbf16>
    %cst_37 = arith.constant dense<0.000000e+00> : vector<8x8xf32>
    %42 = tpu.matmul %2, %41, %cst_37 {dimension_numbers = #tpu.dot_dimension_numbers<[1], [0], [0], [1], [0, 0, 1, 1], [], []>} : vector<8x32xbf16>, vector<32x8xbf16>, vector<8x8xf32> -> vector<8x8xf32>
    %c5_38 = arith.constant 5 : index
    %c0_39 = arith.constant 0 : index
    %c0_40 = arith.constant 0 : index
    %43 = vector.load %arg4[%c5_38, %c0_39, %c0_40] : memref<12x1x8xf32, #tpu.memory_space<vmem>>, vector<1x1x8xf32>
    %44 = vector.shape_cast %43 : vector<1x1x8xf32> to vector<1x8xf32>
    %45 = vector.broadcast %44 : vector<1x8xf32> to vector<8x8xf32>
    %46 = arith.addf %42, %45 : vector<8x8xf32>
    %c6 = arith.constant 6 : index
    %c0_41 = arith.constant 0 : index
    %c0_42 = arith.constant 0 : index
    %47 = vector.load %arg3[%c6, %c0_41, %c0_42] : memref<12x32x8xbf16, #tpu.memory_space<vmem>>, vector<1x32x8xbf16>
    %48 = vector.shape_cast %47 : vector<1x32x8xbf16> to vector<32x8xbf16>
    %cst_43 = arith.constant dense<0.000000e+00> : vector<8x8xf32>
    %49 = tpu.matmul %2, %48, %cst_43 {dimension_numbers = #tpu.dot_dimension_numbers<[1], [0], [0], [1], [0, 0, 1, 1], [], []>} : vector<8x32xbf16>, vector<32x8xbf16>, vector<8x8xf32> -> vector<8x8xf32>
    %c6_44 = arith.constant 6 : index
    %c0_45 = arith.constant 0 : index
    %c0_46 = arith.constant 0 : index
    %50 = vector.load %arg4[%c6_44, %c0_45, %c0_46] : memref<12x1x8xf32, #tpu.memory_space<vmem>>, vector<1x1x8xf32>
    %51 = vector.shape_cast %50 : vector<1x1x8xf32> to vector<1x8xf32>
    %52 = vector.broadcast %51 : vector<1x8xf32> to vector<8x8xf32>
    %53 = arith.addf %49, %52 : vector<8x8xf32>
    %c7 = arith.constant 7 : index
    %c0_47 = arith.constant 0 : index
    %c0_48 = arith.constant 0 : index
    %54 = vector.load %arg3[%c7, %c0_47, %c0_48] : memref<12x32x8xbf16, #tpu.memory_space<vmem>>, vector<1x32x8xbf16>
    %55 = vector.shape_cast %54 : vector<1x32x8xbf16> to vector<32x8xbf16>
    %cst_49 = arith.constant dense<0.000000e+00> : vector<8x8xf32>
    %56 = tpu.matmul %2, %55, %cst_49 {dimension_numbers = #tpu.dot_dimension_numbers<[1], [0], [0], [1], [0, 0, 1, 1], [], []>} : vector<8x32xbf16>, vector<32x8xbf16>, vector<8x8xf32> -> vector<8x8xf32>
    %c7_50 = arith.constant 7 : index
    %c0_51 = arith.constant 0 : index
    %c0_52 = arith.constant 0 : index
    %57 = vector.load %arg4[%c7_50, %c0_51, %c0_52] : memref<12x1x8xf32, #tpu.memory_space<vmem>>, vector<1x1x8xf32>
    %58 = vector.shape_cast %57 : vector<1x1x8xf32> to vector<1x8xf32>
    %59 = vector.broadcast %58 : vector<1x8xf32> to vector<8x8xf32>
    %60 = arith.addf %56, %59 : vector<8x8xf32>
    %c8 = arith.constant 8 : index
    %c0_53 = arith.constant 0 : index
    %c0_54 = arith.constant 0 : index
    %61 = vector.load %arg3[%c8, %c0_53, %c0_54] : memref<12x32x8xbf16, #tpu.memory_space<vmem>>, vector<1x32x8xbf16>
    %62 = vector.shape_cast %61 : vector<1x32x8xbf16> to vector<32x8xbf16>
    %cst_55 = arith.constant dense<0.000000e+00> : vector<8x8xf32>
    %63 = tpu.matmul %2, %62, %cst_55 {dimension_numbers = #tpu.dot_dimension_numbers<[1], [0], [0], [1], [0, 0, 1, 1], [], []>} : vector<8x32xbf16>, vector<32x8xbf16>, vector<8x8xf32> -> vector<8x8xf32>
    %c8_56 = arith.constant 8 : index
    %c0_57 = arith.constant 0 : index
    %c0_58 = arith.constant 0 : index
    %64 = vector.load %arg4[%c8_56, %c0_57, %c0_58] : memref<12x1x8xf32, #tpu.memory_space<vmem>>, vector<1x1x8xf32>
    %65 = vector.shape_cast %64 : vector<1x1x8xf32> to vector<1x8xf32>
    %66 = vector.broadcast %65 : vector<1x8xf32> to vector<8x8xf32>
    %67 = arith.addf %63, %66 : vector<8x8xf32>
    %c9 = arith.constant 9 : index
    %c0_59 = arith.constant 0 : index
    %c0_60 = arith.constant 0 : index
    %68 = vector.load %arg3[%c9, %c0_59, %c0_60] : memref<12x32x8xbf16, #tpu.memory_space<vmem>>, vector<1x32x8xbf16>
    %69 = vector.shape_cast %68 : vector<1x32x8xbf16> to vector<32x8xbf16>
    %cst_61 = arith.constant dense<0.000000e+00> : vector<8x8xf32>
    %70 = tpu.matmul %2, %69, %cst_61 {dimension_numbers = #tpu.dot_dimension_numbers<[1], [0], [0], [1], [0, 0, 1, 1], [], []>} : vector<8x32xbf16>, vector<32x8xbf16>, vector<8x8xf32> -> vector<8x8xf32>
    %c9_62 = arith.constant 9 : index
    %c0_63 = arith.constant 0 : index
    %c0_64 = arith.constant 0 : index
    %71 = vector.load %arg4[%c9_62, %c0_63, %c0_64] : memref<12x1x8xf32, #tpu.memory_space<vmem>>, vector<1x1x8xf32>
    %72 = vector.shape_cast %71 : vector<1x1x8xf32> to vector<1x8xf32>
    %73 = vector.broadcast %72 : vector<1x8xf32> to vector<8x8xf32>
    %74 = arith.addf %70, %73 : vector<8x8xf32>
    %c10 = arith.constant 10 : index
    %c0_65 = arith.constant 0 : index
    %c0_66 = arith.constant 0 : index
    %75 = vector.load %arg3[%c10, %c0_65, %c0_66] : memref<12x32x8xbf16, #tpu.memory_space<vmem>>, vector<1x32x8xbf16>
    %76 = vector.shape_cast %75 : vector<1x32x8xbf16> to vector<32x8xbf16>
    %cst_67 = arith.constant dense<0.000000e+00> : vector<8x8xf32>
    %77 = tpu.matmul %2, %76, %cst_67 {dimension_numbers = #tpu.dot_dimension_numbers<[1], [0], [0], [1], [0, 0, 1, 1], [], []>} : vector<8x32xbf16>, vector<32x8xbf16>, vector<8x8xf32> -> vector<8x8xf32>
    %c10_68 = arith.constant 10 : index
    %c0_69 = arith.constant 0 : index
    %c0_70 = arith.constant 0 : index
    %78 = vector.load %arg4[%c10_68, %c0_69, %c0_70] : memref<12x1x8xf32, #tpu.memory_space<vmem>>, vector<1x1x8xf32>
    %79 = vector.shape_cast %78 : vector<1x1x8xf32> to vector<1x8xf32>
    %80 = vector.broadcast %79 : vector<1x8xf32> to vector<8x8xf32>
    %81 = arith.addf %77, %80 : vector<8x8xf32>
    %c11 = arith.constant 11 : index
    %c0_71 = arith.constant 0 : index
    %c0_72 = arith.constant 0 : index
    %82 = vector.load %arg3[%c11, %c0_71, %c0_72] : memref<12x32x8xbf16, #tpu.memory_space<vmem>>, vector<1x32x8xbf16>
    %83 = vector.shape_cast %82 : vector<1x32x8xbf16> to vector<32x8xbf16>
    %cst_73 = arith.constant dense<0.000000e+00> : vector<8x8xf32>
    %84 = tpu.matmul %2, %83, %cst_73 {dimension_numbers = #tpu.dot_dimension_numbers<[1], [0], [0], [1], [0, 0, 1, 1], [], []>} : vector<8x32xbf16>, vector<32x8xbf16>, vector<8x8xf32> -> vector<8x8xf32>
    %c11_74 = arith.constant 11 : index
    %c0_75 = arith.constant 0 : index
    %c0_76 = arith.constant 0 : index
    %85 = vector.load %arg4[%c11_74, %c0_75, %c0_76] : memref<12x1x8xf32, #tpu.memory_space<vmem>>, vector<1x1x8xf32>
    %86 = vector.shape_cast %85 : vector<1x1x8xf32> to vector<1x8xf32>
    %87 = vector.broadcast %86 : vector<1x8xf32> to vector<8x8xf32>
    %88 = arith.addf %84, %87 : vector<8x8xf32>
    %c0_77 = arith.constant 0 : index
    %c0_78 = arith.constant 0 : index
    %89 = vector.load %arg6[%c0_77, %c0_78] : memref<1x32xf32, #tpu.memory_space<vmem>>, vector<1x32xf32>
    %cst_79 = arith.constant -1.000000e+09 : f32
    %90 = vector.broadcast %cst_79 : f32 to vector<8x8xf32>
    %91 = arith.mulf %4, %90 : vector<8x8xf32>
    %92 = arith.truncf %11 : vector<8x8xf32> to vector<8x8xbf16>
    %93 = arith.truncf %39 : vector<8x8xf32> to vector<8x8xbf16>
    %cst_80 = arith.constant dense<0.000000e+00> : vector<8x8xf32>
    %94 = tpu.matmul %92, %93, %cst_80 {dimension_numbers = #tpu.dot_dimension_numbers<[1], [1], [0], [0], [0, 0, 1, 0], [], []>} : vector<8x8xbf16>, vector<8x8xbf16>, vector<8x8xf32> -> vector<8x8xf32>
    %95 = arith.addf %94, %91 : vector<8x8xf32>
    %cst_81 = arith.constant dense<0xFF800000> : vector<8xf32>
    %96 = vector.multi_reduction <maximumf>, %95, %cst_81 [1] : vector<8x8xf32> to vector<8xf32>
    %97 = vector.shape_cast %96 : vector<8xf32> to vector<8x1xf32>
    %98 = vector.broadcast %97 : vector<8x1xf32> to vector<8x8xf32>
    %99 = arith.subf %95, %98 : vector<8x8xf32>
    %100 = math.exp %99 : vector<8x8xf32>
    %cst_82 = arith.constant dense<0.000000e+00> : vector<8xf32>
    %101 = vector.multi_reduction <add>, %100, %cst_82 [1] : vector<8x8xf32> to vector<8xf32>
    %102 = vector.shape_cast %101 : vector<8xf32> to vector<8x1xf32>
    %103 = tpu.reciprocal %102 {approx = true} : vector<8x1xf32> -> vector<8x1xf32>
    %104 = vector.broadcast %103 : vector<8x1xf32> to vector<8x8xf32>
    %105 = arith.mulf %100, %104 : vector<8x8xf32>
    %c0_83 = arith.constant 0 : index
    %c0_84 = arith.constant 0 : index
    %c0_85 = arith.constant 0 : index
    %c0_86 = arith.constant 0 : index
    %106 = vector.load %arg16[%c0_83, %c0_84, %c0_85, %c0_86] : memref<1x4x8x8xf32, #tpu.memory_space<vmem>>, vector<1x1x8x8xf32>
    %107 = vector.shape_cast %106 : vector<1x1x8x8xf32> to vector<8x8xf32>
    %108 = vector.shape_cast %105 : vector<8x8xf32> to vector<1x1x8x8xf32>
    tpu.vector_store %arg16[%c0_83, %c0_84, %c0_85, %c0_86], %108 {strides = array<i32>} : memref<1x4x8x8xf32, #tpu.memory_space<vmem>>, vector<1x1x8x8xf32>,
    %109 = arith.truncf %105 : vector<8x8xf32> to vector<8x8xbf16>
    %110 = arith.truncf %67 : vector<8x8xf32> to vector<8x8xbf16>
    %cst_87 = arith.constant dense<0.000000e+00> : vector<8x8xf32>
    %111 = tpu.matmul %109, %110, %cst_87 {dimension_numbers = #tpu.dot_dimension_numbers<[1], [0], [0], [1], [0, 0, 1, 1], [], []>} : vector<8x8xbf16>, vector<8x8xbf16>, vector<8x8xf32> -> vector<8x8xf32>
    %112 = arith.truncf %111 : vector<8x8xf32> to vector<8x8xbf16>
    %c0_88 = arith.constant 0 : index
    %c0_89 = arith.constant 0 : index
    %c0_90 = arith.constant 0 : index
    %113 = vector.load %arg5[%c0_88, %c0_89, %c0_90] : memref<4x8x32xbf16, #tpu.memory_space<vmem>>, vector<1x8x32xbf16>
    %114 = vector.shape_cast %113 : vector<1x8x32xbf16> to vector<8x32xbf16>
    %cst_91 = arith.constant dense<0.000000e+00> : vector<8x32xf32>
    %115 = tpu.matmul %112, %114, %cst_91 {dimension_numbers = #tpu.dot_dimension_numbers<[1], [0], [0], [1], [0, 0, 1, 1], [], []>} : vector<8x8xbf16>, vector<8x32xbf16>, vector<8x32xf32> -> vector<8x32xf32>
    %116 = arith.truncf %18 : vector<8x8xf32> to vector<8x8xbf16>
    %117 = arith.truncf %46 : vector<8x8xf32> to vector<8x8xbf16>
    %cst_92 = arith.constant dense<0.000000e+00> : vector<8x8xf32>
    %118 = tpu.matmul %116, %117, %cst_92 {dimension_numbers = #tpu.dot_dimension_numbers<[1], [1], [0], [0], [0, 0, 1, 0], [], []>} : vector<8x8xbf16>, vector<8x8xbf16>, vector<8x8xf32> -> vector<8x8xf32>
    %119 = arith.addf %118, %91 : vector<8x8xf32>
    %cst_93 = arith.constant dense<0xFF800000> : vector<8xf32>
    %120 = vector.multi_reduction <maximumf>, %119, %cst_93 [1] : vector<8x8xf32> to vector<8xf32>
    %121 = vector.shape_cast %120 : vector<8xf32> to vector<8x1xf32>
    %122 = vector.broadcast %121 : vector<8x1xf32> to vector<8x8xf32>
    %123 = arith.subf %119, %122 : vector<8x8xf32>
    %124 = math.exp %123 : vector<8x8xf32>
    %cst_94 = arith.constant dense<0.000000e+00> : vector<8xf32>
    %125 = vector.multi_reduction <add>, %124, %cst_94 [1] : vector<8x8xf32> to vector<8xf32>
    %126 = vector.shape_cast %125 : vector<8xf32> to vector<8x1xf32>
    %127 = tpu.reciprocal %126 {approx = true} : vector<8x1xf32> -> vector<8x1xf32>
    %128 = vector.broadcast %127 : vector<8x1xf32> to vector<8x8xf32>
    %129 = arith.mulf %124, %128 : vector<8x8xf32>
    %c0_95 = arith.constant 0 : index
    %c1_96 = arith.constant 1 : index
    %c0_97 = arith.constant 0 : index
    %c0_98 = arith.constant 0 : index
    %130 = vector.load %arg16[%c0_95, %c1_96, %c0_97, %c0_98] : memref<1x4x8x8xf32, #tpu.memory_space<vmem>>, vector<1x1x8x8xf32>
    %131 = vector.shape_cast %130 : vector<1x1x8x8xf32> to vector<8x8xf32>
    %132 = vector.shape_cast %129 : vector<8x8xf32> to vector<1x1x8x8xf32>
    tpu.vector_store %arg16[%c0_95, %c1_96, %c0_97, %c0_98], %132 {strides = array<i32>} : memref<1x4x8x8xf32, #tpu.memory_space<vmem>>, vector<1x1x8x8xf32>,
    %133 = arith.truncf %129 : vector<8x8xf32> to vector<8x8xbf16>
    %134 = arith.truncf %74 : vector<8x8xf32> to vector<8x8xbf16>
    %cst_99 = arith.constant dense<0.000000e+00> : vector<8x8xf32>
    %135 = tpu.matmul %133, %134, %cst_99 {dimension_numbers = #tpu.dot_dimension_numbers<[1], [0], [0], [1], [0, 0, 1, 1], [], []>} : vector<8x8xbf16>, vector<8x8xbf16>, vector<8x8xf32> -> vector<8x8xf32>
    %136 = arith.truncf %135 : vector<8x8xf32> to vector<8x8xbf16>
    %c1_100 = arith.constant 1 : index
    %c0_101 = arith.constant 0 : index
    %c0_102 = arith.constant 0 : index
    %137 = vector.load %arg5[%c1_100, %c0_101, %c0_102] : memref<4x8x32xbf16, #tpu.memory_space<vmem>>, vector<1x8x32xbf16>
    %138 = vector.shape_cast %137 : vector<1x8x32xbf16> to vector<8x32xbf16>
    %cst_103 = arith.constant dense<0.000000e+00> : vector<8x32xf32>
    %139 = tpu.matmul %136, %138, %cst_103 {dimension_numbers = #tpu.dot_dimension_numbers<[1], [0], [0], [1], [0, 0, 1, 1], [], []>} : vector<8x8xbf16>, vector<8x32xbf16>, vector<8x32xf32> -> vector<8x32xf32>
    %140 = arith.addf %115, %139 : vector<8x32xf32>
    %141 = arith.truncf %25 : vector<8x8xf32> to vector<8x8xbf16>
    %142 = arith.truncf %53 : vector<8x8xf32> to vector<8x8xbf16>
    %cst_104 = arith.constant dense<0.000000e+00> : vector<8x8xf32>
    %143 = tpu.matmul %141, %142, %cst_104 {dimension_numbers = #tpu.dot_dimension_numbers<[1], [1], [0], [0], [0, 0, 1, 0], [], []>} : vector<8x8xbf16>, vector<8x8xbf16>, vector<8x8xf32> -> vector<8x8xf32>
    %144 = arith.addf %143, %91 : vector<8x8xf32>
    %cst_105 = arith.constant dense<0xFF800000> : vector<8xf32>
    %145 = vector.multi_reduction <maximumf>, %144, %cst_105 [1] : vector<8x8xf32> to vector<8xf32>
    %146 = vector.shape_cast %145 : vector<8xf32> to vector<8x1xf32>
    %147 = vector.broadcast %146 : vector<8x1xf32> to vector<8x8xf32>
    %148 = arith.subf %144, %147 : vector<8x8xf32>
    %149 = math.exp %148 : vector<8x8xf32>
    %cst_106 = arith.constant dense<0.000000e+00> : vector<8xf32>
    %150 = vector.multi_reduction <add>, %149, %cst_106 [1] : vector<8x8xf32> to vector<8xf32>
    %151 = vector.shape_cast %150 : vector<8xf32> to vector<8x1xf32>
    %152 = tpu.reciprocal %151 {approx = true} : vector<8x1xf32> -> vector<8x1xf32>
    %153 = vector.broadcast %152 : vector<8x1xf32> to vector<8x8xf32>
    %154 = arith.mulf %149, %153 : vector<8x8xf32>
    %c0_107 = arith.constant 0 : index
    %c2_108 = arith.constant 2 : index
    %c0_109 = arith.constant 0 : index
    %c0_110 = arith.constant 0 : index
    %155 = vector.load %arg16[%c0_107, %c2_108, %c0_109, %c0_110] : memref<1x4x8x8xf32, #tpu.memory_space<vmem>>, vector<1x1x8x8xf32>
    %156 = vector.shape_cast %155 : vector<1x1x8x8xf32> to vector<8x8xf32>
    %157 = vector.shape_cast %154 : vector<8x8xf32> to vector<1x1x8x8xf32>
    tpu.vector_store %arg16[%c0_107, %c2_108, %c0_109, %c0_110], %157 {strides = array<i32>} : memref<1x4x8x8xf32, #tpu.memory_space<vmem>>, vector<1x1x8x8xf32>,
    %158 = arith.truncf %154 : vector<8x8xf32> to vector<8x8xbf16>
    %159 = arith.truncf %81 : vector<8x8xf32> to vector<8x8xbf16>
    %cst_111 = arith.constant dense<0.000000e+00> : vector<8x8xf32>
    %160 = tpu.matmul %158, %159, %cst_111 {dimension_numbers = #tpu.dot_dimension_numbers<[1], [0], [0], [1], [0, 0, 1, 1], [], []>} : vector<8x8xbf16>, vector<8x8xbf16>, vector<8x8xf32> -> vector<8x8xf32>
    %161 = arith.truncf %160 : vector<8x8xf32> to vector<8x8xbf16>
    %c2_112 = arith.constant 2 : index
    %c0_113 = arith.constant 0 : index
    %c0_114 = arith.constant 0 : index
    %162 = vector.load %arg5[%c2_112, %c0_113, %c0_114] : memref<4x8x32xbf16, #tpu.memory_space<vmem>>, vector<1x8x32xbf16>
    %163 = vector.shape_cast %162 : vector<1x8x32xbf16> to vector<8x32xbf16>
    %cst_115 = arith.constant dense<0.000000e+00> : vector<8x32xf32>
    %164 = tpu.matmul %161, %163, %cst_115 {dimension_numbers = #tpu.dot_dimension_numbers<[1], [0], [0], [1], [0, 0, 1, 1], [], []>} : vector<8x8xbf16>, vector<8x32xbf16>, vector<8x32xf32> -> vector<8x32xf32>
    %165 = arith.addf %140, %164 : vector<8x32xf32>
    %166 = arith.truncf %32 : vector<8x8xf32> to vector<8x8xbf16>
    %167 = arith.truncf %60 : vector<8x8xf32> to vector<8x8xbf16>
    %cst_116 = arith.constant dense<0.000000e+00> : vector<8x8xf32>
    %168 = tpu.matmul %166, %167, %cst_116 {dimension_numbers = #tpu.dot_dimension_numbers<[1], [1], [0], [0], [0, 0, 1, 0], [], []>} : vector<8x8xbf16>, vector<8x8xbf16>, vector<8x8xf32> -> vector<8x8xf32>
    %169 = arith.addf %168, %91 : vector<8x8xf32>
    %cst_117 = arith.constant dense<0xFF800000> : vector<8xf32>
    %170 = vector.multi_reduction <maximumf>, %169, %cst_117 [1] : vector<8x8xf32> to vector<8xf32>
    %171 = vector.shape_cast %170 : vector<8xf32> to vector<8x1xf32>
    %172 = vector.broadcast %171 : vector<8x1xf32> to vector<8x8xf32>
    %173 = arith.subf %169, %172 : vector<8x8xf32>
    %174 = math.exp %173 : vector<8x8xf32>
    %cst_118 = arith.constant dense<0.000000e+00> : vector<8xf32>
    %175 = vector.multi_reduction <add>, %174, %cst_118 [1] : vector<8x8xf32> to vector<8xf32>
    %176 = vector.shape_cast %175 : vector<8xf32> to vector<8x1xf32>
    %177 = tpu.reciprocal %176 {approx = true} : vector<8x1xf32> -> vector<8x1xf32>
    %178 = vector.broadcast %177 : vector<8x1xf32> to vector<8x8xf32>
    %179 = arith.mulf %174, %178 : vector<8x8xf32>
    %c0_119 = arith.constant 0 : index
    %c3_120 = arith.constant 3 : index
    %c0_121 = arith.constant 0 : index
    %c0_122 = arith.constant 0 : index
    %180 = vector.load %arg16[%c0_119, %c3_120, %c0_121, %c0_122] : memref<1x4x8x8xf32, #tpu.memory_space<vmem>>, vector<1x1x8x8xf32>
    %181 = vector.shape_cast %180 : vector<1x1x8x8xf32> to vector<8x8xf32>
    %182 = vector.shape_cast %179 : vector<8x8xf32> to vector<1x1x8x8xf32>
    tpu.vector_store %arg16[%c0_119, %c3_120, %c0_121, %c0_122], %182 {strides = array<i32>} : memref<1x4x8x8xf32, #tpu.memory_space<vmem>>, vector<1x1x8x8xf32>,
    %183 = arith.truncf %179 : vector<8x8xf32> to vector<8x8xbf16>
    %184 = arith.truncf %88 : vector<8x8xf32> to vector<8x8xbf16>
    %cst_123 = arith.constant dense<0.000000e+00> : vector<8x8xf32>
    %185 = tpu.matmul %183, %184, %cst_123 {dimension_numbers = #tpu.dot_dimension_numbers<[1], [0], [0], [1], [0, 0, 1, 1], [], []>} : vector<8x8xbf16>, vector<8x8xbf16>, vector<8x8xf32> -> vector<8x8xf32>
    %186 = arith.truncf %185 : vector<8x8xf32> to vector<8x8xbf16>
    %c3_124 = arith.constant 3 : index
    %c0_125 = arith.constant 0 : index
    %c0_126 = arith.constant 0 : index
    %187 = vector.load %arg5[%c3_124, %c0_125, %c0_126] : memref<4x8x32xbf16, #tpu.memory_space<vmem>>, vector<1x8x32xbf16>
    %188 = vector.shape_cast %187 : vector<1x8x32xbf16> to vector<8x32xbf16>
    %cst_127 = arith.constant dense<0.000000e+00> : vector<8x32xf32>
    %189 = tpu.matmul %186, %188, %cst_127 {dimension_numbers = #tpu.dot_dimension_numbers<[1], [0], [0], [1], [0, 0, 1, 1], [], []>} : vector<8x8xbf16>, vector<8x32xbf16>, vector<8x32xf32> -> vector<8x32xf32>
    %190 = arith.addf %165, %189 : vector<8x32xf32>
    %191 = vector.broadcast %89 : vector<1x32xf32> to vector<8x32xf32>
    %192 = arith.addf %190, %191 : vector<8x32xf32>
    %c0_128 = arith.constant 0 : index
    %c0_129 = arith.constant 0 : index
    %193 = vector.load %arg7[%c0_128, %c0_129] : memref<1x32xf32, #tpu.memory_space<vmem>>, vector<1x32xf32>
    %c0_130 = arith.constant 0 : index
    %c0_131 = arith.constant 0 : index
    %194 = vector.load %arg8[%c0_130, %c0_131] : memref<1x32xf32, #tpu.memory_space<vmem>>, vector<1x32xf32>
    %195 = arith.addf %192, %1 : vector<8x32xf32>
    %cst_132 = arith.constant dense<0.000000e+00> : vector<8xf32>
    %196 = vector.multi_reduction <add>, %195, %cst_132 [1] : vector<8x32xf32> to vector<8xf32>
    %197 = vector.shape_cast %196 : vector<8xf32> to vector<8x1xf32>
    %cst_133 = arith.constant 3.200000e+01 : f32
    %198 = vector.broadcast %cst_133 : f32 to vector<8x1xf32>
    %199 = arith.divf %197, %198 : vector<8x1xf32>
    %200 = vector.broadcast %199 : vector<8x1xf32> to vector<8x32xf32>
    %201 = arith.subf %195, %200 : vector<8x32xf32>
    %202 = arith.mulf %201, %201 : vector<8x32xf32>
    %cst_134 = arith.constant dense<0.000000e+00> : vector<8xf32>
    %203 = vector.multi_reduction <add>, %202, %cst_134 [1] : vector<8x32xf32> to vector<8xf32>
    %204 = vector.shape_cast %203 : vector<8xf32> to vector<8x1xf32>
    %cst_135 = arith.constant 3.200000e+01 : f32
    %205 = vector.broadcast %cst_135 : f32 to vector<8x1xf32>
    %206 = arith.divf %204, %205 : vector<8x1xf32>
    %207 = vector.broadcast %199 : vector<8x1xf32> to vector<8x32xf32>
    %208 = arith.subf %195, %207 : vector<8x32xf32>
    %cst_136 = arith.constant 9.99999974E-6 : f32
    %209 = vector.broadcast %cst_136 : f32 to vector<8x1xf32>
    %210 = arith.addf %206, %209 : vector<8x1xf32>
    %211 = math.rsqrt %210 : vector<8x1xf32>
    %212 = vector.broadcast %211 : vector<8x1xf32> to vector<8x32xf32>
    %213 = arith.mulf %208, %212 : vector<8x32xf32>
    %214 = vector.broadcast %193 : vector<1x32xf32> to vector<8x32xf32>
    %215 = arith.mulf %213, %214 : vector<8x32xf32>
    %216 = vector.broadcast %194 : vector<1x32xf32> to vector<8x32xf32>
    %217 = arith.addf %215, %216 : vector<8x32xf32>
    %218 = arith.truncf %217 : vector<8x32xf32> to vector<8x32xbf16>
    %c0_137 = arith.constant 0 : index
    %c0_138 = arith.constant 0 : index
    %219 = vector.load %arg9[%c0_137, %c0_138] : memref<32x64xbf16, #tpu.memory_space<vmem>>, vector<32x64xbf16>
    %cst_139 = arith.constant dense<0.000000e+00> : vector<8x64xf32>
    %220 = tpu.matmul %218, %219, %cst_139 {dimension_numbers = #tpu.dot_dimension_numbers<[1], [0], [0], [1], [0, 0, 1, 1], [], []>} : vector<8x32xbf16>, vector<32x64xbf16>, vector<8x64xf32> -> vector<8x64xf32>
    %c0_140 = arith.constant 0 : index
    %c0_141 = arith.constant 0 : index
    %221 = vector.load %arg10[%c0_140, %c0_141] : memref<1x64xf32, #tpu.memory_space<vmem>>, vector<1x64xf32>
    %222 = vector.broadcast %221 : vector<1x64xf32> to vector<8x64xf32>
    %223 = arith.addf %220, %222 : vector<8x64xf32>
    %cst_142 = arith.constant 0.000000e+00 : f32
    %224 = vector.broadcast %cst_142 : f32 to vector<8x64xf32>
    %225 = arith.maximumf %223, %224 : vector<8x64xf32>
    %226 = arith.truncf %225 : vector<8x64xf32> to vector<8x64xbf16>
    %c0_143 = arith.constant 0 : index
    %c0_144 = arith.constant 0 : index
    %227 = vector.load %arg11[%c0_143, %c0_144] : memref<64x32xbf16, #tpu.memory_space<vmem>>, vector<64x32xbf16>
    %cst_145 = arith.constant dense<0.000000e+00> : vector<8x32xf32>
    %228 = tpu.matmul %226, %227, %cst_145 {dimension_numbers = #tpu.dot_dimension_numbers<[1], [0], [0], [1], [0, 0, 1, 1], [], []>} : vector<8x64xbf16>, vector<64x32xbf16>, vector<8x32xf32> -> vector<8x32xf32>
    %c0_146 = arith.constant 0 : index
    %c0_147 = arith.constant 0 : index
    %229 = vector.load %arg12[%c0_146, %c0_147] : memref<1x32xf32, #tpu.memory_space<vmem>>, vector<1x32xf32>
    %230 = vector.broadcast %229 : vector<1x32xf32> to vector<8x32xf32>
    %231 = arith.addf %228, %230 : vector<8x32xf32>
    %c0_148 = arith.constant 0 : index
    %c0_149 = arith.constant 0 : index
    %232 = vector.load %arg13[%c0_148, %c0_149] : memref<1x32xf32, #tpu.memory_space<vmem>>, vector<1x32xf32>
    %c0_150 = arith.constant 0 : index
    %c0_151 = arith.constant 0 : index
    %233 = vector.load %arg14[%c0_150, %c0_151] : memref<1x32xf32, #tpu.memory_space<vmem>>, vector<1x32xf32>
    %234 = arith.addf %231, %217 : vector<8x32xf32>
    %cst_152 = arith.constant dense<0.000000e+00> : vector<8xf32>
    %235 = vector.multi_reduction <add>, %234, %cst_152 [1] : vector<8x32xf32> to vector<8xf32>
    %236 = vector.shape_cast %235 : vector<8xf32> to vector<8x1xf32>
    %cst_153 = arith.constant 3.200000e+01 : f32
    %237 = vector.broadcast %cst_153 : f32 to vector<8x1xf32>
    %238 = arith.divf %236, %237 : vector<8x1xf32>
    %239 = vector.broadcast %238 : vector<8x1xf32> to vector<8x32xf32>
    %240 = arith.subf %234, %239 : vector<8x32xf32>
    %241 = arith.mulf %240, %240 : vector<8x32xf32>
    %cst_154 = arith.constant dense<0.000000e+00> : vector<8xf32>
    %242 = vector.multi_reduction <add>, %241, %cst_154 [1] : vector<8x32xf32> to vector<8xf32>
    %243 = vector.shape_cast %242 : vector<8xf32> to vector<8x1xf32>
    %cst_155 = arith.constant 3.200000e+01 : f32
    %244 = vector.broadcast %cst_155 : f32 to vector<8x1xf32>
    %245 = arith.divf %243, %244 : vector<8x1xf32>
    %246 = vector.broadcast %238 : vector<8x1xf32> to vector<8x32xf32>
    %247 = arith.subf %234, %246 : vector<8x32xf32>
    %cst_156 = arith.constant 9.99999974E-6 : f32
    %248 = vector.broadcast %cst_156 : f32 to vector<8x1xf32>
    %249 = arith.addf %245, %248 : vector<8x1xf32>
    %250 = math.rsqrt %249 : vector<8x1xf32>
    %251 = vector.broadcast %250 : vector<8x1xf32> to vector<8x32xf32>
    %252 = arith.mulf %247, %251 : vector<8x32xf32>
    %253 = vector.broadcast %232 : vector<1x32xf32> to vector<8x32xf32>
    %254 = arith.mulf %252, %253 : vector<8x32xf32>
    %255 = vector.broadcast %233 : vector<1x32xf32> to vector<8x32xf32>
    %256 = arith.addf %254, %255 : vector<8x32xf32>
    %c0_157 = arith.constant 0 : index
    %c0_158 = arith.constant 0 : index
    %c0_159 = arith.constant 0 : index
    %257 = vector.load %arg15[%c0_157, %c0_158, %c0_159] : memref<1x8x32xf32, #tpu.memory_space<vmem>>, vector<1x8x32xf32>
    %258 = vector.shape_cast %257 : vector<1x8x32xf32> to vector<8x32xf32>
    %259 = vector.shape_cast %256 : vector<8x32xf32> to vector<1x8x32xf32>
    tpu.vector_store %arg15[%c0_157, %c0_158, %c0_159], %259 {strides = array<i32>} : memref<1x8x32xf32, #tpu.memory_space<vmem>>, vector<1x8x32xf32>,
    return
  }
  func.func @transform_0(%arg0: i32) -> (i32, i32, i32) {
    %c0_i32 = arith.constant 0 : i32
    %c0_i32_0 = arith.constant 0 : i32
    %c0_i32_1 = arith.constant 0 : i32
    return %arg0, %c0_i32, %c0_i32_0 : i32, i32, i32
  }
  func.func @transform_1(%arg0: i32) -> (i32, i32, i32) {
    %c0_i32 = arith.constant 0 : i32
    %c0_i32_0 = arith.constant 0 : i32
    %c0_i32_1 = arith.constant 0 : i32
    return %arg0, %c0_i32, %c0_i32_0 : i32, i32, i32
  }
  func.func @transform_2(%arg0: i32) -> (i32, i32, i32) {
    %c0_i32 = arith.constant 0 : i32
    %c0_i32_0 = arith.constant 0 : i32
    %c0_i32_1 = arith.constant 0 : i32
    %c0_i32_2 = arith.constant 0 : i32
    return %c0_i32, %c0_i32_0, %c0_i32_1 : i32, i32, i32
  }
  func.func @transform_3(%arg0: i32) -> (i32, i32, i32) {
    %c0_i32 = arith.constant 0 : i32
    %c0_i32_0 = arith.constant 0 : i32
    %c0_i32_1 = arith.constant 0 : i32
    %c0_i32_2 = arith.constant 0 : i32
    return %c0_i32, %c0_i32_0, %c0_i32_1 : i32, i32, i32
  }
  func.func @transform_4(%arg0: i32) -> (i32, i32, i32) {
    %c0_i32 = arith.constant 0 : i32
    %c0_i32_0 = arith.constant 0 : i32
    %c0_i32_1 = arith.constant 0 : i32
    %c0_i32_2 = arith.constant 0 : i32
    return %c0_i32, %c0_i32_0, %c0_i32_1 : i32, i32, i32
  }
  func.func @transform_5(%arg0: i32) -> (i32, i32) {
    %c0_i32 = arith.constant 0 : i32
    %c0_i32_0 = arith.constant 0 : i32
    %c0_i32_1 = arith.constant 0 : i32
    return %c0_i32, %c0_i32_0 : i32, i32
  }
  func.func @transform_6(%arg0: i32) -> (i32, i32) {
    %c0_i32 = arith.constant 0 : i32
    %c0_i32_0 = arith.constant 0 : i32
    %c0_i32_1 = arith.constant 0 : i32
    return %c0_i32, %c0_i32_0 : i32, i32
  }
  func.func @transform_7(%arg0: i32) -> (i32, i32) {
    %c0_i32 = arith.constant 0 : i32
    %c0_i32_0 = arith.constant 0 : i32
    %c0_i32_1 = arith.constant 0 : i32
    return %c0_i32, %c0_i32_0 : i32, i32
  }
  func.func @transform_8(%arg0: i32) -> (i32, i32) {
    %c0_i32 = arith.constant 0 : i32
    %c0_i32_0 = arith.constant 0 : i32
    %c0_i32_1 = arith.constant 0 : i32
    return %c0_i32, %c0_i32_0 : i32, i32
  }
  func.func @transform_9(%arg0: i32) -> (i32, i32) {
    %c0_i32 = arith.constant 0 : i32
    %c0_i32_0 = arith.constant 0 : i32
    %c0_i32_1 = arith.constant 0 : i32
    return %c0_i32, %c0_i32_0 : i32, i32
  }
  func.func @transform_10(%arg0: i32) -> (i32, i32) {
    %c0_i32 = arith.constant 0 : i32
    %c0_i32_0 = arith.constant 0 : i32
    %c0_i32_1 = arith.constant 0 : i32
    return %c0_i32, %c0_i32_0 : i32, i32
  }
  func.func @transform_11(%arg0: i32) -> (i32, i32) {
    %c0_i32 = arith.constant 0 : i32
    %c0_i32_0 = arith.constant 0 : i32
    %c0_i32_1 = arith.constant 0 : i32
    return %c0_i32, %c0_i32_0 : i32, i32
  }
  func.func @transform_12(%arg0: i32) -> (i32, i32) {
    %c0_i32 = arith.constant 0 : i32
    %c0_i32_0 = arith.constant 0 : i32
    %c0_i32_1 = arith.constant 0 : i32
    return %c0_i32, %c0_i32_0 : i32, i32
  }
  func.func @transform_13(%arg0: i32) -> (i32, i32) {
    %c0_i32 = arith.constant 0 : i32
    %c0_i32_0 = arith.constant 0 : i32
    %c0_i32_1 = arith.constant 0 : i32
    return %c0_i32, %c0_i32_0 : i32, i32
  }
  func.func @transform_14(%arg0: i32) -> (i32, i32, i32) {
    %c0_i32 = arith.constant 0 : i32
    %c0_i32_0 = arith.constant 0 : i32
    %c0_i32_1 = arith.constant 0 : i32
    return %arg0, %c0_i32, %c0_i32_0 : i32, i32, i32
  }
  func.func @transform_15(%arg0: i32) -> (i32, i32, i32, i32) {
    %c0_i32 = arith.constant 0 : i32
    %c0_i32_0 = arith.constant 0 : i32
    %c0_i32_1 = arith.constant 0 : i32
    %c0_i32_2 = arith.constant 0 : i32
    return %arg0, %c0_i32, %c0_i32_0, %c0_i32_1 : i32, i32, i32, i32
  }
}

module attributes {stable_mosaic.version = 11 : i64} {
  func.func @_output_proj_kernel(%arg0: i32, %arg1: memref<1x8x32xf32, #tpu.memory_space<vmem>>, %arg2: memref<32x48xbf16, #tpu.memory_space<vmem>>, %arg3: memref<1x48xf32, #tpu.memory_space<vmem>>, %arg4: memref<1x8x48xf32, #tpu.memory_space<vmem>>) attributes {dimension_semantics = [#tpu.dimension_semantics<parallel>], iteration_bounds = array<i64: 2>, scalar_prefetch = 0 : i64, scratch_operands = 0 : i64, tpu.core_type = #tpu.core_type<tc>, window_params = [{transform_indices = @transform_0, window_bounds = array<i64: 1, 8, 32>}, {pipeline_mode = #tpu.pipeline_mode<synchronous>, transform_indices = @transform_1, window_bounds = array<i64: 32, 48>}, {pipeline_mode = #tpu.pipeline_mode<synchronous>, transform_indices = @transform_2, window_bounds = array<i64: 1, 48>}, {transform_indices = @transform_3, window_bounds = array<i64: 1, 8, 48>}]} {
    %c0 = arith.constant 0 : index
    %c0_0 = arith.constant 0 : index
    %c0_1 = arith.constant 0 : index
    %0 = vector.load %arg1[%c0, %c0_0, %c0_1] : memref<1x8x32xf32, #tpu.memory_space<vmem>>, vector<1x8x32xf32>
    %1 = vector.shape_cast %0 : vector<1x8x32xf32> to vector<8x32xf32>
    %2 = arith.truncf %1 : vector<8x32xf32> to vector<8x32xbf16>
    %c0_2 = arith.constant 0 : index
    %c0_3 = arith.constant 0 : index
    %3 = vector.load %arg2[%c0_2, %c0_3] : memref<32x48xbf16, #tpu.memory_space<vmem>>, vector<32x48xbf16>
    %cst = arith.constant dense<0.000000e+00> : vector<8x48xf32>
    %4 = tpu.matmul %2, %3, %cst {dimension_numbers = #tpu.dot_dimension_numbers<[1], [0], [0], [1], [0, 0, 1, 1], [], []>} : vector<8x32xbf16>, vector<32x48xbf16>, vector<8x48xf32> -> vector<8x48xf32>
    %c0_4 = arith.constant 0 : index
    %c0_5 = arith.constant 0 : index
    %5 = vector.load %arg3[%c0_4, %c0_5] : memref<1x48xf32, #tpu.memory_space<vmem>>, vector<1x48xf32>
    %6 = vector.broadcast %5 : vector<1x48xf32> to vector<8x48xf32>
    %7 = arith.addf %4, %6 : vector<8x48xf32>
    %c0_6 = arith.constant 0 : index
    %c0_7 = arith.constant 0 : index
    %c0_8 = arith.constant 0 : index
    %8 = vector.load %arg4[%c0_6, %c0_7, %c0_8] : memref<1x8x48xf32, #tpu.memory_space<vmem>>, vector<1x8x48xf32>
    %9 = vector.shape_cast %8 : vector<1x8x48xf32> to vector<8x48xf32>
    %10 = vector.shape_cast %7 : vector<8x48xf32> to vector<1x8x48xf32>
    tpu.vector_store %arg4[%c0_6, %c0_7, %c0_8], %10 {strides = array<i32>} : memref<1x8x48xf32, #tpu.memory_space<vmem>>, vector<1x8x48xf32>,
    return
  }
  func.func @transform_0(%arg0: i32) -> (i32, i32, i32) {
    %c0_i32 = arith.constant 0 : i32
    %c0_i32_0 = arith.constant 0 : i32
    %c0_i32_1 = arith.constant 0 : i32
    return %arg0, %c0_i32, %c0_i32_0 : i32, i32, i32
  }
  func.func @transform_1(%arg0: i32) -> (i32, i32) {
    %c0_i32 = arith.constant 0 : i32
    %c0_i32_0 = arith.constant 0 : i32
    %c0_i32_1 = arith.constant 0 : i32
    return %c0_i32, %c0_i32_0 : i32, i32
  }
  func.func @transform_2(%arg0: i32) -> (i32, i32) {
    %c0_i32 = arith.constant 0 : i32
    %c0_i32_0 = arith.constant 0 : i32
    %c0_i32_1 = arith.constant 0 : i32
    return %c0_i32, %c0_i32_0 : i32, i32
  }
  func.func @transform_3(%arg0: i32) -> (i32, i32, i32) {
    %c0_i32 = arith.constant 0 : i32
    %c0_i32_0 = arith.constant 0 : i32
    %c0_i32_1 = arith.constant 0 : i32
    return %arg0, %c0_i32, %c0_i32_0 : i32, i32, i32
  }
}

module attributes {stable_mosaic.version = 11 : i64} {
  func.func @_decoder_block_kernel(%arg0: i32, %arg1: memref<1x8x32xf32, #tpu.memory_space<vmem>>, %arg2: memref<1x8x32xf32, #tpu.memory_space<vmem>>, %arg3: memref<1x8x8xf32, #tpu.memory_space<vmem>>, %arg4: memref<1x8x8xf32, #tpu.memory_space<vmem>>, %arg5: memref<12x32x8xbf16, #tpu.memory_space<vmem>>, %arg6: memref<12x1x8xf32, #tpu.memory_space<vmem>>, %arg7: memref<4x8x32xbf16, #tpu.memory_space<vmem>>, %arg8: memref<1x32xf32, #tpu.memory_space<vmem>>, %arg9: memref<1x32xf32, #tpu.memory_space<vmem>>, %arg10: memref<1x32xf32, #tpu.memory_space<vmem>>, %arg11: memref<4x32x8xbf16, #tpu.memory_space<vmem>>, %arg12: memref<4x1x8xf32, #tpu.memory_space<vmem>>, %arg13: memref<8x32x8xbf16, #tpu.memory_space<vmem>>, %arg14: memref<8x1x8xf32, #tpu.memory_space<vmem>>, %arg15: memref<4x8x32xbf16, #tpu.memory_space<vmem>>, %arg16: memref<1x32xf32, #tpu.memory_space<vmem>>, %arg17: memref<1x32xf32, #tpu.memory_space<vmem>>, %arg18: memref<1x32xf32, #tpu.memory_space<vmem>>, %arg19: memref<32x64xbf16, #tpu.memory_space<vmem>>, %arg20: memref<1x64xf32, #tpu.memory_space<vmem>>, %arg21: memref<64x32xbf16, #tpu.memory_space<vmem>>, %arg22: memref<1x32xf32, #tpu.memory_space<vmem>>, %arg23: memref<1x32xf32, #tpu.memory_space<vmem>>, %arg24: memref<1x32xf32, #tpu.memory_space<vmem>>, %arg25: memref<1x8x32xf32, #tpu.memory_space<vmem>>, %arg26: memref<1x4x8x8xf32, #tpu.memory_space<vmem>>, %arg27: memref<1x4x8x8xf32, #tpu.memory_space<vmem>>) attributes {dimension_semantics = [#tpu.dimension_semantics<parallel>], iteration_bounds = array<i64: 2>, scalar_prefetch = 0 : i64, scratch_operands = 0 : i64, tpu.core_type = #tpu.core_type<tc>, window_params = [{transform_indices = @transform_0, window_bounds = array<i64: 1, 8, 32>}, {transform_indices = @transform_1, window_bounds = array<i64: 1, 8, 32>}, {transform_indices = @transform_2, window_bounds = array<i64: 1, 8, 8>}, {transform_indices = @transform_3, window_bounds = array<i64: 1, 8, 8>}, {pipeline_mode = #tpu.pipeline_mode<synchronous>, transform_indices = @transform_4, window_bounds = array<i64: 12, 32, 8>}, {pipeline_mode = #tpu.pipeline_mode<synchronous>, transform_indices = @transform_5, window_bounds = array<i64: 12, 1, 8>}, {pipeline_mode = #tpu.pipeline_mode<synchronous>, transform_indices = @transform_6, window_bounds = array<i64: 4, 8, 32>}, {pipeline_mode = #tpu.pipeline_mode<synchronous>, transform_indices = @transform_7, window_bounds = array<i64: 1, 32>}, {pipeline_mode = #tpu.pipeline_mode<synchronous>, transform_indices = @transform_8, window_bounds = array<i64: 1, 32>}, {pipeline_mode = #tpu.pipeline_mode<synchronous>, transform_indices = @transform_9, window_bounds = array<i64: 1, 32>}, {pipeline_mode = #tpu.pipeline_mode<synchronous>, transform_indices = @transform_10, window_bounds = array<i64: 4, 32, 8>}, {pipeline_mode = #tpu.pipeline_mode<synchronous>, transform_indices = @transform_11, window_bounds = array<i64: 4, 1, 8>}, {pipeline_mode = #tpu.pipeline_mode<synchronous>, transform_indices = @transform_12, window_bounds = array<i64: 8, 32, 8>}, {pipeline_mode = #tpu.pipeline_mode<synchronous>, transform_indices = @transform_13, window_bounds = array<i64: 8, 1, 8>}, {pipeline_mode = #tpu.pipeline_mode<synchronous>, transform_indices = @transform_14, window_bounds = array<i64: 4, 8, 32>}, {pipeline_mode = #tpu.pipeline_mode<synchronous>, transform_indices = @transform_15, window_bounds = array<i64: 1, 32>}, {pipeline_mode = #tpu.pipeline_mode<synchronous>, transform_indices = @transform_16, window_bounds = array<i64: 1, 32>}, {pipeline_mode = #tpu.pipeline_mode<synchronous>, transform_indices = @transform_17, window_bounds = array<i64: 1, 32>}, {pipeline_mode = #tpu.pipeline_mode<synchronous>, transform_indices = @transform_18, window_bounds = array<i64: 32, 64>}, {pipeline_mode = #tpu.pipeline_mode<synchronous>, transform_indices = @transform_19, window_bounds = array<i64: 1, 64>}, {pipeline_mode = #tpu.pipeline_mode<synchronous>, transform_indices = @transform_20, window_bounds = array<i64: 64, 32>}, {pipeline_mode = #tpu.pipeline_mode<synchronous>, transform_indices = @transform_21, window_bounds = array<i64: 1, 32>}, {pipeline_mode = #tpu.pipeline_mode<synchronous>, transform_indices = @transform_22, window_bounds = array<i64: 1, 32>}, {pipeline_mode = #tpu.pipeline_mode<synchronous>, transform_indices = @transform_23, window_bounds = array<i64: 1, 32>}, {transform_indices = @transform_24, window_bounds = array<i64: 1, 8, 32>}, {transform_indices = @transform_25, window_bounds = array<i64: 1, 4, 8, 8>}, {transform_indices = @transform_26, window_bounds = array<i64: 1, 4, 8, 8>}]} {
    %c0 = arith.constant 0 : index
    %c0_0 = arith.constant 0 : index
    %c0_1 = arith.constant 0 : index
    %0 = vector.load %arg1[%c0, %c0_0, %c0_1] : memref<1x8x32xf32, #tpu.memory_space<vmem>>, vector<1x8x32xf32>
    %1 = vector.shape_cast %0 : vector<1x8x32xf32> to vector<8x32xf32>
    %2 = arith.truncf %1 : vector<8x32xf32> to vector<8x32xbf16>
    %c0_2 = arith.constant 0 : index
    %c0_3 = arith.constant 0 : index
    %c0_4 = arith.constant 0 : index
    %3 = vector.load %arg2[%c0_2, %c0_3, %c0_4] : memref<1x8x32xf32, #tpu.memory_space<vmem>>, vector<1x8x32xf32>
    %4 = vector.shape_cast %3 : vector<1x8x32xf32> to vector<8x32xf32>
    %5 = arith.truncf %4 : vector<8x32xf32> to vector<8x32xbf16>
    %c0_5 = arith.constant 0 : index
    %c0_6 = arith.constant 0 : index
    %c0_7 = arith.constant 0 : index
    %6 = vector.load %arg5[%c0_5, %c0_6, %c0_7] : memref<12x32x8xbf16, #tpu.memory_space<vmem>>, vector<1x32x8xbf16>
    %7 = vector.shape_cast %6 : vector<1x32x8xbf16> to vector<32x8xbf16>
    %cst = arith.constant dense<0.000000e+00> : vector<8x8xf32>
    %8 = tpu.matmul %2, %7, %cst {dimension_numbers = #tpu.dot_dimension_numbers<[1], [0], [0], [1], [0, 0, 1, 1], [], []>} : vector<8x32xbf16>, vector<32x8xbf16>, vector<8x8xf32> -> vector<8x8xf32>
    %c0_8 = arith.constant 0 : index
    %c0_9 = arith.constant 0 : index
    %c0_10 = arith.constant 0 : index
    %9 = vector.load %arg6[%c0_8, %c0_9, %c0_10] : memref<12x1x8xf32, #tpu.memory_space<vmem>>, vector<1x1x8xf32>
    %10 = vector.shape_cast %9 : vector<1x1x8xf32> to vector<1x8xf32>
    %11 = vector.broadcast %10 : vector<1x8xf32> to vector<8x8xf32>
    %12 = arith.addf %8, %11 : vector<8x8xf32>
    %c1 = arith.constant 1 : index
    %c0_11 = arith.constant 0 : index
    %c0_12 = arith.constant 0 : index
    %13 = vector.load %arg5[%c1, %c0_11, %c0_12] : memref<12x32x8xbf16, #tpu.memory_space<vmem>>, vector<1x32x8xbf16>
    %14 = vector.shape_cast %13 : vector<1x32x8xbf16> to vector<32x8xbf16>
    %cst_13 = arith.constant dense<0.000000e+00> : vector<8x8xf32>
    %15 = tpu.matmul %2, %14, %cst_13 {dimension_numbers = #tpu.dot_dimension_numbers<[1], [0], [0], [1], [0, 0, 1, 1], [], []>} : vector<8x32xbf16>, vector<32x8xbf16>, vector<8x8xf32> -> vector<8x8xf32>
    %c1_14 = arith.constant 1 : index
    %c0_15 = arith.constant 0 : index
    %c0_16 = arith.constant 0 : index
    %16 = vector.load %arg6[%c1_14, %c0_15, %c0_16] : memref<12x1x8xf32, #tpu.memory_space<vmem>>, vector<1x1x8xf32>
    %17 = vector.shape_cast %16 : vector<1x1x8xf32> to vector<1x8xf32>
    %18 = vector.broadcast %17 : vector<1x8xf32> to vector<8x8xf32>
    %19 = arith.addf %15, %18 : vector<8x8xf32>
    %c2 = arith.constant 2 : index
    %c0_17 = arith.constant 0 : index
    %c0_18 = arith.constant 0 : index
    %20 = vector.load %arg5[%c2, %c0_17, %c0_18] : memref<12x32x8xbf16, #tpu.memory_space<vmem>>, vector<1x32x8xbf16>
    %21 = vector.shape_cast %20 : vector<1x32x8xbf16> to vector<32x8xbf16>
    %cst_19 = arith.constant dense<0.000000e+00> : vector<8x8xf32>
    %22 = tpu.matmul %2, %21, %cst_19 {dimension_numbers = #tpu.dot_dimension_numbers<[1], [0], [0], [1], [0, 0, 1, 1], [], []>} : vector<8x32xbf16>, vector<32x8xbf16>, vector<8x8xf32> -> vector<8x8xf32>
    %c2_20 = arith.constant 2 : index
    %c0_21 = arith.constant 0 : index
    %c0_22 = arith.constant 0 : index
    %23 = vector.load %arg6[%c2_20, %c0_21, %c0_22] : memref<12x1x8xf32, #tpu.memory_space<vmem>>, vector<1x1x8xf32>
    %24 = vector.shape_cast %23 : vector<1x1x8xf32> to vector<1x8xf32>
    %25 = vector.broadcast %24 : vector<1x8xf32> to vector<8x8xf32>
    %26 = arith.addf %22, %25 : vector<8x8xf32>
    %c3 = arith.constant 3 : index
    %c0_23 = arith.constant 0 : index
    %c0_24 = arith.constant 0 : index
    %27 = vector.load %arg5[%c3, %c0_23, %c0_24] : memref<12x32x8xbf16, #tpu.memory_space<vmem>>, vector<1x32x8xbf16>
    %28 = vector.shape_cast %27 : vector<1x32x8xbf16> to vector<32x8xbf16>
    %cst_25 = arith.constant dense<0.000000e+00> : vector<8x8xf32>
    %29 = tpu.matmul %2, %28, %cst_25 {dimension_numbers = #tpu.dot_dimension_numbers<[1], [0], [0], [1], [0, 0, 1, 1], [], []>} : vector<8x32xbf16>, vector<32x8xbf16>, vector<8x8xf32> -> vector<8x8xf32>
    %c3_26 = arith.constant 3 : index
    %c0_27 = arith.constant 0 : index
    %c0_28 = arith.constant 0 : index
    %30 = vector.load %arg6[%c3_26, %c0_27, %c0_28] : memref<12x1x8xf32, #tpu.memory_space<vmem>>, vector<1x1x8xf32>
    %31 = vector.shape_cast %30 : vector<1x1x8xf32> to vector<1x8xf32>
    %32 = vector.broadcast %31 : vector<1x8xf32> to vector<8x8xf32>
    %33 = arith.addf %29, %32 : vector<8x8xf32>
    %c4 = arith.constant 4 : index
    %c0_29 = arith.constant 0 : index
    %c0_30 = arith.constant 0 : index
    %34 = vector.load %arg5[%c4, %c0_29, %c0_30] : memref<12x32x8xbf16, #tpu.memory_space<vmem>>, vector<1x32x8xbf16>
    %35 = vector.shape_cast %34 : vector<1x32x8xbf16> to vector<32x8xbf16>
    %cst_31 = arith.constant dense<0.000000e+00> : vector<8x8xf32>
    %36 = tpu.matmul %2, %35, %cst_31 {dimension_numbers = #tpu.dot_dimension_numbers<[1], [0], [0], [1], [0, 0, 1, 1], [], []>} : vector<8x32xbf16>, vector<32x8xbf16>, vector<8x8xf32> -> vector<8x8xf32>
    %c4_32 = arith.constant 4 : index
    %c0_33 = arith.constant 0 : index
    %c0_34 = arith.constant 0 : index
    %37 = vector.load %arg6[%c4_32, %c0_33, %c0_34] : memref<12x1x8xf32, #tpu.memory_space<vmem>>, vector<1x1x8xf32>
    %38 = vector.shape_cast %37 : vector<1x1x8xf32> to vector<1x8xf32>
    %39 = vector.broadcast %38 : vector<1x8xf32> to vector<8x8xf32>
    %40 = arith.addf %36, %39 : vector<8x8xf32>
    %c5 = arith.constant 5 : index
    %c0_35 = arith.constant 0 : index
    %c0_36 = arith.constant 0 : index
    %41 = vector.load %arg5[%c5, %c0_35, %c0_36] : memref<12x32x8xbf16, #tpu.memory_space<vmem>>, vector<1x32x8xbf16>
    %42 = vector.shape_cast %41 : vector<1x32x8xbf16> to vector<32x8xbf16>
    %cst_37 = arith.constant dense<0.000000e+00> : vector<8x8xf32>
    %43 = tpu.matmul %2, %42, %cst_37 {dimension_numbers = #tpu.dot_dimension_numbers<[1], [0], [0], [1], [0, 0, 1, 1], [], []>} : vector<8x32xbf16>, vector<32x8xbf16>, vector<8x8xf32> -> vector<8x8xf32>
    %c5_38 = arith.constant 5 : index
    %c0_39 = arith.constant 0 : index
    %c0_40 = arith.constant 0 : index
    %44 = vector.load %arg6[%c5_38, %c0_39, %c0_40] : memref<12x1x8xf32, #tpu.memory_space<vmem>>, vector<1x1x8xf32>
    %45 = vector.shape_cast %44 : vector<1x1x8xf32> to vector<1x8xf32>
    %46 = vector.broadcast %45 : vector<1x8xf32> to vector<8x8xf32>
    %47 = arith.addf %43, %46 : vector<8x8xf32>
    %c6 = arith.constant 6 : index
    %c0_41 = arith.constant 0 : index
    %c0_42 = arith.constant 0 : index
    %48 = vector.load %arg5[%c6, %c0_41, %c0_42] : memref<12x32x8xbf16, #tpu.memory_space<vmem>>, vector<1x32x8xbf16>
    %49 = vector.shape_cast %48 : vector<1x32x8xbf16> to vector<32x8xbf16>
    %cst_43 = arith.constant dense<0.000000e+00> : vector<8x8xf32>
    %50 = tpu.matmul %2, %49, %cst_43 {dimension_numbers = #tpu.dot_dimension_numbers<[1], [0], [0], [1], [0, 0, 1, 1], [], []>} : vector<8x32xbf16>, vector<32x8xbf16>, vector<8x8xf32> -> vector<8x8xf32>
    %c6_44 = arith.constant 6 : index
    %c0_45 = arith.constant 0 : index
    %c0_46 = arith.constant 0 : index
    %51 = vector.load %arg6[%c6_44, %c0_45, %c0_46] : memref<12x1x8xf32, #tpu.memory_space<vmem>>, vector<1x1x8xf32>
    %52 = vector.shape_cast %51 : vector<1x1x8xf32> to vector<1x8xf32>
    %53 = vector.broadcast %52 : vector<1x8xf32> to vector<8x8xf32>
    %54 = arith.addf %50, %53 : vector<8x8xf32>
    %c7 = arith.constant 7 : index
    %c0_47 = arith.constant 0 : index
    %c0_48 = arith.constant 0 : index
    %55 = vector.load %arg5[%c7, %c0_47, %c0_48] : memref<12x32x8xbf16, #tpu.memory_space<vmem>>, vector<1x32x8xbf16>
    %56 = vector.shape_cast %55 : vector<1x32x8xbf16> to vector<32x8xbf16>
    %cst_49 = arith.constant dense<0.000000e+00> : vector<8x8xf32>
    %57 = tpu.matmul %2, %56, %cst_49 {dimension_numbers = #tpu.dot_dimension_numbers<[1], [0], [0], [1], [0, 0, 1, 1], [], []>} : vector<8x32xbf16>, vector<32x8xbf16>, vector<8x8xf32> -> vector<8x8xf32>
    %c7_50 = arith.constant 7 : index
    %c0_51 = arith.constant 0 : index
    %c0_52 = arith.constant 0 : index
    %58 = vector.load %arg6[%c7_50, %c0_51, %c0_52] : memref<12x1x8xf32, #tpu.memory_space<vmem>>, vector<1x1x8xf32>
    %59 = vector.shape_cast %58 : vector<1x1x8xf32> to vector<1x8xf32>
    %60 = vector.broadcast %59 : vector<1x8xf32> to vector<8x8xf32>
    %61 = arith.addf %57, %60 : vector<8x8xf32>
    %c8 = arith.constant 8 : index
    %c0_53 = arith.constant 0 : index
    %c0_54 = arith.constant 0 : index
    %62 = vector.load %arg5[%c8, %c0_53, %c0_54] : memref<12x32x8xbf16, #tpu.memory_space<vmem>>, vector<1x32x8xbf16>
    %63 = vector.shape_cast %62 : vector<1x32x8xbf16> to vector<32x8xbf16>
    %cst_55 = arith.constant dense<0.000000e+00> : vector<8x8xf32>
    %64 = tpu.matmul %2, %63, %cst_55 {dimension_numbers = #tpu.dot_dimension_numbers<[1], [0], [0], [1], [0, 0, 1, 1], [], []>} : vector<8x32xbf16>, vector<32x8xbf16>, vector<8x8xf32> -> vector<8x8xf32>
    %c8_56 = arith.constant 8 : index
    %c0_57 = arith.constant 0 : index
    %c0_58 = arith.constant 0 : index
    %65 = vector.load %arg6[%c8_56, %c0_57, %c0_58] : memref<12x1x8xf32, #tpu.memory_space<vmem>>, vector<1x1x8xf32>
    %66 = vector.shape_cast %65 : vector<1x1x8xf32> to vector<1x8xf32>
    %67 = vector.broadcast %66 : vector<1x8xf32> to vector<8x8xf32>
    %68 = arith.addf %64, %67 : vector<8x8xf32>
    %c9 = arith.constant 9 : index
    %c0_59 = arith.constant 0 : index
    %c0_60 = arith.constant 0 : index
    %69 = vector.load %arg5[%c9, %c0_59, %c0_60] : memref<12x32x8xbf16, #tpu.memory_space<vmem>>, vector<1x32x8xbf16>
    %70 = vector.shape_cast %69 : vector<1x32x8xbf16> to vector<32x8xbf16>
    %cst_61 = arith.constant dense<0.000000e+00> : vector<8x8xf32>
    %71 = tpu.matmul %2, %70, %cst_61 {dimension_numbers = #tpu.dot_dimension_numbers<[1], [0], [0], [1], [0, 0, 1, 1], [], []>} : vector<8x32xbf16>, vector<32x8xbf16>, vector<8x8xf32> -> vector<8x8xf32>
    %c9_62 = arith.constant 9 : index
    %c0_63 = arith.constant 0 : index
    %c0_64 = arith.constant 0 : index
    %72 = vector.load %arg6[%c9_62, %c0_63, %c0_64] : memref<12x1x8xf32, #tpu.memory_space<vmem>>, vector<1x1x8xf32>
    %73 = vector.shape_cast %72 : vector<1x1x8xf32> to vector<1x8xf32>
    %74 = vector.broadcast %73 : vector<1x8xf32> to vector<8x8xf32>
    %75 = arith.addf %71, %74 : vector<8x8xf32>
    %c10 = arith.constant 10 : index
    %c0_65 = arith.constant 0 : index
    %c0_66 = arith.constant 0 : index
    %76 = vector.load %arg5[%c10, %c0_65, %c0_66] : memref<12x32x8xbf16, #tpu.memory_space<vmem>>, vector<1x32x8xbf16>
    %77 = vector.shape_cast %76 : vector<1x32x8xbf16> to vector<32x8xbf16>
    %cst_67 = arith.constant dense<0.000000e+00> : vector<8x8xf32>
    %78 = tpu.matmul %2, %77, %cst_67 {dimension_numbers = #tpu.dot_dimension_numbers<[1], [0], [0], [1], [0, 0, 1, 1], [], []>} : vector<8x32xbf16>, vector<32x8xbf16>, vector<8x8xf32> -> vector<8x8xf32>
    %c10_68 = arith.constant 10 : index
    %c0_69 = arith.constant 0 : index
    %c0_70 = arith.constant 0 : index
    %79 = vector.load %arg6[%c10_68, %c0_69, %c0_70] : memref<12x1x8xf32, #tpu.memory_space<vmem>>, vector<1x1x8xf32>
    %80 = vector.shape_cast %79 : vector<1x1x8xf32> to vector<1x8xf32>
    %81 = vector.broadcast %80 : vector<1x8xf32> to vector<8x8xf32>
    %82 = arith.addf %78, %81 : vector<8x8xf32>
    %c11 = arith.constant 11 : index
    %c0_71 = arith.constant 0 : index
    %c0_72 = arith.constant 0 : index
    %83 = vector.load %arg5[%c11, %c0_71, %c0_72] : memref<12x32x8xbf16, #tpu.memory_space<vmem>>, vector<1x32x8xbf16>
    %84 = vector.shape_cast %83 : vector<1x32x8xbf16> to vector<32x8xbf16>
    %cst_73 = arith.constant dense<0.000000e+00> : vector<8x8xf32>
    %85 = tpu.matmul %2, %84, %cst_73 {dimension_numbers = #tpu.dot_dimension_numbers<[1], [0], [0], [1], [0, 0, 1, 1], [], []>} : vector<8x32xbf16>, vector<32x8xbf16>, vector<8x8xf32> -> vector<8x8xf32>
    %c11_74 = arith.constant 11 : index
    %c0_75 = arith.constant 0 : index
    %c0_76 = arith.constant 0 : index
    %86 = vector.load %arg6[%c11_74, %c0_75, %c0_76] : memref<12x1x8xf32, #tpu.memory_space<vmem>>, vector<1x1x8xf32>
    %87 = vector.shape_cast %86 : vector<1x1x8xf32> to vector<1x8xf32>
    %88 = vector.broadcast %87 : vector<1x8xf32> to vector<8x8xf32>
    %89 = arith.addf %85, %88 : vector<8x8xf32>
    %c0_77 = arith.constant 0 : index
    %c0_78 = arith.constant 0 : index
    %c0_79 = arith.constant 0 : index
    %90 = vector.load %arg3[%c0_77, %c0_78, %c0_79] : memref<1x8x8xf32, #tpu.memory_space<vmem>>, vector<1x8x8xf32>
    %91 = vector.shape_cast %90 : vector<1x8x8xf32> to vector<8x8xf32>
    %c0_80 = arith.constant 0 : index
    %c0_81 = arith.constant 0 : index
    %92 = vector.load %arg8[%c0_80, %c0_81] : memref<1x32xf32, #tpu.memory_space<vmem>>, vector<1x32xf32>
    %cst_82 = arith.constant -1.000000e+09 : f32
    %93 = vector.broadcast %cst_82 : f32 to vector<8x8xf32>
    %94 = arith.mulf %91, %93 : vector<8x8xf32>
    %95 = arith.truncf %12 : vector<8x8xf32> to vector<8x8xbf16>
    %96 = arith.truncf %40 : vector<8x8xf32> to vector<8x8xbf16>
    %cst_83 = arith.constant dense<0.000000e+00> : vector<8x8xf32>
    %97 = tpu.matmul %95, %96, %cst_83 {dimension_numbers = #tpu.dot_dimension_numbers<[1], [1], [0], [0], [0, 0, 1, 0], [], []>} : vector<8x8xbf16>, vector<8x8xbf16>, vector<8x8xf32> -> vector<8x8xf32>
    %98 = arith.addf %97, %94 : vector<8x8xf32>
    %cst_84 = arith.constant dense<0xFF800000> : vector<8xf32>
    %99 = vector.multi_reduction <maximumf>, %98, %cst_84 [1] : vector<8x8xf32> to vector<8xf32>
    %100 = vector.shape_cast %99 : vector<8xf32> to vector<8x1xf32>
    %101 = vector.broadcast %100 : vector<8x1xf32> to vector<8x8xf32>
    %102 = arith.subf %98, %101 : vector<8x8xf32>
    %103 = math.exp %102 : vector<8x8xf32>
    %cst_85 = arith.constant dense<0.000000e+00> : vector<8xf32>
    %104 = vector.multi_reduction <add>, %103, %cst_85 [1] : vector<8x8xf32> to vector<8xf32>
    %105 = vector.shape_cast %104 : vector<8xf32> to vector<8x1xf32>
    %106 = tpu.reciprocal %105 {approx = true} : vector<8x1xf32> -> vector<8x1xf32>
    %107 = vector.broadcast %106 : vector<8x1xf32> to vector<8x8xf32>
    %108 = arith.mulf %103, %107 : vector<8x8xf32>
    %c0_86 = arith.constant 0 : index
    %c0_87 = arith.constant 0 : index
    %c0_88 = arith.constant 0 : index
    %c0_89 = arith.constant 0 : index
    %109 = vector.load %arg26[%c0_86, %c0_87, %c0_88, %c0_89] : memref<1x4x8x8xf32, #tpu.memory_space<vmem>>, vector<1x1x8x8xf32>
    %110 = vector.shape_cast %109 : vector<1x1x8x8xf32> to vector<8x8xf32>
    %111 = vector.shape_cast %108 : vector<8x8xf32> to vector<1x1x8x8xf32>
    tpu.vector_store %arg26[%c0_86, %c0_87, %c0_88, %c0_89], %111 {strides = array<i32>} : memref<1x4x8x8xf32, #tpu.memory_space<vmem>>, vector<1x1x8x8xf32>,
    %112 = arith.truncf %108 : vector<8x8xf32> to vector<8x8xbf16>
    %113 = arith.truncf %68 : vector<8x8xf32> to vector<8x8xbf16>
    %cst_90 = arith.constant dense<0.000000e+00> : vector<8x8xf32>
    %114 = tpu.matmul %112, %113, %cst_90 {dimension_numbers = #tpu.dot_dimension_numbers<[1], [0], [0], [1], [0, 0, 1, 1], [], []>} : vector<8x8xbf16>, vector<8x8xbf16>, vector<8x8xf32> -> vector<8x8xf32>
    %115 = arith.truncf %114 : vector<8x8xf32> to vector<8x8xbf16>
    %c0_91 = arith.constant 0 : index
    %c0_92 = arith.constant 0 : index
    %c0_93 = arith.constant 0 : index
    %116 = vector.load %arg7[%c0_91, %c0_92, %c0_93] : memref<4x8x32xbf16, #tpu.memory_space<vmem>>, vector<1x8x32xbf16>
    %117 = vector.shape_cast %116 : vector<1x8x32xbf16> to vector<8x32xbf16>
    %cst_94 = arith.constant dense<0.000000e+00> : vector<8x32xf32>
    %118 = tpu.matmul %115, %117, %cst_94 {dimension_numbers = #tpu.dot_dimension_numbers<[1], [0], [0], [1], [0, 0, 1, 1], [], []>} : vector<8x8xbf16>, vector<8x32xbf16>, vector<8x32xf32> -> vector<8x32xf32>
    %119 = arith.truncf %19 : vector<8x8xf32> to vector<8x8xbf16>
    %120 = arith.truncf %47 : vector<8x8xf32> to vector<8x8xbf16>
    %cst_95 = arith.constant dense<0.000000e+00> : vector<8x8xf32>
    %121 = tpu.matmul %119, %120, %cst_95 {dimension_numbers = #tpu.dot_dimension_numbers<[1], [1], [0], [0], [0, 0, 1, 0], [], []>} : vector<8x8xbf16>, vector<8x8xbf16>, vector<8x8xf32> -> vector<8x8xf32>
    %122 = arith.addf %121, %94 : vector<8x8xf32>
    %cst_96 = arith.constant dense<0xFF800000> : vector<8xf32>
    %123 = vector.multi_reduction <maximumf>, %122, %cst_96 [1] : vector<8x8xf32> to vector<8xf32>
    %124 = vector.shape_cast %123 : vector<8xf32> to vector<8x1xf32>
    %125 = vector.broadcast %124 : vector<8x1xf32> to vector<8x8xf32>
    %126 = arith.subf %122, %125 : vector<8x8xf32>
    %127 = math.exp %126 : vector<8x8xf32>
    %cst_97 = arith.constant dense<0.000000e+00> : vector<8xf32>
    %128 = vector.multi_reduction <add>, %127, %cst_97 [1] : vector<8x8xf32> to vector<8xf32>
    %129 = vector.shape_cast %128 : vector<8xf32> to vector<8x1xf32>
    %130 = tpu.reciprocal %129 {approx = true} : vector<8x1xf32> -> vector<8x1xf32>
    %131 = vector.broadcast %130 : vector<8x1xf32> to vector<8x8xf32>
    %132 = arith.mulf %127, %131 : vector<8x8xf32>
    %c0_98 = arith.constant 0 : index
    %c1_99 = arith.constant 1 : index
    %c0_100 = arith.constant 0 : index
    %c0_101 = arith.constant 0 : index
    %133 = vector.load %arg26[%c0_98, %c1_99, %c0_100, %c0_101] : memref<1x4x8x8xf32, #tpu.memory_space<vmem>>, vector<1x1x8x8xf32>
    %134 = vector.shape_cast %133 : vector<1x1x8x8xf32> to vector<8x8xf32>
    %135 = vector.shape_cast %132 : vector<8x8xf32> to vector<1x1x8x8xf32>
    tpu.vector_store %arg26[%c0_98, %c1_99, %c0_100, %c0_101], %135 {strides = array<i32>} : memref<1x4x8x8xf32, #tpu.memory_space<vmem>>, vector<1x1x8x8xf32>,
    %136 = arith.truncf %132 : vector<8x8xf32> to vector<8x8xbf16>
    %137 = arith.truncf %75 : vector<8x8xf32> to vector<8x8xbf16>
    %cst_102 = arith.constant dense<0.000000e+00> : vector<8x8xf32>
    %138 = tpu.matmul %136, %137, %cst_102 {dimension_numbers = #tpu.dot_dimension_numbers<[1], [0], [0], [1], [0, 0, 1, 1], [], []>} : vector<8x8xbf16>, vector<8x8xbf16>, vector<8x8xf32> -> vector<8x8xf32>
    %139 = arith.truncf %138 : vector<8x8xf32> to vector<8x8xbf16>
    %c1_103 = arith.constant 1 : index
    %c0_104 = arith.constant 0 : index
    %c0_105 = arith.constant 0 : index
    %140 = vector.load %arg7[%c1_103, %c0_104, %c0_105] : memref<4x8x32xbf16, #tpu.memory_space<vmem>>, vector<1x8x32xbf16>
    %141 = vector.shape_cast %140 : vector<1x8x32xbf16> to vector<8x32xbf16>
    %cst_106 = arith.constant dense<0.000000e+00> : vector<8x32xf32>
    %142 = tpu.matmul %139, %141, %cst_106 {dimension_numbers = #tpu.dot_dimension_numbers<[1], [0], [0], [1], [0, 0, 1, 1], [], []>} : vector<8x8xbf16>, vector<8x32xbf16>, vector<8x32xf32> -> vector<8x32xf32>
    %143 = arith.addf %118, %142 : vector<8x32xf32>
    %144 = arith.truncf %26 : vector<8x8xf32> to vector<8x8xbf16>
    %145 = arith.truncf %54 : vector<8x8xf32> to vector<8x8xbf16>
    %cst_107 = arith.constant dense<0.000000e+00> : vector<8x8xf32>
    %146 = tpu.matmul %144, %145, %cst_107 {dimension_numbers = #tpu.dot_dimension_numbers<[1], [1], [0], [0], [0, 0, 1, 0], [], []>} : vector<8x8xbf16>, vector<8x8xbf16>, vector<8x8xf32> -> vector<8x8xf32>
    %147 = arith.addf %146, %94 : vector<8x8xf32>
    %cst_108 = arith.constant dense<0xFF800000> : vector<8xf32>
    %148 = vector.multi_reduction <maximumf>, %147, %cst_108 [1] : vector<8x8xf32> to vector<8xf32>
    %149 = vector.shape_cast %148 : vector<8xf32> to vector<8x1xf32>
    %150 = vector.broadcast %149 : vector<8x1xf32> to vector<8x8xf32>
    %151 = arith.subf %147, %150 : vector<8x8xf32>
    %152 = math.exp %151 : vector<8x8xf32>
    %cst_109 = arith.constant dense<0.000000e+00> : vector<8xf32>
    %153 = vector.multi_reduction <add>, %152, %cst_109 [1] : vector<8x8xf32> to vector<8xf32>
    %154 = vector.shape_cast %153 : vector<8xf32> to vector<8x1xf32>
    %155 = tpu.reciprocal %154 {approx = true} : vector<8x1xf32> -> vector<8x1xf32>
    %156 = vector.broadcast %155 : vector<8x1xf32> to vector<8x8xf32>
    %157 = arith.mulf %152, %156 : vector<8x8xf32>
    %c0_110 = arith.constant 0 : index
    %c2_111 = arith.constant 2 : index
    %c0_112 = arith.constant 0 : index
    %c0_113 = arith.constant 0 : index
    %158 = vector.load %arg26[%c0_110, %c2_111, %c0_112, %c0_113] : memref<1x4x8x8xf32, #tpu.memory_space<vmem>>, vector<1x1x8x8xf32>
    %159 = vector.shape_cast %158 : vector<1x1x8x8xf32> to vector<8x8xf32>
    %160 = vector.shape_cast %157 : vector<8x8xf32> to vector<1x1x8x8xf32>
    tpu.vector_store %arg26[%c0_110, %c2_111, %c0_112, %c0_113], %160 {strides = array<i32>} : memref<1x4x8x8xf32, #tpu.memory_space<vmem>>, vector<1x1x8x8xf32>,
    %161 = arith.truncf %157 : vector<8x8xf32> to vector<8x8xbf16>
    %162 = arith.truncf %82 : vector<8x8xf32> to vector<8x8xbf16>
    %cst_114 = arith.constant dense<0.000000e+00> : vector<8x8xf32>
    %163 = tpu.matmul %161, %162, %cst_114 {dimension_numbers = #tpu.dot_dimension_numbers<[1], [0], [0], [1], [0, 0, 1, 1], [], []>} : vector<8x8xbf16>, vector<8x8xbf16>, vector<8x8xf32> -> vector<8x8xf32>
    %164 = arith.truncf %163 : vector<8x8xf32> to vector<8x8xbf16>
    %c2_115 = arith.constant 2 : index
    %c0_116 = arith.constant 0 : index
    %c0_117 = arith.constant 0 : index
    %165 = vector.load %arg7[%c2_115, %c0_116, %c0_117] : memref<4x8x32xbf16, #tpu.memory_space<vmem>>, vector<1x8x32xbf16>
    %166 = vector.shape_cast %165 : vector<1x8x32xbf16> to vector<8x32xbf16>
    %cst_118 = arith.constant dense<0.000000e+00> : vector<8x32xf32>
    %167 = tpu.matmul %164, %166, %cst_118 {dimension_numbers = #tpu.dot_dimension_numbers<[1], [0], [0], [1], [0, 0, 1, 1], [], []>} : vector<8x8xbf16>, vector<8x32xbf16>, vector<8x32xf32> -> vector<8x32xf32>
    %168 = arith.addf %143, %167 : vector<8x32xf32>
    %169 = arith.truncf %33 : vector<8x8xf32> to vector<8x8xbf16>
    %170 = arith.truncf %61 : vector<8x8xf32> to vector<8x8xbf16>
    %cst_119 = arith.constant dense<0.000000e+00> : vector<8x8xf32>
    %171 = tpu.matmul %169, %170, %cst_119 {dimension_numbers = #tpu.dot_dimension_numbers<[1], [1], [0], [0], [0, 0, 1, 0], [], []>} : vector<8x8xbf16>, vector<8x8xbf16>, vector<8x8xf32> -> vector<8x8xf32>
    %172 = arith.addf %171, %94 : vector<8x8xf32>
    %cst_120 = arith.constant dense<0xFF800000> : vector<8xf32>
    %173 = vector.multi_reduction <maximumf>, %172, %cst_120 [1] : vector<8x8xf32> to vector<8xf32>
    %174 = vector.shape_cast %173 : vector<8xf32> to vector<8x1xf32>
    %175 = vector.broadcast %174 : vector<8x1xf32> to vector<8x8xf32>
    %176 = arith.subf %172, %175 : vector<8x8xf32>
    %177 = math.exp %176 : vector<8x8xf32>
    %cst_121 = arith.constant dense<0.000000e+00> : vector<8xf32>
    %178 = vector.multi_reduction <add>, %177, %cst_121 [1] : vector<8x8xf32> to vector<8xf32>
    %179 = vector.shape_cast %178 : vector<8xf32> to vector<8x1xf32>
    %180 = tpu.reciprocal %179 {approx = true} : vector<8x1xf32> -> vector<8x1xf32>
    %181 = vector.broadcast %180 : vector<8x1xf32> to vector<8x8xf32>
    %182 = arith.mulf %177, %181 : vector<8x8xf32>
    %c0_122 = arith.constant 0 : index
    %c3_123 = arith.constant 3 : index
    %c0_124 = arith.constant 0 : index
    %c0_125 = arith.constant 0 : index
    %183 = vector.load %arg26[%c0_122, %c3_123, %c0_124, %c0_125] : memref<1x4x8x8xf32, #tpu.memory_space<vmem>>, vector<1x1x8x8xf32>
    %184 = vector.shape_cast %183 : vector<1x1x8x8xf32> to vector<8x8xf32>
    %185 = vector.shape_cast %182 : vector<8x8xf32> to vector<1x1x8x8xf32>
    tpu.vector_store %arg26[%c0_122, %c3_123, %c0_124, %c0_125], %185 {strides = array<i32>} : memref<1x4x8x8xf32, #tpu.memory_space<vmem>>, vector<1x1x8x8xf32>,
    %186 = arith.truncf %182 : vector<8x8xf32> to vector<8x8xbf16>
    %187 = arith.truncf %89 : vector<8x8xf32> to vector<8x8xbf16>
    %cst_126 = arith.constant dense<0.000000e+00> : vector<8x8xf32>
    %188 = tpu.matmul %186, %187, %cst_126 {dimension_numbers = #tpu.dot_dimension_numbers<[1], [0], [0], [1], [0, 0, 1, 1], [], []>} : vector<8x8xbf16>, vector<8x8xbf16>, vector<8x8xf32> -> vector<8x8xf32>
    %189 = arith.truncf %188 : vector<8x8xf32> to vector<8x8xbf16>
    %c3_127 = arith.constant 3 : index
    %c0_128 = arith.constant 0 : index
    %c0_129 = arith.constant 0 : index
    %190 = vector.load %arg7[%c3_127, %c0_128, %c0_129] : memref<4x8x32xbf16, #tpu.memory_space<vmem>>, vector<1x8x32xbf16>
    %191 = vector.shape_cast %190 : vector<1x8x32xbf16> to vector<8x32xbf16>
    %cst_130 = arith.constant dense<0.000000e+00> : vector<8x32xf32>
    %192 = tpu.matmul %189, %191, %cst_130 {dimension_numbers = #tpu.dot_dimension_numbers<[1], [0], [0], [1], [0, 0, 1, 1], [], []>} : vector<8x8xbf16>, vector<8x32xbf16>, vector<8x32xf32> -> vector<8x32xf32>
    %193 = arith.addf %168, %192 : vector<8x32xf32>
    %194 = vector.broadcast %92 : vector<1x32xf32> to vector<8x32xf32>
    %195 = arith.addf %193, %194 : vector<8x32xf32>
    %c0_131 = arith.constant 0 : index
    %c0_132 = arith.constant 0 : index
    %196 = vector.load %arg9[%c0_131, %c0_132] : memref<1x32xf32, #tpu.memory_space<vmem>>, vector<1x32xf32>
    %c0_133 = arith.constant 0 : index
    %c0_134 = arith.constant 0 : index
    %197 = vector.load %arg10[%c0_133, %c0_134] : memref<1x32xf32, #tpu.memory_space<vmem>>, vector<1x32xf32>
    %198 = arith.addf %195, %1 : vector<8x32xf32>
    %cst_135 = arith.constant dense<0.000000e+00> : vector<8xf32>
    %199 = vector.multi_reduction <add>, %198, %cst_135 [1] : vector<8x32xf32> to vector<8xf32>
    %200 = vector.shape_cast %199 : vector<8xf32> to vector<8x1xf32>
    %cst_136 = arith.constant 3.200000e+01 : f32
    %201 = vector.broadcast %cst_136 : f32 to vector<8x1xf32>
    %202 = arith.divf %200, %201 : vector<8x1xf32>
    %203 = vector.broadcast %202 : vector<8x1xf32> to vector<8x32xf32>
    %204 = arith.subf %198, %203 : vector<8x32xf32>
    %205 = arith.mulf %204, %204 : vector<8x32xf32>
    %cst_137 = arith.constant dense<0.000000e+00> : vector<8xf32>
    %206 = vector.multi_reduction <add>, %205, %cst_137 [1] : vector<8x32xf32> to vector<8xf32>
    %207 = vector.shape_cast %206 : vector<8xf32> to vector<8x1xf32>
    %cst_138 = arith.constant 3.200000e+01 : f32
    %208 = vector.broadcast %cst_138 : f32 to vector<8x1xf32>
    %209 = arith.divf %207, %208 : vector<8x1xf32>
    %210 = vector.broadcast %202 : vector<8x1xf32> to vector<8x32xf32>
    %211 = arith.subf %198, %210 : vector<8x32xf32>
    %cst_139 = arith.constant 9.99999974E-6 : f32
    %212 = vector.broadcast %cst_139 : f32 to vector<8x1xf32>
    %213 = arith.addf %209, %212 : vector<8x1xf32>
    %214 = math.rsqrt %213 : vector<8x1xf32>
    %215 = vector.broadcast %214 : vector<8x1xf32> to vector<8x32xf32>
    %216 = arith.mulf %211, %215 : vector<8x32xf32>
    %217 = vector.broadcast %196 : vector<1x32xf32> to vector<8x32xf32>
    %218 = arith.mulf %216, %217 : vector<8x32xf32>
    %219 = vector.broadcast %197 : vector<1x32xf32> to vector<8x32xf32>
    %220 = arith.addf %218, %219 : vector<8x32xf32>
    %221 = arith.truncf %220 : vector<8x32xf32> to vector<8x32xbf16>
    %c0_140 = arith.constant 0 : index
    %c0_141 = arith.constant 0 : index
    %c0_142 = arith.constant 0 : index
    %222 = vector.load %arg11[%c0_140, %c0_141, %c0_142] : memref<4x32x8xbf16, #tpu.memory_space<vmem>>, vector<1x32x8xbf16>
    %223 = vector.shape_cast %222 : vector<1x32x8xbf16> to vector<32x8xbf16>
    %cst_143 = arith.constant dense<0.000000e+00> : vector<8x8xf32>
    %224 = tpu.matmul %221, %223, %cst_143 {dimension_numbers = #tpu.dot_dimension_numbers<[1], [0], [0], [1], [0, 0, 1, 1], [], []>} : vector<8x32xbf16>, vector<32x8xbf16>, vector<8x8xf32> -> vector<8x8xf32>
    %c0_144 = arith.constant 0 : index
    %c0_145 = arith.constant 0 : index
    %c0_146 = arith.constant 0 : index
    %225 = vector.load %arg12[%c0_144, %c0_145, %c0_146] : memref<4x1x8xf32, #tpu.memory_space<vmem>>, vector<1x1x8xf32>
    %226 = vector.shape_cast %225 : vector<1x1x8xf32> to vector<1x8xf32>
    %227 = vector.broadcast %226 : vector<1x8xf32> to vector<8x8xf32>
    %228 = arith.addf %224, %227 : vector<8x8xf32>
    %c1_147 = arith.constant 1 : index
    %c0_148 = arith.constant 0 : index
    %c0_149 = arith.constant 0 : index
    %229 = vector.load %arg11[%c1_147, %c0_148, %c0_149] : memref<4x32x8xbf16, #tpu.memory_space<vmem>>, vector<1x32x8xbf16>
    %230 = vector.shape_cast %229 : vector<1x32x8xbf16> to vector<32x8xbf16>
    %cst_150 = arith.constant dense<0.000000e+00> : vector<8x8xf32>
    %231 = tpu.matmul %221, %230, %cst_150 {dimension_numbers = #tpu.dot_dimension_numbers<[1], [0], [0], [1], [0, 0, 1, 1], [], []>} : vector<8x32xbf16>, vector<32x8xbf16>, vector<8x8xf32> -> vector<8x8xf32>
    %c1_151 = arith.constant 1 : index
    %c0_152 = arith.constant 0 : index
    %c0_153 = arith.constant 0 : index
    %232 = vector.load %arg12[%c1_151, %c0_152, %c0_153] : memref<4x1x8xf32, #tpu.memory_space<vmem>>, vector<1x1x8xf32>
    %233 = vector.shape_cast %232 : vector<1x1x8xf32> to vector<1x8xf32>
    %234 = vector.broadcast %233 : vector<1x8xf32> to vector<8x8xf32>
    %235 = arith.addf %231, %234 : vector<8x8xf32>
    %c2_154 = arith.constant 2 : index
    %c0_155 = arith.constant 0 : index
    %c0_156 = arith.constant 0 : index
    %236 = vector.load %arg11[%c2_154, %c0_155, %c0_156] : memref<4x32x8xbf16, #tpu.memory_space<vmem>>, vector<1x32x8xbf16>
    %237 = vector.shape_cast %236 : vector<1x32x8xbf16> to vector<32x8xbf16>
    %cst_157 = arith.constant dense<0.000000e+00> : vector<8x8xf32>
    %238 = tpu.matmul %221, %237, %cst_157 {dimension_numbers = #tpu.dot_dimension_numbers<[1], [0], [0], [1], [0, 0, 1, 1], [], []>} : vector<8x32xbf16>, vector<32x8xbf16>, vector<8x8xf32> -> vector<8x8xf32>
    %c2_158 = arith.constant 2 : index
    %c0_159 = arith.constant 0 : index
    %c0_160 = arith.constant 0 : index
    %239 = vector.load %arg12[%c2_158, %c0_159, %c0_160] : memref<4x1x8xf32, #tpu.memory_space<vmem>>, vector<1x1x8xf32>
    %240 = vector.shape_cast %239 : vector<1x1x8xf32> to vector<1x8xf32>
    %241 = vector.broadcast %240 : vector<1x8xf32> to vector<8x8xf32>
    %242 = arith.addf %238, %241 : vector<8x8xf32>
    %c3_161 = arith.constant 3 : index
    %c0_162 = arith.constant 0 : index
    %c0_163 = arith.constant 0 : index
    %243 = vector.load %arg11[%c3_161, %c0_162, %c0_163] : memref<4x32x8xbf16, #tpu.memory_space<vmem>>, vector<1x32x8xbf16>
    %244 = vector.shape_cast %243 : vector<1x32x8xbf16> to vector<32x8xbf16>
    %cst_164 = arith.constant dense<0.000000e+00> : vector<8x8xf32>
    %245 = tpu.matmul %221, %244, %cst_164 {dimension_numbers = #tpu.dot_dimension_numbers<[1], [0], [0], [1], [0, 0, 1, 1], [], []>} : vector<8x32xbf16>, vector<32x8xbf16>, vector<8x8xf32> -> vector<8x8xf32>
    %c3_165 = arith.constant 3 : index
    %c0_166 = arith.constant 0 : index
    %c0_167 = arith.constant 0 : index
    %246 = vector.load %arg12[%c3_165, %c0_166, %c0_167] : memref<4x1x8xf32, #tpu.memory_space<vmem>>, vector<1x1x8xf32>
    %247 = vector.shape_cast %246 : vector<1x1x8xf32> to vector<1x8xf32>
    %248 = vector.broadcast %247 : vector<1x8xf32> to vector<8x8xf32>
    %249 = arith.addf %245, %248 : vector<8x8xf32>
    %c0_168 = arith.constant 0 : index
    %c0_169 = arith.constant 0 : index
    %c0_170 = arith.constant 0 : index
    %250 = vector.load %arg13[%c0_168, %c0_169, %c0_170] : memref<8x32x8xbf16, #tpu.memory_space<vmem>>, vector<1x32x8xbf16>
    %251 = vector.shape_cast %250 : vector<1x32x8xbf16> to vector<32x8xbf16>
    %cst_171 = arith.constant dense<0.000000e+00> : vector<8x8xf32>
    %252 = tpu.matmul %5, %251, %cst_171 {dimension_numbers = #tpu.dot_dimension_numbers<[1], [0], [0], [1], [0, 0, 1, 1], [], []>} : vector<8x32xbf16>, vector<32x8xbf16>, vector<8x8xf32> -> vector<8x8xf32>
    %c0_172 = arith.constant 0 : index
    %c0_173 = arith.constant 0 : index
    %c0_174 = arith.constant 0 : index
    %253 = vector.load %arg14[%c0_172, %c0_173, %c0_174] : memref<8x1x8xf32, #tpu.memory_space<vmem>>, vector<1x1x8xf32>
    %254 = vector.shape_cast %253 : vector<1x1x8xf32> to vector<1x8xf32>
    %255 = vector.broadcast %254 : vector<1x8xf32> to vector<8x8xf32>
    %256 = arith.addf %252, %255 : vector<8x8xf32>
    %c1_175 = arith.constant 1 : index
    %c0_176 = arith.constant 0 : index
    %c0_177 = arith.constant 0 : index
    %257 = vector.load %arg13[%c1_175, %c0_176, %c0_177] : memref<8x32x8xbf16, #tpu.memory_space<vmem>>, vector<1x32x8xbf16>
    %258 = vector.shape_cast %257 : vector<1x32x8xbf16> to vector<32x8xbf16>
    %cst_178 = arith.constant dense<0.000000e+00> : vector<8x8xf32>
    %259 = tpu.matmul %5, %258, %cst_178 {dimension_numbers = #tpu.dot_dimension_numbers<[1], [0], [0], [1], [0, 0, 1, 1], [], []>} : vector<8x32xbf16>, vector<32x8xbf16>, vector<8x8xf32> -> vector<8x8xf32>
    %c1_179 = arith.constant 1 : index
    %c0_180 = arith.constant 0 : index
    %c0_181 = arith.constant 0 : index
    %260 = vector.load %arg14[%c1_179, %c0_180, %c0_181] : memref<8x1x8xf32, #tpu.memory_space<vmem>>, vector<1x1x8xf32>
    %261 = vector.shape_cast %260 : vector<1x1x8xf32> to vector<1x8xf32>
    %262 = vector.broadcast %261 : vector<1x8xf32> to vector<8x8xf32>
    %263 = arith.addf %259, %262 : vector<8x8xf32>
    %c2_182 = arith.constant 2 : index
    %c0_183 = arith.constant 0 : index
    %c0_184 = arith.constant 0 : index
    %264 = vector.load %arg13[%c2_182, %c0_183, %c0_184] : memref<8x32x8xbf16, #tpu.memory_space<vmem>>, vector<1x32x8xbf16>
    %265 = vector.shape_cast %264 : vector<1x32x8xbf16> to vector<32x8xbf16>
    %cst_185 = arith.constant dense<0.000000e+00> : vector<8x8xf32>
    %266 = tpu.matmul %5, %265, %cst_185 {dimension_numbers = #tpu.dot_dimension_numbers<[1], [0], [0], [1], [0, 0, 1, 1], [], []>} : vector<8x32xbf16>, vector<32x8xbf16>, vector<8x8xf32> -> vector<8x8xf32>
    %c2_186 = arith.constant 2 : index
    %c0_187 = arith.constant 0 : index
    %c0_188 = arith.constant 0 : index
    %267 = vector.load %arg14[%c2_186, %c0_187, %c0_188] : memref<8x1x8xf32, #tpu.memory_space<vmem>>, vector<1x1x8xf32>
    %268 = vector.shape_cast %267 : vector<1x1x8xf32> to vector<1x8xf32>
    %269 = vector.broadcast %268 : vector<1x8xf32> to vector<8x8xf32>
    %270 = arith.addf %266, %269 : vector<8x8xf32>
    %c3_189 = arith.constant 3 : index
    %c0_190 = arith.constant 0 : index
    %c0_191 = arith.constant 0 : index
    %271 = vector.load %arg13[%c3_189, %c0_190, %c0_191] : memref<8x32x8xbf16, #tpu.memory_space<vmem>>, vector<1x32x8xbf16>
    %272 = vector.shape_cast %271 : vector<1x32x8xbf16> to vector<32x8xbf16>
    %cst_192 = arith.constant dense<0.000000e+00> : vector<8x8xf32>
    %273 = tpu.matmul %5, %272, %cst_192 {dimension_numbers = #tpu.dot_dimension_numbers<[1], [0], [0], [1], [0, 0, 1, 1], [], []>} : vector<8x32xbf16>, vector<32x8xbf16>, vector<8x8xf32> -> vector<8x8xf32>
    %c3_193 = arith.constant 3 : index
    %c0_194 = arith.constant 0 : index
    %c0_195 = arith.constant 0 : index
    %274 = vector.load %arg14[%c3_193, %c0_194, %c0_195] : memref<8x1x8xf32, #tpu.memory_space<vmem>>, vector<1x1x8xf32>
    %275 = vector.shape_cast %274 : vector<1x1x8xf32> to vector<1x8xf32>
    %276 = vector.broadcast %275 : vector<1x8xf32> to vector<8x8xf32>
    %277 = arith.addf %273, %276 : vector<8x8xf32>
    %c4_196 = arith.constant 4 : index
    %c0_197 = arith.constant 0 : index
    %c0_198 = arith.constant 0 : index
    %278 = vector.load %arg13[%c4_196, %c0_197, %c0_198] : memref<8x32x8xbf16, #tpu.memory_space<vmem>>, vector<1x32x8xbf16>
    %279 = vector.shape_cast %278 : vector<1x32x8xbf16> to vector<32x8xbf16>
    %cst_199 = arith.constant dense<0.000000e+00> : vector<8x8xf32>
    %280 = tpu.matmul %5, %279, %cst_199 {dimension_numbers = #tpu.dot_dimension_numbers<[1], [0], [0], [1], [0, 0, 1, 1], [], []>} : vector<8x32xbf16>, vector<32x8xbf16>, vector<8x8xf32> -> vector<8x8xf32>
    %c4_200 = arith.constant 4 : index
    %c0_201 = arith.constant 0 : index
    %c0_202 = arith.constant 0 : index
    %281 = vector.load %arg14[%c4_200, %c0_201, %c0_202] : memref<8x1x8xf32, #tpu.memory_space<vmem>>, vector<1x1x8xf32>
    %282 = vector.shape_cast %281 : vector<1x1x8xf32> to vector<1x8xf32>
    %283 = vector.broadcast %282 : vector<1x8xf32> to vector<8x8xf32>
    %284 = arith.addf %280, %283 : vector<8x8xf32>
    %c5_203 = arith.constant 5 : index
    %c0_204 = arith.constant 0 : index
    %c0_205 = arith.constant 0 : index
    %285 = vector.load %arg13[%c5_203, %c0_204, %c0_205] : memref<8x32x8xbf16, #tpu.memory_space<vmem>>, vector<1x32x8xbf16>
    %286 = vector.shape_cast %285 : vector<1x32x8xbf16> to vector<32x8xbf16>
    %cst_206 = arith.constant dense<0.000000e+00> : vector<8x8xf32>
    %287 = tpu.matmul %5, %286, %cst_206 {dimension_numbers = #tpu.dot_dimension_numbers<[1], [0], [0], [1], [0, 0, 1, 1], [], []>} : vector<8x32xbf16>, vector<32x8xbf16>, vector<8x8xf32> -> vector<8x8xf32>
    %c5_207 = arith.constant 5 : index
    %c0_208 = arith.constant 0 : index
    %c0_209 = arith.constant 0 : index
    %288 = vector.load %arg14[%c5_207, %c0_208, %c0_209] : memref<8x1x8xf32, #tpu.memory_space<vmem>>, vector<1x1x8xf32>
    %289 = vector.shape_cast %288 : vector<1x1x8xf32> to vector<1x8xf32>
    %290 = vector.broadcast %289 : vector<1x8xf32> to vector<8x8xf32>
    %291 = arith.addf %287, %290 : vector<8x8xf32>
    %c6_210 = arith.constant 6 : index
    %c0_211 = arith.constant 0 : index
    %c0_212 = arith.constant 0 : index
    %292 = vector.load %arg13[%c6_210, %c0_211, %c0_212] : memref<8x32x8xbf16, #tpu.memory_space<vmem>>, vector<1x32x8xbf16>
    %293 = vector.shape_cast %292 : vector<1x32x8xbf16> to vector<32x8xbf16>
    %cst_213 = arith.constant dense<0.000000e+00> : vector<8x8xf32>
    %294 = tpu.matmul %5, %293, %cst_213 {dimension_numbers = #tpu.dot_dimension_numbers<[1], [0], [0], [1], [0, 0, 1, 1], [], []>} : vector<8x32xbf16>, vector<32x8xbf16>, vector<8x8xf32> -> vector<8x8xf32>
    %c6_214 = arith.constant 6 : index
    %c0_215 = arith.constant 0 : index
    %c0_216 = arith.constant 0 : index
    %295 = vector.load %arg14[%c6_214, %c0_215, %c0_216] : memref<8x1x8xf32, #tpu.memory_space<vmem>>, vector<1x1x8xf32>
    %296 = vector.shape_cast %295 : vector<1x1x8xf32> to vector<1x8xf32>
    %297 = vector.broadcast %296 : vector<1x8xf32> to vector<8x8xf32>
    %298 = arith.addf %294, %297 : vector<8x8xf32>
    %c7_217 = arith.constant 7 : index
    %c0_218 = arith.constant 0 : index
    %c0_219 = arith.constant 0 : index
    %299 = vector.load %arg13[%c7_217, %c0_218, %c0_219] : memref<8x32x8xbf16, #tpu.memory_space<vmem>>, vector<1x32x8xbf16>
    %300 = vector.shape_cast %299 : vector<1x32x8xbf16> to vector<32x8xbf16>
    %cst_220 = arith.constant dense<0.000000e+00> : vector<8x8xf32>
    %301 = tpu.matmul %5, %300, %cst_220 {dimension_numbers = #tpu.dot_dimension_numbers<[1], [0], [0], [1], [0, 0, 1, 1], [], []>} : vector<8x32xbf16>, vector<32x8xbf16>, vector<8x8xf32> -> vector<8x8xf32>
    %c7_221 = arith.constant 7 : index
    %c0_222 = arith.constant 0 : index
    %c0_223 = arith.constant 0 : index
    %302 = vector.load %arg14[%c7_221, %c0_222, %c0_223] : memref<8x1x8xf32, #tpu.memory_space<vmem>>, vector<1x1x8xf32>
    %303 = vector.shape_cast %302 : vector<1x1x8xf32> to vector<1x8xf32>
    %304 = vector.broadcast %303 : vector<1x8xf32> to vector<8x8xf32>
    %305 = arith.addf %301, %304 : vector<8x8xf32>
    %c0_224 = arith.constant 0 : index
    %c0_225 = arith.constant 0 : index
    %c0_226 = arith.constant 0 : index
    %306 = vector.load %arg4[%c0_224, %c0_225, %c0_226] : memref<1x8x8xf32, #tpu.memory_space<vmem>>, vector<1x8x8xf32>
    %307 = vector.shape_cast %306 : vector<1x8x8xf32> to vector<8x8xf32>
    %c0_227 = arith.constant 0 : index
    %c0_228 = arith.constant 0 : index
    %308 = vector.load %arg16[%c0_227, %c0_228] : memref<1x32xf32, #tpu.memory_space<vmem>>, vector<1x32xf32>
    %cst_229 = arith.constant -1.000000e+09 : f32
    %309 = vector.broadcast %cst_229 : f32 to vector<8x8xf32>
    %310 = arith.mulf %307, %309 : vector<8x8xf32>
    %311 = arith.truncf %228 : vector<8x8xf32> to vector<8x8xbf16>
    %312 = arith.truncf %256 : vector<8x8xf32> to vector<8x8xbf16>
    %cst_230 = arith.constant dense<0.000000e+00> : vector<8x8xf32>
    %313 = tpu.matmul %311, %312, %cst_230 {dimension_numbers = #tpu.dot_dimension_numbers<[1], [1], [0], [0], [0, 0, 1, 0], [], []>} : vector<8x8xbf16>, vector<8x8xbf16>, vector<8x8xf32> -> vector<8x8xf32>
    %314 = arith.addf %313, %310 : vector<8x8xf32>
    %cst_231 = arith.constant dense<0xFF800000> : vector<8xf32>
    %315 = vector.multi_reduction <maximumf>, %314, %cst_231 [1] : vector<8x8xf32> to vector<8xf32>
    %316 = vector.shape_cast %315 : vector<8xf32> to vector<8x1xf32>
    %317 = vector.broadcast %316 : vector<8x1xf32> to vector<8x8xf32>
    %318 = arith.subf %314, %317 : vector<8x8xf32>
    %319 = math.exp %318 : vector<8x8xf32>
    %cst_232 = arith.constant dense<0.000000e+00> : vector<8xf32>
    %320 = vector.multi_reduction <add>, %319, %cst_232 [1] : vector<8x8xf32> to vector<8xf32>
    %321 = vector.shape_cast %320 : vector<8xf32> to vector<8x1xf32>
    %322 = tpu.reciprocal %321 {approx = true} : vector<8x1xf32> -> vector<8x1xf32>
    %323 = vector.broadcast %322 : vector<8x1xf32> to vector<8x8xf32>
    %324 = arith.mulf %319, %323 : vector<8x8xf32>
    %c0_233 = arith.constant 0 : index
    %c0_234 = arith.constant 0 : index
    %c0_235 = arith.constant 0 : index
    %c0_236 = arith.constant 0 : index
    %325 = vector.load %arg27[%c0_233, %c0_234, %c0_235, %c0_236] : memref<1x4x8x8xf32, #tpu.memory_space<vmem>>, vector<1x1x8x8xf32>
    %326 = vector.shape_cast %325 : vector<1x1x8x8xf32> to vector<8x8xf32>
    %327 = vector.shape_cast %324 : vector<8x8xf32> to vector<1x1x8x8xf32>
    tpu.vector_store %arg27[%c0_233, %c0_234, %c0_235, %c0_236], %327 {strides = array<i32>} : memref<1x4x8x8xf32, #tpu.memory_space<vmem>>, vector<1x1x8x8xf32>,
    %328 = arith.truncf %324 : vector<8x8xf32> to vector<8x8xbf16>
    %329 = arith.truncf %284 : vector<8x8xf32> to vector<8x8xbf16>
    %cst_237 = arith.constant dense<0.000000e+00> : vector<8x8xf32>
    %330 = tpu.matmul %328, %329, %cst_237 {dimension_numbers = #tpu.dot_dimension_numbers<[1], [0], [0], [1], [0, 0, 1, 1], [], []>} : vector<8x8xbf16>, vector<8x8xbf16>, vector<8x8xf32> -> vector<8x8xf32>
    %331 = arith.truncf %330 : vector<8x8xf32> to vector<8x8xbf16>
    %c0_238 = arith.constant 0 : index
    %c0_239 = arith.constant 0 : index
    %c0_240 = arith.constant 0 : index
    %332 = vector.load %arg15[%c0_238, %c0_239, %c0_240] : memref<4x8x32xbf16, #tpu.memory_space<vmem>>, vector<1x8x32xbf16>
    %333 = vector.shape_cast %332 : vector<1x8x32xbf16> to vector<8x32xbf16>
    %cst_241 = arith.constant dense<0.000000e+00> : vector<8x32xf32>
    %334 = tpu.matmul %331, %333, %cst_241 {dimension_numbers = #tpu.dot_dimension_numbers<[1], [0], [0], [1], [0, 0, 1, 1], [], []>} : vector<8x8xbf16>, vector<8x32xbf16>, vector<8x32xf32> -> vector<8x32xf32>
    %335 = arith.truncf %235 : vector<8x8xf32> to vector<8x8xbf16>
    %336 = arith.truncf %263 : vector<8x8xf32> to vector<8x8xbf16>
    %cst_242 = arith.constant dense<0.000000e+00> : vector<8x8xf32>
    %337 = tpu.matmul %335, %336, %cst_242 {dimension_numbers = #tpu.dot_dimension_numbers<[1], [1], [0], [0], [0, 0, 1, 0], [], []>} : vector<8x8xbf16>, vector<8x8xbf16>, vector<8x8xf32> -> vector<8x8xf32>
    %338 = arith.addf %337, %310 : vector<8x8xf32>
    %cst_243 = arith.constant dense<0xFF800000> : vector<8xf32>
    %339 = vector.multi_reduction <maximumf>, %338, %cst_243 [1] : vector<8x8xf32> to vector<8xf32>
    %340 = vector.shape_cast %339 : vector<8xf32> to vector<8x1xf32>
    %341 = vector.broadcast %340 : vector<8x1xf32> to vector<8x8xf32>
    %342 = arith.subf %338, %341 : vector<8x8xf32>
    %343 = math.exp %342 : vector<8x8xf32>
    %cst_244 = arith.constant dense<0.000000e+00> : vector<8xf32>
    %344 = vector.multi_reduction <add>, %343, %cst_244 [1] : vector<8x8xf32> to vector<8xf32>
    %345 = vector.shape_cast %344 : vector<8xf32> to vector<8x1xf32>
    %346 = tpu.reciprocal %345 {approx = true} : vector<8x1xf32> -> vector<8x1xf32>
    %347 = vector.broadcast %346 : vector<8x1xf32> to vector<8x8xf32>
    %348 = arith.mulf %343, %347 : vector<8x8xf32>
    %c0_245 = arith.constant 0 : index
    %c1_246 = arith.constant 1 : index
    %c0_247 = arith.constant 0 : index
    %c0_248 = arith.constant 0 : index
    %349 = vector.load %arg27[%c0_245, %c1_246, %c0_247, %c0_248] : memref<1x4x8x8xf32, #tpu.memory_space<vmem>>, vector<1x1x8x8xf32>
    %350 = vector.shape_cast %349 : vector<1x1x8x8xf32> to vector<8x8xf32>
    %351 = vector.shape_cast %348 : vector<8x8xf32> to vector<1x1x8x8xf32>
    tpu.vector_store %arg27[%c0_245, %c1_246, %c0_247, %c0_248], %351 {strides = array<i32>} : memref<1x4x8x8xf32, #tpu.memory_space<vmem>>, vector<1x1x8x8xf32>,
    %352 = arith.truncf %348 : vector<8x8xf32> to vector<8x8xbf16>
    %353 = arith.truncf %291 : vector<8x8xf32> to vector<8x8xbf16>
    %cst_249 = arith.constant dense<0.000000e+00> : vector<8x8xf32>
    %354 = tpu.matmul %352, %353, %cst_249 {dimension_numbers = #tpu.dot_dimension_numbers<[1], [0], [0], [1], [0, 0, 1, 1], [], []>} : vector<8x8xbf16>, vector<8x8xbf16>, vector<8x8xf32> -> vector<8x8xf32>
    %355 = arith.truncf %354 : vector<8x8xf32> to vector<8x8xbf16>
    %c1_250 = arith.constant 1 : index
    %c0_251 = arith.constant 0 : index
    %c0_252 = arith.constant 0 : index
    %356 = vector.load %arg15[%c1_250, %c0_251, %c0_252] : memref<4x8x32xbf16, #tpu.memory_space<vmem>>, vector<1x8x32xbf16>
    %357 = vector.shape_cast %356 : vector<1x8x32xbf16> to vector<8x32xbf16>
    %cst_253 = arith.constant dense<0.000000e+00> : vector<8x32xf32>
    %358 = tpu.matmul %355, %357, %cst_253 {dimension_numbers = #tpu.dot_dimension_numbers<[1], [0], [0], [1], [0, 0, 1, 1], [], []>} : vector<8x8xbf16>, vector<8x32xbf16>, vector<8x32xf32> -> vector<8x32xf32>
    %359 = arith.addf %334, %358 : vector<8x32xf32>
    %360 = arith.truncf %242 : vector<8x8xf32> to vector<8x8xbf16>
    %361 = arith.truncf %270 : vector<8x8xf32> to vector<8x8xbf16>
    %cst_254 = arith.constant dense<0.000000e+00> : vector<8x8xf32>
    %362 = tpu.matmul %360, %361, %cst_254 {dimension_numbers = #tpu.dot_dimension_numbers<[1], [1], [0], [0], [0, 0, 1, 0], [], []>} : vector<8x8xbf16>, vector<8x8xbf16>, vector<8x8xf32> -> vector<8x8xf32>
    %363 = arith.addf %362, %310 : vector<8x8xf32>
    %cst_255 = arith.constant dense<0xFF800000> : vector<8xf32>
    %364 = vector.multi_reduction <maximumf>, %363, %cst_255 [1] : vector<8x8xf32> to vector<8xf32>
    %365 = vector.shape_cast %364 : vector<8xf32> to vector<8x1xf32>
    %366 = vector.broadcast %365 : vector<8x1xf32> to vector<8x8xf32>
    %367 = arith.subf %363, %366 : vector<8x8xf32>
    %368 = math.exp %367 : vector<8x8xf32>
    %cst_256 = arith.constant dense<0.000000e+00> : vector<8xf32>
    %369 = vector.multi_reduction <add>, %368, %cst_256 [1] : vector<8x8xf32> to vector<8xf32>
    %370 = vector.shape_cast %369 : vector<8xf32> to vector<8x1xf32>
    %371 = tpu.reciprocal %370 {approx = true} : vector<8x1xf32> -> vector<8x1xf32>
    %372 = vector.broadcast %371 : vector<8x1xf32> to vector<8x8xf32>
    %373 = arith.mulf %368, %372 : vector<8x8xf32>
    %c0_257 = arith.constant 0 : index
    %c2_258 = arith.constant 2 : index
    %c0_259 = arith.constant 0 : index
    %c0_260 = arith.constant 0 : index
    %374 = vector.load %arg27[%c0_257, %c2_258, %c0_259, %c0_260] : memref<1x4x8x8xf32, #tpu.memory_space<vmem>>, vector<1x1x8x8xf32>
    %375 = vector.shape_cast %374 : vector<1x1x8x8xf32> to vector<8x8xf32>
    %376 = vector.shape_cast %373 : vector<8x8xf32> to vector<1x1x8x8xf32>
    tpu.vector_store %arg27[%c0_257, %c2_258, %c0_259, %c0_260], %376 {strides = array<i32>} : memref<1x4x8x8xf32, #tpu.memory_space<vmem>>, vector<1x1x8x8xf32>,
    %377 = arith.truncf %373 : vector<8x8xf32> to vector<8x8xbf16>
    %378 = arith.truncf %298 : vector<8x8xf32> to vector<8x8xbf16>
    %cst_261 = arith.constant dense<0.000000e+00> : vector<8x8xf32>
    %379 = tpu.matmul %377, %378, %cst_261 {dimension_numbers = #tpu.dot_dimension_numbers<[1], [0], [0], [1], [0, 0, 1, 1], [], []>} : vector<8x8xbf16>, vector<8x8xbf16>, vector<8x8xf32> -> vector<8x8xf32>
    %380 = arith.truncf %379 : vector<8x8xf32> to vector<8x8xbf16>
    %c2_262 = arith.constant 2 : index
    %c0_263 = arith.constant 0 : index
    %c0_264 = arith.constant 0 : index
    %381 = vector.load %arg15[%c2_262, %c0_263, %c0_264] : memref<4x8x32xbf16, #tpu.memory_space<vmem>>, vector<1x8x32xbf16>
    %382 = vector.shape_cast %381 : vector<1x8x32xbf16> to vector<8x32xbf16>
    %cst_265 = arith.constant dense<0.000000e+00> : vector<8x32xf32>
    %383 = tpu.matmul %380, %382, %cst_265 {dimension_numbers = #tpu.dot_dimension_numbers<[1], [0], [0], [1], [0, 0, 1, 1], [], []>} : vector<8x8xbf16>, vector<8x32xbf16>, vector<8x32xf32> -> vector<8x32xf32>
    %384 = arith.addf %359, %383 : vector<8x32xf32>
    %385 = arith.truncf %249 : vector<8x8xf32> to vector<8x8xbf16>
    %386 = arith.truncf %277 : vector<8x8xf32> to vector<8x8xbf16>
    %cst_266 = arith.constant dense<0.000000e+00> : vector<8x8xf32>
    %387 = tpu.matmul %385, %386, %cst_266 {dimension_numbers = #tpu.dot_dimension_numbers<[1], [1], [0], [0], [0, 0, 1, 0], [], []>} : vector<8x8xbf16>, vector<8x8xbf16>, vector<8x8xf32> -> vector<8x8xf32>
    %388 = arith.addf %387, %310 : vector<8x8xf32>
    %cst_267 = arith.constant dense<0xFF800000> : vector<8xf32>
    %389 = vector.multi_reduction <maximumf>, %388, %cst_267 [1] : vector<8x8xf32> to vector<8xf32>
    %390 = vector.shape_cast %389 : vector<8xf32> to vector<8x1xf32>
    %391 = vector.broadcast %390 : vector<8x1xf32> to vector<8x8xf32>
    %392 = arith.subf %388, %391 : vector<8x8xf32>
    %393 = math.exp %392 : vector<8x8xf32>
    %cst_268 = arith.constant dense<0.000000e+00> : vector<8xf32>
    %394 = vector.multi_reduction <add>, %393, %cst_268 [1] : vector<8x8xf32> to vector<8xf32>
    %395 = vector.shape_cast %394 : vector<8xf32> to vector<8x1xf32>
    %396 = tpu.reciprocal %395 {approx = true} : vector<8x1xf32> -> vector<8x1xf32>
    %397 = vector.broadcast %396 : vector<8x1xf32> to vector<8x8xf32>
    %398 = arith.mulf %393, %397 : vector<8x8xf32>
    %c0_269 = arith.constant 0 : index
    %c3_270 = arith.constant 3 : index
    %c0_271 = arith.constant 0 : index
    %c0_272 = arith.constant 0 : index
    %399 = vector.load %arg27[%c0_269, %c3_270, %c0_271, %c0_272] : memref<1x4x8x8xf32, #tpu.memory_space<vmem>>, vector<1x1x8x8xf32>
    %400 = vector.shape_cast %399 : vector<1x1x8x8xf32> to vector<8x8xf32>
    %401 = vector.shape_cast %398 : vector<8x8xf32> to vector<1x1x8x8xf32>
    tpu.vector_store %arg27[%c0_269, %c3_270, %c0_271, %c0_272], %401 {strides = array<i32>} : memref<1x4x8x8xf32, #tpu.memory_space<vmem>>, vector<1x1x8x8xf32>,
    %402 = arith.truncf %398 : vector<8x8xf32> to vector<8x8xbf16>
    %403 = arith.truncf %305 : vector<8x8xf32> to vector<8x8xbf16>
    %cst_273 = arith.constant dense<0.000000e+00> : vector<8x8xf32>
    %404 = tpu.matmul %402, %403, %cst_273 {dimension_numbers = #tpu.dot_dimension_numbers<[1], [0], [0], [1], [0, 0, 1, 1], [], []>} : vector<8x8xbf16>, vector<8x8xbf16>, vector<8x8xf32> -> vector<8x8xf32>
    %405 = arith.truncf %404 : vector<8x8xf32> to vector<8x8xbf16>
    %c3_274 = arith.constant 3 : index
    %c0_275 = arith.constant 0 : index
    %c0_276 = arith.constant 0 : index
    %406 = vector.load %arg15[%c3_274, %c0_275, %c0_276] : memref<4x8x32xbf16, #tpu.memory_space<vmem>>, vector<1x8x32xbf16>
    %407 = vector.shape_cast %406 : vector<1x8x32xbf16> to vector<8x32xbf16>
    %cst_277 = arith.constant dense<0.000000e+00> : vector<8x32xf32>
    %408 = tpu.matmul %405, %407, %cst_277 {dimension_numbers = #tpu.dot_dimension_numbers<[1], [0], [0], [1], [0, 0, 1, 1], [], []>} : vector<8x8xbf16>, vector<8x32xbf16>, vector<8x32xf32> -> vector<8x32xf32>
    %409 = arith.addf %384, %408 : vector<8x32xf32>
    %410 = vector.broadcast %308 : vector<1x32xf32> to vector<8x32xf32>
    %411 = arith.addf %409, %410 : vector<8x32xf32>
    %c0_278 = arith.constant 0 : index
    %c0_279 = arith.constant 0 : index
    %412 = vector.load %arg17[%c0_278, %c0_279] : memref<1x32xf32, #tpu.memory_space<vmem>>, vector<1x32xf32>
    %c0_280 = arith.constant 0 : index
    %c0_281 = arith.constant 0 : index
    %413 = vector.load %arg18[%c0_280, %c0_281] : memref<1x32xf32, #tpu.memory_space<vmem>>, vector<1x32xf32>
    %414 = arith.addf %411, %220 : vector<8x32xf32>
    %cst_282 = arith.constant dense<0.000000e+00> : vector<8xf32>
    %415 = vector.multi_reduction <add>, %414, %cst_282 [1] : vector<8x32xf32> to vector<8xf32>
    %416 = vector.shape_cast %415 : vector<8xf32> to vector<8x1xf32>
    %cst_283 = arith.constant 3.200000e+01 : f32
    %417 = vector.broadcast %cst_283 : f32 to vector<8x1xf32>
    %418 = arith.divf %416, %417 : vector<8x1xf32>
    %419 = vector.broadcast %418 : vector<8x1xf32> to vector<8x32xf32>
    %420 = arith.subf %414, %419 : vector<8x32xf32>
    %421 = arith.mulf %420, %420 : vector<8x32xf32>
    %cst_284 = arith.constant dense<0.000000e+00> : vector<8xf32>
    %422 = vector.multi_reduction <add>, %421, %cst_284 [1] : vector<8x32xf32> to vector<8xf32>
    %423 = vector.shape_cast %422 : vector<8xf32> to vector<8x1xf32>
    %cst_285 = arith.constant 3.200000e+01 : f32
    %424 = vector.broadcast %cst_285 : f32 to vector<8x1xf32>
    %425 = arith.divf %423, %424 : vector<8x1xf32>
    %426 = vector.broadcast %418 : vector<8x1xf32> to vector<8x32xf32>
    %427 = arith.subf %414, %426 : vector<8x32xf32>
    %cst_286 = arith.constant 9.99999974E-6 : f32
    %428 = vector.broadcast %cst_286 : f32 to vector<8x1xf32>
    %429 = arith.addf %425, %428 : vector<8x1xf32>
    %430 = math.rsqrt %429 : vector<8x1xf32>
    %431 = vector.broadcast %430 : vector<8x1xf32> to vector<8x32xf32>
    %432 = arith.mulf %427, %431 : vector<8x32xf32>
    %433 = vector.broadcast %412 : vector<1x32xf32> to vector<8x32xf32>
    %434 = arith.mulf %432, %433 : vector<8x32xf32>
    %435 = vector.broadcast %413 : vector<1x32xf32> to vector<8x32xf32>
    %436 = arith.addf %434, %435 : vector<8x32xf32>
    %437 = arith.truncf %436 : vector<8x32xf32> to vector<8x32xbf16>
    %c0_287 = arith.constant 0 : index
    %c0_288 = arith.constant 0 : index
    %438 = vector.load %arg19[%c0_287, %c0_288] : memref<32x64xbf16, #tpu.memory_space<vmem>>, vector<32x64xbf16>
    %cst_289 = arith.constant dense<0.000000e+00> : vector<8x64xf32>
    %439 = tpu.matmul %437, %438, %cst_289 {dimension_numbers = #tpu.dot_dimension_numbers<[1], [0], [0], [1], [0, 0, 1, 1], [], []>} : vector<8x32xbf16>, vector<32x64xbf16>, vector<8x64xf32> -> vector<8x64xf32>
    %c0_290 = arith.constant 0 : index
    %c0_291 = arith.constant 0 : index
    %440 = vector.load %arg20[%c0_290, %c0_291] : memref<1x64xf32, #tpu.memory_space<vmem>>, vector<1x64xf32>
    %441 = vector.broadcast %440 : vector<1x64xf32> to vector<8x64xf32>
    %442 = arith.addf %439, %441 : vector<8x64xf32>
    %cst_292 = arith.constant 0.000000e+00 : f32
    %443 = vector.broadcast %cst_292 : f32 to vector<8x64xf32>
    %444 = arith.maximumf %442, %443 : vector<8x64xf32>
    %445 = arith.truncf %444 : vector<8x64xf32> to vector<8x64xbf16>
    %c0_293 = arith.constant 0 : index
    %c0_294 = arith.constant 0 : index
    %446 = vector.load %arg21[%c0_293, %c0_294] : memref<64x32xbf16, #tpu.memory_space<vmem>>, vector<64x32xbf16>
    %cst_295 = arith.constant dense<0.000000e+00> : vector<8x32xf32>
    %447 = tpu.matmul %445, %446, %cst_295 {dimension_numbers = #tpu.dot_dimension_numbers<[1], [0], [0], [1], [0, 0, 1, 1], [], []>} : vector<8x64xbf16>, vector<64x32xbf16>, vector<8x32xf32> -> vector<8x32xf32>
    %c0_296 = arith.constant 0 : index
    %c0_297 = arith.constant 0 : index
    %448 = vector.load %arg22[%c0_296, %c0_297] : memref<1x32xf32, #tpu.memory_space<vmem>>, vector<1x32xf32>
    %449 = vector.broadcast %448 : vector<1x32xf32> to vector<8x32xf32>
    %450 = arith.addf %447, %449 : vector<8x32xf32>
    %c0_298 = arith.constant 0 : index
    %c0_299 = arith.constant 0 : index
    %451 = vector.load %arg23[%c0_298, %c0_299] : memref<1x32xf32, #tpu.memory_space<vmem>>, vector<1x32xf32>
    %c0_300 = arith.constant 0 : index
    %c0_301 = arith.constant 0 : index
    %452 = vector.load %arg24[%c0_300, %c0_301] : memref<1x32xf32, #tpu.memory_space<vmem>>, vector<1x32xf32>
    %453 = arith.addf %450, %436 : vector<8x32xf32>
    %cst_302 = arith.constant dense<0.000000e+00> : vector<8xf32>
    %454 = vector.multi_reduction <add>, %453, %cst_302 [1] : vector<8x32xf32> to vector<8xf32>
    %455 = vector.shape_cast %454 : vector<8xf32> to vector<8x1xf32>
    %cst_303 = arith.constant 3.200000e+01 : f32
    %456 = vector.broadcast %cst_303 : f32 to vector<8x1xf32>
    %457 = arith.divf %455, %456 : vector<8x1xf32>
    %458 = vector.broadcast %457 : vector<8x1xf32> to vector<8x32xf32>
    %459 = arith.subf %453, %458 : vector<8x32xf32>
    %460 = arith.mulf %459, %459 : vector<8x32xf32>
    %cst_304 = arith.constant dense<0.000000e+00> : vector<8xf32>
    %461 = vector.multi_reduction <add>, %460, %cst_304 [1] : vector<8x32xf32> to vector<8xf32>
    %462 = vector.shape_cast %461 : vector<8xf32> to vector<8x1xf32>
    %cst_305 = arith.constant 3.200000e+01 : f32
    %463 = vector.broadcast %cst_305 : f32 to vector<8x1xf32>
    %464 = arith.divf %462, %463 : vector<8x1xf32>
    %465 = vector.broadcast %457 : vector<8x1xf32> to vector<8x32xf32>
    %466 = arith.subf %453, %465 : vector<8x32xf32>
    %cst_306 = arith.constant 9.99999974E-6 : f32
    %467 = vector.broadcast %cst_306 : f32 to vector<8x1xf32>
    %468 = arith.addf %464, %467 : vector<8x1xf32>
    %469 = math.rsqrt %468 : vector<8x1xf32>
    %470 = vector.broadcast %469 : vector<8x1xf32> to vector<8x32xf32>
    %471 = arith.mulf %466, %470 : vector<8x32xf32>
    %472 = vector.broadcast %451 : vector<1x32xf32> to vector<8x32xf32>
    %473 = arith.mulf %471, %472 : vector<8x32xf32>
    %474 = vector.broadcast %452 : vector<1x32xf32> to vector<8x32xf32>
    %475 = arith.addf %473, %474 : vector<8x32xf32>
    %c0_307 = arith.constant 0 : index
    %c0_308 = arith.constant 0 : index
    %c0_309 = arith.constant 0 : index
    %476 = vector.load %arg25[%c0_307, %c0_308, %c0_309] : memref<1x8x32xf32, #tpu.memory_space<vmem>>, vector<1x8x32xf32>
    %477 = vector.shape_cast %476 : vector<1x8x32xf32> to vector<8x32xf32>
    %478 = vector.shape_cast %475 : vector<8x32xf32> to vector<1x8x32xf32>
    tpu.vector_store %arg25[%c0_307, %c0_308, %c0_309], %478 {strides = array<i32>} : memref<1x8x32xf32, #tpu.memory_space<vmem>>, vector<1x8x32xf32>,
    return
  }
  func.func @transform_0(%arg0: i32) -> (i32, i32, i32) {
    %c0_i32 = arith.constant 0 : i32
    %c0_i32_0 = arith.constant 0 : i32
    %c0_i32_1 = arith.constant 0 : i32
    return %arg0, %c0_i32, %c0_i32_0 : i32, i32, i32
  }
  func.func @transform_1(%arg0: i32) -> (i32, i32, i32) {
    %c0_i32 = arith.constant 0 : i32
    %c0_i32_0 = arith.constant 0 : i32
    %c0_i32_1 = arith.constant 0 : i32
    return %arg0, %c0_i32, %c0_i32_0 : i32, i32, i32
  }
  func.func @transform_2(%arg0: i32) -> (i32, i32, i32) {
    %c0_i32 = arith.constant 0 : i32
    %c0_i32_0 = arith.constant 0 : i32
    %c0_i32_1 = arith.constant 0 : i32
    return %arg0, %c0_i32, %c0_i32_0 : i32, i32, i32
  }
  func.func @transform_3(%arg0: i32) -> (i32, i32, i32) {
    %c0_i32 = arith.constant 0 : i32
    %c0_i32_0 = arith.constant 0 : i32
    %c0_i32_1 = arith.constant 0 : i32
    return %arg0, %c0_i32, %c0_i32_0 : i32, i32, i32
  }
  func.func @transform_4(%arg0: i32) -> (i32, i32, i32) {
    %c0_i32 = arith.constant 0 : i32
    %c0_i32_0 = arith.constant 0 : i32
    %c0_i32_1 = arith.constant 0 : i32
    %c0_i32_2 = arith.constant 0 : i32
    return %c0_i32, %c0_i32_0, %c0_i32_1 : i32, i32, i32
  }
  func.func @transform_5(%arg0: i32) -> (i32, i32, i32) {
    %c0_i32 = arith.constant 0 : i32
    %c0_i32_0 = arith.constant 0 : i32
    %c0_i32_1 = arith.constant 0 : i32
    %c0_i32_2 = arith.constant 0 : i32
    return %c0_i32, %c0_i32_0, %c0_i32_1 : i32, i32, i32
  }
  func.func @transform_6(%arg0: i32) -> (i32, i32, i32) {
    %c0_i32 = arith.constant 0 : i32
    %c0_i32_0 = arith.constant 0 : i32
    %c0_i32_1 = arith.constant 0 : i32
    %c0_i32_2 = arith.constant 0 : i32
    return %c0_i32, %c0_i32_0, %c0_i32_1 : i32, i32, i32
  }
  func.func @transform_7(%arg0: i32) -> (i32, i32) {
    %c0_i32 = arith.constant 0 : i32
    %c0_i32_0 = arith.constant 0 : i32
    %c0_i32_1 = arith.constant 0 : i32
    return %c0_i32, %c0_i32_0 : i32, i32
  }
  func.func @transform_8(%arg0: i32) -> (i32, i32) {
    %c0_i32 = arith.constant 0 : i32
    %c0_i32_0 = arith.constant 0 : i32
    %c0_i32_1 = arith.constant 0 : i32
    return %c0_i32, %c0_i32_0 : i32, i32
  }
  func.func @transform_9(%arg0: i32) -> (i32, i32) {
    %c0_i32 = arith.constant 0 : i32
    %c0_i32_0 = arith.constant 0 : i32
    %c0_i32_1 = arith.constant 0 : i32
    return %c0_i32, %c0_i32_0 : i32, i32
  }
  func.func @transform_10(%arg0: i32) -> (i32, i32, i32) {
    %c0_i32 = arith.constant 0 : i32
    %c0_i32_0 = arith.constant 0 : i32
    %c0_i32_1 = arith.constant 0 : i32
    %c0_i32_2 = arith.constant 0 : i32
    return %c0_i32, %c0_i32_0, %c0_i32_1 : i32, i32, i32
  }
  func.func @transform_11(%arg0: i32) -> (i32, i32, i32) {
    %c0_i32 = arith.constant 0 : i32
    %c0_i32_0 = arith.constant 0 : i32
    %c0_i32_1 = arith.constant 0 : i32
    %c0_i32_2 = arith.constant 0 : i32
    return %c0_i32, %c0_i32_0, %c0_i32_1 : i32, i32, i32
  }
  func.func @transform_12(%arg0: i32) -> (i32, i32, i32) {
    %c0_i32 = arith.constant 0 : i32
    %c0_i32_0 = arith.constant 0 : i32
    %c0_i32_1 = arith.constant 0 : i32
    %c0_i32_2 = arith.constant 0 : i32
    return %c0_i32, %c0_i32_0, %c0_i32_1 : i32, i32, i32
  }
  func.func @transform_13(%arg0: i32) -> (i32, i32, i32) {
    %c0_i32 = arith.constant 0 : i32
    %c0_i32_0 = arith.constant 0 : i32
    %c0_i32_1 = arith.constant 0 : i32
    %c0_i32_2 = arith.constant 0 : i32
    return %c0_i32, %c0_i32_0, %c0_i32_1 : i32, i32, i32
  }
  func.func @transform_14(%arg0: i32) -> (i32, i32, i32) {
    %c0_i32 = arith.constant 0 : i32
    %c0_i32_0 = arith.constant 0 : i32
    %c0_i32_1 = arith.constant 0 : i32
    %c0_i32_2 = arith.constant 0 : i32
    return %c0_i32, %c0_i32_0, %c0_i32_1 : i32, i32, i32
  }
  func.func @transform_15(%arg0: i32) -> (i32, i32) {
    %c0_i32 = arith.constant 0 : i32
    %c0_i32_0 = arith.constant 0 : i32
    %c0_i32_1 = arith.constant 0 : i32
    return %c0_i32, %c0_i32_0 : i32, i32
  }
  func.func @transform_16(%arg0: i32) -> (i32, i32) {
    %c0_i32 = arith.constant 0 : i32
    %c0_i32_0 = arith.constant 0 : i32
    %c0_i32_1 = arith.constant 0 : i32
    return %c0_i32, %c0_i32_0 : i32, i32
  }
  func.func @transform_17(%arg0: i32) -> (i32, i32) {
    %c0_i32 = arith.constant 0 : i32
    %c0_i32_0 = arith.constant 0 : i32
    %c0_i32_1 = arith.constant 0 : i32
    return %c0_i32, %c0_i32_0 : i32, i32
  }
  func.func @transform_18(%arg0: i32) -> (i32, i32) {
    %c0_i32 = arith.constant 0 : i32
    %c0_i32_0 = arith.constant 0 : i32
    %c0_i32_1 = arith.constant 0 : i32
    return %c0_i32, %c0_i32_0 : i32, i32
  }
  func.func @transform_19(%arg0: i32) -> (i32, i32) {
    %c0_i32 = arith.constant 0 : i32
    %c0_i32_0 = arith.constant 0 : i32
    %c0_i32_1 = arith.constant 0 : i32
    return %c0_i32, %c0_i32_0 : i32, i32
  }
  func.func @transform_20(%arg0: i32) -> (i32, i32) {
    %c0_i32 = arith.constant 0 : i32
    %c0_i32_0 = arith.constant 0 : i32
    %c0_i32_1 = arith.constant 0 : i32
    return %c0_i32, %c0_i32_0 : i32, i32
  }
  func.func @transform_21(%arg0: i32) -> (i32, i32) {
    %c0_i32 = arith.constant 0 : i32
    %c0_i32_0 = arith.constant 0 : i32
    %c0_i32_1 = arith.constant 0 : i32
    return %c0_i32, %c0_i32_0 : i32, i32
  }
  func.func @transform_22(%arg0: i32) -> (i32, i32) {
    %c0_i32 = arith.constant 0 : i32
    %c0_i32_0 = arith.constant 0 : i32
    %c0_i32_1 = arith.constant 0 : i32
    return %c0_i32, %c0_i32_0 : i32, i32
  }
  func.func @transform_23(%arg0: i32) -> (i32, i32) {
    %c0_i32 = arith.constant 0 : i32
    %c0_i32_0 = arith.constant 0 : i32
    %c0_i32_1 = arith.constant 0 : i32
    return %c0_i32, %c0_i32_0 : i32, i32
  }
  func.func @transform_24(%arg0: i32) -> (i32, i32, i32) {
    %c0_i32 = arith.constant 0 : i32
    %c0_i32_0 = arith.constant 0 : i32
    %c0_i32_1 = arith.constant 0 : i32
    return %arg0, %c0_i32, %c0_i32_0 : i32, i32, i32
  }
  func.func @transform_25(%arg0: i32) -> (i32, i32, i32, i32) {
    %c0_i32 = arith.constant 0 : i32
    %c0_i32_0 = arith.constant 0 : i32
    %c0_i32_1 = arith.constant 0 : i32
    %c0_i32_2 = arith.constant 0 : i32
    return %arg0, %c0_i32, %c0_i32_0, %c0_i32_1 : i32, i32, i32, i32
  }
  func.func @transform_26(%arg0: i32) -> (i32, i32, i32, i32) {
    %c0_i32 = arith.constant 0 : i32
    %c0_i32_0 = arith.constant 0 : i32
    %c0_i32_1 = arith.constant 0 : i32
    %c0_i32_2 = arith.constant 0 : i32
    return %arg0, %c0_i32, %c0_i32_0, %c0_i32_1 : i32, i32, i32, i32
  }
}

</mosaic_0001>

<bundles_post_ra>
// kernel: transformer_forward.9
= control target key start
LH: loop header
LB: loop body
LE: loop exit
PB: predicated region body
PF: predicated region fallthrough
CT: control target
= control target key end

     0   :  { %8 = vsyncpa [#allocation3], 0  ;;  %s522_s0 = inlined_call_operand.vmem [shape: f32[2,8,32], index: 0, kind: input, shape index: {}]   ;;  %s523_s1 = inlined_call_operand.vmem [shape: bf16[32,48], index: 1, kind: input, shape index: {}]   ;;  %s524_s2 = inlined_call_operand.vmem [shape: f32[1,48], index: 2, kind: input, shape index: {}]   ;;  %s525_s3 = inlined_call_operand.hbm [shape: f32[2,8,48], index: 3, kind: output, shape index: {}]  }
   0x1   :  { %10 = vsyncpa [#allocation3 + $0x1], 0  ;;  %s428_s12 = smov 0   ;;  %s430_s13 = smov 0  }
   0x2   :  { %s432_s14 = smov 0   ;;  %s434_s15 = smov 0  }
   0x3 LB: > { %s449_s16 = sadd.s32 4294967295, %s406_s15   ;;  %s283_s17 = sadd.s32 4294967294, %s406_s15   ;;  %s406_s15 = sphi %s434_s15, %s531_s15   ;;  %s402_s14 = sphi %s432_s14, %s530_s14   ;;  %s398_s13 = sphi %s430_s13, %s529_s13   ;;  %s394_s12 = sphi %s428_s12, %s528_s12  }
   0x4   : > { %s453_s18 = sadd.s32 1, %s406_s15   ;;  %s91_s19 = sadd.s32 1, %s402_s14 }
   0x5   : > { %s88_s20 = ssub.s32 %s406_s15, %s453_s18  ;;  %p101_p0 = scmp.ne.s32.totalorder %s402_s14, %s398_s13 }
   0x6   : > { %p89_p1 = scmp.eq.s32.totalorder %s88_s20, 0  ;;  %p102_p2 = scmp.eq.s32.totalorder %s449_s16, 1 }
   0x7   : > { %p107_p3 = scmp.ne.s32.totalorder %s398_s13, %s394_s12  ;;  %p108_p4 = scmp.eq.s32.totalorder %s283_s17, 1 }
   0x8   : > { %s464_s21 = scalar_select %p89_p1, %s402_s14, %s91_s19  }
   0x9   : > { %p466_p5 = por %p102_p2, %p101_p0  ;;  %p470_p6 = por %p108_p4, %p107_p3 }
   0xa   : > { %p286_p7 = scmp.ge.s32.totalorder %s406_s15, 1  ;;  %p139_p8 = scmp.lt.s32.totalorder %s406_s15, 3 }
   0xc   : > { %p140_p9 = pnand %p286_p7, %p139_p8 }
   0xd   : > { %p162_p10 = scmp.lt.s32.totalorder (!%p140_p9), %s449_s16, 1  ;;  %s159_s6 = sand.u32 (!%p140_p9), 1, %s398_s13  }
   0xe   : > { %143 = sbr.rel (%p140_p9) target bundleno = 161 (0xa1), region = 32  ;;  %s299_s7 = sshll.u32 (!%p140_p9), %s449_s16, 3 }
   0xf   : > { %s287_s8 = sshll.u32 (!%p140_p9), %s159_s6, 3  ;;  %s219_s11 = scalar_lea.hbm (!%p140_p9), %s525_s3, %s299_s7 }
  0x10   : > { %s161_s20 = scalar_lea.vmem (!%p140_p9), [#allocation2], %s287_s8  ;;  %s223_s25 = sshll.u32 (!%p140_p9), %s219_s11, 4  ;;  %s224_s25 = int_to_ptr.hbm [resolvable:$true] %s223_s25 }
  0x11   : > { %s221_s24 = sshll.u32 (!%p140_p9), %s161_s20, 4  ;;  %s358_s26 = sshra.s32 (!%p140_p9), %s224_s25, 4  ;;  %s222_s24 = int_to_ptr.vmem [resolvable:$true] %s221_s24  ;;  %s359_s26 = int_to_ptr.hbm [resolvable:$true] %s358_s26 }
  0x12   : > { %s360_s27 = scalar_lea.hbm (!%p140_p9), %s359_s26, 8  ;;  %s364_s30 = scalar_lea.hbm (!%p140_p9), %s525_s3, 16 }
  0x13   : > { %v303_v0 = vld [vmem:[%s523_s1 + $0x8] sm:$0xff]  ;;  %v302_v1 = vld [vmem:[%s523_s1] sm:$0xff]  ;;  %s163_s28 = scalar_select %p162_p10, %s449_s16, 1  ;;  %vm189_vm0 = vcmask 261120   ;;  %vm206_vm1 = vcmask 392192  }
  0x14   : > { %199 = vmatpush.bf16.msra.mxu0 %v303_v0  ;;  %v343_v4 = vld [vmem:[%s524_s2] ss:$0 sm:$0xff]  ;;  %s209_s16 = scalar_lea.sflag [#allocation3], %s159_s6  ;;  %p361_p11 = scmp.ne.s32.totalorder %s359_s26, %s360_s27 }
  0x15   : > { %s288_s29 = sshll.u32 %s163_s28, 3  ;;  %p365_p0 = scmp.lt.s32.totalorder %s359_s26, %s525_s3 }
  0x16   : > { %s165_s5 = scalar_lea.vmem %s522_s0, %s288_s29  ;;  %p362_p12 = pnand %p361_p11, %p466_p5 }
  0x17   : > { %v167_v2 = vld [vmem:[%s165_s5] sm:$0xff]  ;;  %p366_p1 = scmp.lt.s32.totalorder %s364_s30, %s360_s27 }
  0x18   : > { %200 = vmatpush.bf16.msra.mxu0 %v302_v1  ;;  %v168_v3 = vpack.c.bf16 %v167_v2, %v167_v2  ;;  %p363_p13 = pneg %p362_p12 }
  0x19   : > { %p367_p2 = por %p366_p1, %p365_p0 }
  0x1b   : > { %297 = vmatmul.msk.bf16.vlgmr.msra.gmra.mxu0 %vm189_vm0, %v168_v3  ;;  %p368_p3 = pnand %p367_p2, %p363_p13 }
  0x98   : > { %v202_v5 = vpop.f32.mrf.mxu0 }
  0x99   : > { %v203_v6 = vadd.f32 %v343_v4, %v202_v5 }
  0x9b   : > { %207 = vst.msk [vmem:[%s161_s20] sm:$0xff] %vm206_vm1, %v203_v6 }
  0x9c   : > { %371 = shalt.err (!%p368_p3)
}
  0x9d   : > { %304 = dma.vmem_to_hbm [thread:$0]  (%p466_p5), %s222_s24, 128, %s224_s25, %s209_s16  }
  0xa0   : > { %v204_v7 = vpop.f32.mrf.mxu0 }
  0xa1 PF: > { %p310_p4 = scmp.ge.s32.totalorder %s406_s15, 2  ;;  %s235_s6 = sand.u32 1, %s394_s12  }
  0xa2   : > { %s236_s7 = scalar_lea.sflag [#allocation3], %s235_s6 }
  0xa3   : > { %p307_p7 = pnand %p310_p4, %p470_p6 }
  0xa5   : > { %p308_p8 = pneg %p307_p7 }
  0xa7   : > { %389 = dma.done.wait (%p308_p8), %s236_s7, 128  }
  0xa8   : > { %391 = vsyncadd (%p308_p8), %s236_s7, 4294967168  ;;  %p13_p9 = scmp.ge.s32.totalorder %s453_s18, 4   ;;  %s528_s12 = smov %s398_s13 }
  0xa9   : > { %s529_s13 = smov %s402_s14  ;;  %s530_s14 = smov %s464_s21 }
  0xaa   : > { %s531_s15 = smov %s453_s18  ;;  %15 = sbr.rel (!%p13_p9) target bundleno = 3 (0x3), region = 67 }
  0xaf   :  { %242 = vsyncpa [#allocation3], 1 }
  0xb0   :  { %244 = vsyncpa [#allocation3 + $0x1], 1 }

// kernel: transformer_forward.5
= control target key start
LH: loop header
LB: loop body
LE: loop exit
PB: predicated region body
PF: predicated region fallthrough
CT: control target
= control target key end

     0   :  { %s2383_s0 = inlined_call_operand.vmem [shape: f32[2,8,32], index: 0, kind: input, shape index: {}]   ;;  %s2384_s1 = inlined_call_operand.vmem [shape: f32[2,8,8], index: 1, kind: input, shape index: {}]   ;;  %s2385_s2 = inlined_call_operand.vmem [shape: bf16[12,32,8], index: 2, kind: input, shape index: {}]   ;;  %s2386_s3 = inlined_call_operand.vmem [shape: f32[12,1,8], index: 3, kind: input, shape index: {}]   ;;  %s2387_s4 = inlined_call_operand.vmem [shape: bf16[4,8,32], index: 4, kind: input, shape index: {}]   ;;  %s2388_s5 = inlined_call_operand.vmem [shape: f32[1,32], index: 5, kind: input, shape index: {}]   ;;  %s2389_s6 = inlined_call_operand.vmem [shape: f32[1,32], index: 6, kind: input, shape index: {}]   ;;  %s2390_s7 = inlined_call_operand.vmem [shape: f32[1,32], index: 7, kind: input, shape index: {}]   ;;  %s2391_s8 = inlined_call_operand.vmem [shape: bf16[32,64], index: 8, kind: input, shape index: {}]   ;;  %s2392_s9 = inlined_call_operand.vmem [shape: f32[1,64], index: 9, kind: input, shape index: {}]   ;;  %s2393_s10 = inlined_call_operand.vmem [shape: bf16[64,32], index: 10, kind: input, shape index: {}]   ;;  %s2394_s11 = inlined_call_operand.vmem [shape: f32[1,32], index: 11, kind: input, shape index: {}]   ;;  %s2395_s12 = inlined_call_operand.vmem [shape: f32[1,32], index: 12, kind: input, shape index: {}]   ;;  %s2396_s13 = inlined_call_operand.vmem [shape: f32[1,32], index: 13, kind: input, shape index: {}]   ;;  %s2397_s14 = inlined_call_operand.vmem [shape: f32[2,8,32], index: 14, kind: output, shape index: {0}]   ;;  %s2398_s15 = inlined_call_operand.hbm [shape: f32[2,4,8,8], index: 15, kind: output, shape index: {1}]  }
   0x1   :  { %2405 = sst [smem:[#allocation11_spill]] %s2383_s0 }
   0x2   :  { %2406 = sst [smem:[#allocation12_spill]] %s2384_s1 }
   0x3   :  { %2407 = sst [smem:[#allocation13_spill]] %s2397_s14 }
   0x4   :  { %21 = vsyncpa [#allocation3], 0 }
   0x5   :  { %23 = vsyncpa [#allocation3 + $0x1], 0  ;;  %s2028_s18 = smov 0   ;;  %s2030_s19 = smov 0  }
   0x6   :  { %s2032_s20 = smov 0   ;;  %s2034_s21 = smov 0  }
   0x7 LB: > { %2408 = sst [smem:[#allocation5_spill]] %s1931_s18  ;;  %s2049_s22 = sadd.s32 4294967295, %s1943_s21   ;;  %s1943_s21 = sphi %s2034_s21, %s2422_s21   ;;  %s1939_s20 = sphi %s2032_s20, %s2424_s20   ;;  %s1935_s19 = sphi %s2030_s19, %s2426_s19   ;;  %s1931_s18 = sphi %s2028_s18, %s2425_s18  }
   0x8   : > { %2409 = sst [smem:[#allocation6_spill]] %s1939_s20  ;;  %s1547_s23 = sadd.s32 4294967294, %s1943_s21  }
   0x9   : > { %2410 = sst [smem:[#allocation7_spill]] %s1943_s21  ;;  %s2053_s24 = sadd.s32 1, %s1943_s21  }
   0xa   : > { %2411 = sst [smem:[#allocation8_spill]] %s2053_s24  ;;  %s366_s25 = sadd.s32 1, %s1939_s20 }
   0xb   : > { %s363_s26 = ssub.s32 %s1943_s21, %s2053_s24  ;;  %p376_p0 = scmp.ne.s32.totalorder %s1939_s20, %s1935_s19 }
   0xc   : > { %p364_p1 = scmp.eq.s32.totalorder %s363_s26, 0  ;;  %p377_p2 = scmp.eq.s32.totalorder %s2049_s22, 1 }
   0xd   : > { %p382_p3 = scmp.ne.s32.totalorder %s1935_s19, %s1931_s18  ;;  %p383_p4 = scmp.eq.s32.totalorder %s1547_s23, 1 }
   0xe   : > { %s2064_s27 = scalar_select %p364_p1, %s1939_s20, %s366_s25  }
   0xf   : > { %p2066_p5 = por %p377_p2, %p376_p0  ;;  %p2070_p6 = por %p383_p4, %p382_p3 }
  0x10   : > { %2412 = sst [smem:[#allocation9_spill]] %s2064_s27  ;;  %p1550_p7 = scmp.ge.s32.totalorder %s1943_s21, 1 }
  0x11   : > { %s2414_s29 = scalar_select %p2070_p6, 1, 0 }
  0x12   : > { %p451_p8 = scmp.lt.s32.totalorder %s1943_s21, 3 }
  0x13   : > { %2415 = sst [smem:[#allocation10_spill]] %s2414_s29 }
  0x14   : > { %p452_p9 = pnand %p1550_p7, %p451_p8 }
  0x15   : > { %p506_p10 = scmp.lt.s32.totalorder (!%p452_p9), %s2049_s22, 1  ;;  %s2416_s0 = sld [smem:[#allocation11_spill]] (!%p452_p9) }
  0x16   : > { %455 = sbr.rel (%p452_p9) target bundleno = 2174 (0x87e), region = 76  ;;  %s2417_s1 = sld [smem:[#allocation12_spill]] (!%p452_p9) }
  0x17   : > { %s503_s17 = sand.u32 (!%p452_p9), 1, %s1935_s19  }
  0x18   : > { %s1551_s23 = sshll.u32 (!%p452_p9), %s503_s17, 5  ;;  %s1431_s27 = scalar_lea.sflag (!%p452_p9), [#allocation3], %s503_s17 }
  0x19   : > { %s2242_s25 = scalar_lea.vmem (!%p452_p9), [#allocation2], %s1551_s23 }
  0x1a   : > { %s1446_s14 = sshll.u32 (!%p452_p9), %s2242_s25, 4  ;;  %s1447_s14 = int_to_ptr.vmem [resolvable:$true] %s1446_s14 }
  0x1b   : > { %v1768_v0 = vld [vmem:[%s2385_s2 + $0x8] sm:$0xff]  ;;  %v1770_v1 = vld [vmem:[%s2385_s2 + $0x18] sm:$0xff]  ;;  %v1767_v2 = vld [vmem:[%s2385_s2] sm:$0xff]  ;;  %s507_s24 = scalar_select %p506_p10, %s2049_s22, 1  ;;  %vm542_vm0 = vcmask 261120   ;;  %vm948_vm1 = vcmask 64512  }
  0x1c   : > { %552 = vmatpush.bf16.msra.mxu0 %v1768_v0  ;;  %587 = vmatpush.bf16.msra.mxu1 %v1770_v1  ;;  %v1769_v3 = vld [vmem:[%s2385_s2 + $0x10] sm:$0xff]  ;;  %v1772_v4 = vld [vmem:[%s2385_s2 + $0x28] sm:$0xff]  ;;  %v1778_v6 = vld [vmem:[%s2385_s2 + $0x58] sm:$0xff]  ;;  %vm985_vm2 = vcmask 1043456   ;;  %vm1375_vm7 = vcmask 523264  }
  0x1d   : > { %v1776_v5 = vld [vmem:[%s2385_s2 + $0x48] sm:$0xff]  ;;  %s2099_s21 = sshll.u32 %s507_s24, 3  ;;  %622 = vmatpush.bf16.msra.mxu2 %v1772_v4  ;;  %v1771_v7 = vld [vmem:[%s2385_s2 + $0x20] sm:$0xff]  ;;  %v1777_v10 = vld [vmem:[%s2385_s2 + $0x50] sm:$0xff] }
  0x1e   : > { %v1780_v8 = vld [vmem:[%s2385_s2 + $0x68] sm:$0xff]  ;;  %s509_s18 = scalar_lea.vmem %s2416_s0, %s2099_s21  ;;  %v1775_v9 = vld [vmem:[%s2385_s2 + $0x40] sm:$0xff]  ;;  %v1786_v51 = vld [vmem:[%s2385_s2 + $0x98] sm:$0xff]  ;;  %s513_s30 = scalar_lea.vmem %s2417_s1, %s2099_s21 }
  0x1f   : > { %v2117_v11 = vld [vmem:[%s509_s18] sm:$0xff]  ;;  %v1784_v14 = vld [vmem:[%s2385_s2 + $0x88] sm:$0xff]  ;;  %v1785_v52 = vld [vmem:[%s2385_s2 + $0x90] sm:$0xff]  ;;  %s1797_s18 = sshll.u32 %s2049_s22, 5  ;;  %s1901_s22 = scalar_lea.hbm %s2398_s15, 64 }
  0x20   : > { %553 = vmatpush.bf16.msra.mxu0 %v1767_v2  ;;  %588 = vmatpush.bf16.msra.mxu1 %v1769_v3  ;;  %v2121_v12 = vpack.c.bf16 %v2117_v11, %v2117_v11  ;;  %v1779_v13 = vld [vmem:[%s2385_s2 + $0x60] sm:$0xff]  ;;  %v1788_v16 = vld [vmem:[%s2385_s2 + $0xa8] sm:$0xff]  ;;  %s1445_s23 = scalar_lea.hbm %s2398_s15, %s1797_s18 }
  0x21   : > { %623 = vmatpush.bf16.msra.mxu2 %v1771_v7  ;;  %v1783_v15 = vld [vmem:[%s2385_s2 + $0x80] sm:$0xff]  ;;  %v1846_v53 = vld [vmem:[%s2386_s3 + $0x8] ss:$0 sm:$0xff]  ;;  %s1448_s20 = sshll.u32 %s1445_s23, 4  ;;  %s1449_s20 = int_to_ptr.hbm [resolvable:$true] %s1448_s20 }
  0x22   : > { %v1787_v17 = vld [vmem:[%s2385_s2 + $0xa0] sm:$0xff]  ;;  %s1895_s26 = sshra.s32 %s1449_s20, 4  ;;  %s1896_s26 = int_to_ptr.hbm [resolvable:$true] %s1895_s26 }
  0x23   : > { %1563 = vmatmul.msk.bf16.vlgmr.msra.gmra.mxu0 %vm542_vm0, %v2121_v12  ;;  %1577 = vmatmul.msk.bf16.vlgmr.msra.gmra.mxu1 %vm542_vm0, %v2121_v12  ;;  %v1842_v23 = vld [vmem:[%s2386_s3 + $0x4] ss:$0 sm:$0xff]  ;;  %v1843_v24 = vld [vmem:[%s2386_s3 + $0x5] ss:$0 sm:$0xff]  ;;  %v1841_v27 = vld [vmem:[%s2386_s3 + $0x1] ss:$0 sm:$0xff]  ;;  %p1902_p0 = scmp.lt.s32.totalorder %s1896_s26, %s2398_s15 }
  0x24   : > { %692 = vmatpush.bf16.msrb.mxu0 %v1776_v5  ;;  %727 = vmatpush.bf16.msrb.mxu1 %v1778_v6  ;;  %v1840_v31 = vld [vmem:[%s2386_s3] ss:$0 sm:$0xff]  ;;  %v1845_v37 = vld [vmem:[%s2386_s3 + $0x6] ss:$0 sm:$0xff]  ;;  %v1844_v47 = vld [vmem:[%s2386_s3 + $0x2] ss:$0 sm:$0xff] }
  0x25   : > { %762 = vmatpush.bf16.msrb.mxu2 %v1780_v8  ;;  %v521_v61 = vld [vmem:[%s513_s30] sm:$0xff]  ;;  %s1897_s30 = scalar_lea.hbm %s1896_s26, 32 }
  0x26   : > { %1591 = vmatmul.msk.bf16.vlgmr.msra.gmra.mxu2 %vm542_vm0, %v2121_v12  ;;  %v2194_v62 = vmul.f32 -1e+09, %v521_v61  ;;  %p1898_p11 = scmp.ne.s32.totalorder %s1896_s26, %s1897_s30  ;;  %p1903_p1 = scmp.lt.s32.totalorder %s1901_s22, %s1897_s30 }
  0x28   : > { %693 = vmatpush.bf16.msrb.mxu0 %v1775_v9  ;;  %728 = vmatpush.bf16.msrb.mxu1 %v1777_v10  ;;  %p1899_p12 = pnand %p1898_p11, %p2066_p5  ;;  %p1904_p2 = por %p1903_p1, %p1902_p0 }
  0x29   : > { %763 = vmatpush.bf16.msrb.mxu2 %v1779_v13  ;;  %v1774_v13 = vld [vmem:[%s2385_s2 + $0x38] sm:$0xff] }
  0x2a   : > { %657 = vmatpush.bf16.msra.mxu3 %v1774_v13  ;;  %p1900_p13 = pneg %p1899_p12 }
  0x2c   : > { %832 = vmatpush.bf16.msra.mxu0 %v1784_v14  ;;  %867 = vmatpush.bf16.msra.mxu1 %v1786_v51  ;;  %v1773_v14 = vld [vmem:[%s2385_s2 + $0x30] sm:$0xff]  ;;  %v1850_v51 = vld [vmem:[%s2386_s3 + $0x7] ss:$0 sm:$0xff]  ;;  %p1905_p3 = pnand %p1904_p2, %p1900_p13 }
  0x2d   : > { %902 = vmatpush.bf16.msra.mxu2 %v1788_v16  ;;  %v1781_v16 = vld [vmem:[%s2385_s2 + $0x70] sm:$0xff] }
  0x2e   : > { %658 = vmatpush.bf16.msra.mxu3 %v1773_v14 }
  0x30   : > { %833 = vmatpush.bf16.msra.mxu0 %v1783_v15  ;;  %868 = vmatpush.bf16.msra.mxu1 %v1785_v52  ;;  %v1782_v15 = vld [vmem:[%s2385_s2 + $0x78] sm:$0xff] }
  0x31   : > { %903 = vmatpush.bf16.msra.mxu2 %v1787_v17  ;;  %v1790_v17 = vld [vmem:[%s2385_s2 + $0xb8] sm:$0xff]  ;;  %1605 = vmatmul.msk.bf16.vlgmr.msra.gmra.mxu3 %vm542_vm0, %v2121_v12 }
  0x32   : > { %797 = vmatpush.bf16.msrb.mxu3 %v1782_v15 }
  0x33   : > { %1619 = vmatmul.msk.bf16.vlgmr.msrb.gmra.mxu0 %vm542_vm0, %v2121_v12  ;;  %1633 = vmatmul.msk.bf16.vlgmr.msrb.gmra.mxu1 %vm542_vm0, %v2121_v12 }
  0x36   : > { %1647 = vmatmul.msk.bf16.vlgmr.msrb.gmra.mxu2 %vm542_vm0, %v2121_v12  ;;  %798 = vmatpush.bf16.msrb.mxu3 %v1781_v16 }
  0x3a   : > { %937 = vmatpush.bf16.msra.mxu3 %v1790_v17 }
  0x41   : > { %1661 = vmatmul.msk.bf16.vlgmr.msrb.gmra.mxu3 %vm542_vm0, %v2121_v12 }
  0x43   : > { %1675 = vmatmul.msk.bf16.vlgmr.msra.gmra.mxu0 %vm542_vm0, %v2121_v12  ;;  %1689 = vmatmul.msk.bf16.vlgmr.msra.gmra.mxu1 %vm542_vm0, %v2121_v12 }
  0x46   : > { %1703 = vmatmul.msk.bf16.vlgmr.msra.gmra.mxu2 %vm542_vm0, %v2121_v12 }
  0xa0   : > { %v555_v18 = vpop.f32.mrf.mxu0  ;;  %v590_v19 = vpop.f32.mrf.mxu1 }
  0xa1   : > { %v591_v34 = vadd.f32 %v1841_v27, %v590_v19  ;;  %v556_v38 = vadd.f32 %v1840_v31, %v555_v18  ;;  %v1848_v31 = vld [vmem:[%s2386_s3 + $0x9] ss:$0 sm:$0xff] }
  0xa3   : > { %v1004_v41 = vpack.c.bf16 %v591_v34, %v591_v34  ;;  %v946_v44 = vpack.c.bf16 %v556_v38, %v556_v38 }
  0xa8   : > { %v557_v20 = vpop.f32.mrf.mxu0  ;;  %v592_v21 = vpop.f32.mrf.mxu1 }
  0xa9   : > { %v625_v22 = vpop.f32.mrf.mxu2 }
  0xaa   : > { %v626_v49 = vadd.f32 %v1844_v47, %v625_v22 }
  0xac   : > { %v1100_v50 = vpack.c.bf16 %v626_v49, %v626_v49 }
  0xb0   : > { %v695_v25 = vpop.f32.mrf.mxu0  ;;  %v730_v26 = vpop.f32.mrf.mxu1 }
  0xb1   : > { %v696_v28 = vadd.f32 %v1842_v23, %v695_v25  ;;  %v731_v29 = vadd.f32 %v1843_v24, %v730_v26  ;;  %v627_v30 = vpop.f32.mrf.mxu2 }
  0xb3   : > { %v947_v32 = vpack.c.bf16 %v696_v28, %v696_v28  ;;  %v1005_v33 = vpack.c.bf16 %v731_v29, %v731_v29  ;;  %v1789_v28 = vld [vmem:[%s2385_s2 + $0xb0] sm:$0xff]  ;;  %v1847_v29 = vld [vmem:[%s2386_s3 + $0xa] ss:$0 sm:$0xff] }
  0xb4   : > { %938 = vmatpush.bf16.msra.mxu3 %v1789_v28 }
  0xb5   : > { %v953_v35 = vsel %vm948_vm1, %v947_v32, 0  ;;  %v1010_v36 = vsel %vm948_vm1, %v1005_v33, 0 }
  0xb6   : > { %962 = vmatpush.bf16.xpose.msrb.mxu0 %v953_v35  ;;  %1019 = vmatpush.bf16.xpose.msrb.mxu2 %v1010_v36 }
  0xb7   : > { %1717 = vmatmul.msk.bf16.vlgmr.msra.gmra.mxu3 %vm542_vm0, %v2121_v12 }
  0xb8   : > { %v697_v39 = vpop.f32.mrf.mxu0  ;;  %v732_v40 = vpop.f32.mrf.mxu1 }
  0xb9   : > { %v765_v42 = vpop.f32.mrf.mxu2  ;;  %v660_v39 = vpop.f32.mrf.mxu3 }
  0xba   : > { %v766_v43 = vadd.f32 %v1845_v37, %v765_v42 }
  0xbc   : > { %v1101_v45 = vpack.c.bf16 %v766_v43, %v766_v43 }
  0xbd   : > { %1718 = vmatmul.msk.bf16.vlgmr.msrb.gmra.mxu0 %vm948_vm1, %v946_v44  ;;  %1720 = vmatmul.msk.bf16.vlgmr.msrb.gmra.mxu2 %vm948_vm1, %v1004_v41 }
  0xbe   : > { %v1106_v46 = vsel %vm948_vm1, %v1101_v45, 0 }
  0xbf   : > { %1115 = vmatpush.bf16.xpose.msra.mxu2 %v1106_v46 }
  0xc0   : > { %v835_v54 = vpop.f32.mrf.mxu0  ;;  %v870_v33 = vpop.f32.mrf.mxu1 }
  0xc1   : > { %v767_v48 = vpop.f32.mrf.mxu2  ;;  %v836_v55 = vadd.f32 %v1846_v53, %v835_v54  ;;  %v871_v34 = vadd.f32 %v1848_v31, %v870_v33  ;;  %v662_v43 = vpop.f32.mrf.mxu3 }
  0xc3   : > { %v981_v56 = vpack.c.bf16 %v836_v55, %v836_v55  ;;  %v1039_v35 = vpack.c.bf16 %v871_v34, %v871_v34  ;;  %v1003_v55 = vld [vmem:[%s2387_s4] sm:$0xf]  ;;  %v1729_v34 = vld [vmem:[%s2387_s4 + $0x8] sm:$0xf] }
  0xc5   : > { %v987_v57 = vsel %vm985_vm2, %v981_v56, 0  ;;  %v1044_v37 = vsel %vm985_vm2, %v1039_v35, 0  ;;  %v1085_v56 = vsel %vm985_vm2, %v1003_v55, 0  ;;  %v1162_v35 = vsel %vm985_vm2, %v1729_v34, 0  ;;  %v1856_v34 = vld [vmem:[%s2394_s11] ss:$0 sm:$0xff] }
  0xc6   : > { %996 = vmatpush.bf16.msrb.mxu1 %v987_v57  ;;  %1053 = vmatpush.bf16.msrb.mxu3 %v1044_v37  ;;  %v1851_v57 = vld [vmem:[%s2386_s3 + $0xb] ss:$0 sm:$0xff] }
  0xc8   : > { %v837_v58 = vpop.f32.mrf.mxu0  ;;  %v872_v12 = vpop.f32.mrf.mxu1 }
  0xc9   : > { %v905_v59 = vpop.f32.mrf.mxu2  ;;  %v800_v48 = vpop.f32.mrf.mxu3 }
  0xca   : > { %v906_v30 = vadd.f32 %v1847_v29, %v905_v59  ;;  %v801_v52 = vadd.f32 %v1850_v51, %v800_v48  ;;  %1094 = vmatpush.bf16.msra.mxu1 %v1085_v56 }
  0xcc   : > { %v1135_v32 = vpack.c.bf16 %v906_v30, %v906_v30  ;;  %v1179_v53 = vpack.c.bf16 %v801_v52, %v801_v52 }
  0xcd   : > { %1726 = vmatmul.msk.bf16.vlgmr.msra.gmra.mxu2 %vm948_vm1, %v1100_v50 }
  0xce   : > { %v1140_v36 = vsel %vm985_vm2, %v1135_v32, 0  ;;  %v1184_v54 = vsel %vm948_vm1, %v1179_v53, 0 }
  0xcf   : > { %1149 = vmatpush.bf16.msra.mxu3 %v1140_v36  ;;  %v1734_v36 = vld [vmem:[%s2387_s4 + $0xc] sm:$0xf] }
  0xd0   : > { %v1240_v12 = vsel %vm985_vm2, %v1734_v36, 0 }
  0xd1   : > { %v907_v60 = vpop.f32.mrf.mxu2  ;;  %v802_v50 = vpop.f32.mrf.mxu3 }
  0xd2   : > { %v1852_v50 = vld [vmem:[%s2388_s5] ss:$0 sm:$0xff] }
 0x13a   : > { %v964_v63 = vpop.f32.mrf.mxu0  ;;  %v940_v58 = vpop.f32.mrf.mxu3 }
 0x13b   : > { %v965_v0 = vadd.f32 %v964_v63, %v2194_v62  ;;  %v941_v59 = vadd.f32 %v1851_v57, %v940_v58  ;;  %v1945_v57 = vmov 32.0  }
 0x13d   : > { %v968_v1 = vsel %vm948_vm1, %v965_v0, -inf  ;;  %v1213_v60 = vpack.c.bf16 %v941_v59, %v941_v59 }
 0x13e   : > { %969 = vmax.xlane.f32.xlu0 %v968_v1 }
 0x13f   : > { %v1218_v61 = vsel %vm985_vm2, %v1213_v60, 0 }
 0x140   : > { %v1021_v2 = vpop.f32.mrf.mxu2  ;;  %1227 = vmatpush.bf16.msrb.mxu2 %v1218_v61 }
 0x141   : > { %v1022_v3 = vadd.f32 %v1021_v2, %v2194_v62 }
 0x142   : > { %v966_v4 = vpop.f32.mrf.mxu0  ;;  %v942_v63 = vpop.f32.mrf.mxu3 }
 0x143   : > { %v1025_v5 = vsel %vm948_vm1, %v1022_v3, -inf }
 0x144   : > { %1026 = vmax.xlane.f32.xlu1 %v1025_v5  ;;  %v1849_v5 = vld [vmem:[%s2386_s3 + $0x3] ss:$0 sm:$0xff] }
 0x148   : > { %v1023_v6 = vpop.f32.mrf.mxu2 }
 0x150   : > { %v1117_v7 = vpop.f32.mrf.mxu2 }
 0x151   : > { %v2201_v8 = vadd.f32 %v1117_v7, %v2194_v62  ;;  %v661_v7 = vadd.f32 %v1849_v5, %v660_v39  ;;  %v1792_v5 = vld [vmem:[%s2391_s8 + $0x8] sm:$0xff] }
 0x153   : > { %v1121_v9 = vsel %vm948_vm1, %v2201_v8, -inf }
 0x154   : > { %1122 = vmax.xlane.f32.xlu2 %v1121_v9 }
 0x158   : > { %v1119_v10 = vpop.f32.mrf.mxu2 }
 0x159   : > { %v1178_v10 = vpack.c.bf16 %v661_v7, %v661_v7  ;;  %v1796_v7 = vld [vmem:[%s2393_s10 + $0x18] sm:$0xff] }
 0x1b1   : > { %v970_v18 = vpop.xlane.xlu0 %969 }
 0x1b2   : > { %v971_v19 = vsub.f32 %v965_v0, %v970_v18  ;;  %v1723_v0 = vld [vmem:[%s2387_s4 + $0x4] sm:$0xf] }
 0x1b3   : > { %v1066_v1 = vsel %vm985_vm2, %v1723_v0, 0 }
 0x1b4   : > { %v972_v20 = vmul.f32 1.442695, %v971_v19  ;;  %1075 = vmatpush.bf16.msra.mxu0 %v1066_v1 }
 0x1b6   : > { %1859 = vpow2.f32 %v972_v20 }
 0x1b7   : > { %v1027_v21 = vpop.xlane.xlu1 %1026 }
 0x1b8   : > { %v1028_v22 = vsub.f32 %v1022_v3, %v1027_v21  ;;  %1171 = vmatpush.bf16.msrb.mxu0 %v1162_v35 }
 0x1ba   : > { %v1029_v23 = vmul.f32 1.442695, %v1028_v22 }
 0x1bc   : > { %v1860_v24 = vpop.eup %1859  ;;  %1861 = vpow2.f32 %v1029_v23 }
 0x1bd   : > { %v974_v25 = vsel %vm948_vm1, %v1860_v24, 0.0 }
 0x1be   : > { %975 = vadd.xlane.f32.xlu0 %v974_v25 }
 0x1c2   : > { %v1862_v26 = vpop.eup %1861 }
 0x1c3   : > { %v1031_v27 = vsel %vm948_vm1, %v1862_v26, 0.0 }
 0x1c4   : > { %1032 = vadd.xlane.f32.xlu2 %v1031_v27 }
 0x1c7   : > { %v1123_v38 = vpop.xlane.xlu2 %1122 }
 0x1c8   : > { %v1124_v16 = vsub.f32 %v2201_v8, %v1123_v38 }
 0x1ca   : > { %v1125_v19 = vmul.f32 1.442695, %v1124_v16 }
 0x231   : > { %v976_v40 = vpop.xlane.xlu0 %975 }
 0x232   : > { %1863 = vrcp.f32 %v976_v40 }
 0x237   : > { %v1033_v41 = vpop.xlane.xlu2 %1032 }
 0x238   : > { %v1864_v42 = vpop.eup %1863  ;;  %1865 = vrcp.f32 %v1033_v41 }
 0x239   : > { %v978_v44 = vmul.f32 %v1864_v42, %v1860_v24  ;;  %1867 = vpow2.f32 %v1125_v19 }
 0x23b   : > { %979 = vst.msk [vmem:[%s2242_s25] sm:$0xff] %vm948_vm1, %v978_v44  ;;  %v980_v45 = vpack.c.bf16 %v978_v44, %v978_v44 }
 0x23d   : > { %1719 = vmatmul.msk.bf16.vlgmr.msrb.gmra.mxu1 %vm948_vm1, %v980_v45 }
 0x23e   : > { %v1866_v46 = vpop.eup %1865  ;;  %1193 = vmatpush.bf16.xpose.msrb.mxu1 %v1184_v54 }
 0x23f   : > { %v1035_v47 = vmul.f32 %v1866_v46, %v1862_v26  ;;  %v1868_v24 = vpop.eup %1867 }
 0x240   : > { %v1127_v26 = vsel %vm948_vm1, %v1868_v24, 0.0 }
 0x241   : > { %1721 = vst.msk [vmem:[%s2242_s25 + $0x8] sm:$0xff] %vm948_vm1, %v1035_v47  ;;  %v1038_v49 = vpack.c.bf16 %v1035_v47, %v1035_v47 }
 0x243   : > { %1722 = vmatmul.msk.bf16.vlgmr.msrb.gmra.mxu3 %vm948_vm1, %v1038_v49 }
 0x244   : > { %1249 = vmatpush.bf16.msrb.mxu3 %v1240_v12 }
 0x2ba   : > { %v998_v2 = vpop.f32.mrf.mxu1 }
 0x2bb   : > { %v1002_v3 = vpack.c.bf16 %v998_v2, %v998_v2 }
 0x2bd   : > { %1725 = vmatmul.msk.bf16.vlgmr.msra.gmra.mxu1 %vm948_vm1, %v1002_v3 }
 0x2be   : > { %1383 = vmatpush.bf16.msra.mxu1 %v1796_v7 }
 0x2c2   : > { %v1000_v4 = vpop.f32.mrf.mxu1 }
 0x2c6   : > { %v1055_v6 = vpop.f32.mrf.mxu3 }
 0x2c7   : > { %v1059_v9 = vpack.c.bf16 %v1055_v6, %v1055_v6  ;;  %v1791_v6 = vld [vmem:[%s2391_s8] sm:$0xff] }
 0x2c9   : > { %1724 = vmatmul.msk.bf16.vlgmr.msra.gmra.mxu0 %vm948_vm1, %v1059_v9 }
 0x2ca   : > { %1330 = vmatpush.bf16.msra.mxu0 %v1792_v5 }
 0x2cd   : > { %1731 = vmatmul.msk.bf16.vlgmr.msrb.gmra.mxu1 %vm948_vm1, %v1178_v10 }
 0x2ce   : > { %v1057_v13 = vpop.f32.mrf.mxu3  ;;  %1331 = vmatpush.bf16.msra.mxu0 %v1791_v6 }
 0x2cf   : > { %v1795_v13 = vld [vmem:[%s2393_s10 + $0x10] sm:$0xff] }
 0x2d0   : > { %1384 = vmatpush.bf16.msra.mxu1 %v1795_v13 }
 0x33a   : > { %v1096_v14 = vpop.f32.mrf.mxu1 }
 0x342   : > { %v1098_v15 = vpop.f32.mrf.mxu1 }
 0x346   : > { %v1077_v17 = vpop.f32.mrf.mxu0 }
 0x347   : > { %v1097_v18 = vadd.f32 %v1096_v14, %v1077_v17 }
 0x34a   : > { %v1195_v20 = vpop.f32.mrf.mxu1 }
 0x34b   : > { %v1196_v21 = vadd.f32 %v1195_v20, %v2194_v62 }
 0x34d   : > { %v1199_v22 = vsel %vm948_vm1, %v1196_v21, -inf }
 0x34e   : > { %1200 = vmax.xlane.f32.xlu1 %v1199_v22  ;;  %v1079_v23 = vpop.f32.mrf.mxu0 }
 0x34f   : > { %v1854_v23 = vld [vmem:[%s2390_s7] ss:$0 sm:$0xff] }
 0x352   : > { %v1197_v25 = vpop.f32.mrf.mxu1 }
 0x356   : > { %1128 = vadd.xlane.f32.xlu1 %v1127_v26 }
 0x3c1   : > { %v1201_v27 = vpop.xlane.xlu1 %1200 }
 0x3c2   : > { %v1202_v28 = vsub.f32 %v1196_v21, %v1201_v27  ;;  %v1853_v21 = vld [vmem:[%s2389_s6] ss:$0 sm:$0xff] }
 0x3c4   : > { %v1203_v8 = vmul.f32 1.442695, %v1202_v28  ;;  %v1794_v28 = vld [vmem:[%s2393_s10 + $0x8] sm:$0xff] }
 0x3c5   : > { %1385 = vmatpush.bf16.msra.mxu1 %v1794_v28 }
 0x3c6   : > { %1869 = vpow2.f32 %v1203_v8  ;;  %v1793_v8 = vld [vmem:[%s2393_s10] sm:$0xff] }
 0x3c9   : > { %v1129_v29 = vpop.xlane.xlu1 %1128  ;;  %1386 = vmatpush.bf16.msra.mxu1 %v1793_v8 }
 0x3ca   : > { %1871 = vrcp.f32 %v1129_v29  ;;  %v1855_v29 = vld [vmem:[%s2392_s9] ss:$0 sm:$0xff] }
 0x3cc   : > { %v1870_v30 = vpop.eup %1869 }
 0x3cd   : > { %v1205_v62 = vsel %vm948_vm1, %v1870_v30, 0.0 }
 0x3ce   : > { %1206 = vadd.xlane.f32.xlu0 %v1205_v62 }
 0x3d0   : > { %v1872_v31 = vpop.eup %1871 }
 0x3d1   : > { %v1131_v32 = vmul.f32 %v1872_v31, %v1868_v24 }
 0x3d3   : > { %1727 = vst.msk [vmem:[%s2242_s25 + $0x10] sm:$0xff] %vm948_vm1, %v1131_v32  ;;  %v1134_v33 = vpack.c.bf16 %v1131_v32, %v1131_v32 }
 0x3d5   : > { %1728 = vmatmul.msk.bf16.vlgmr.msra.gmra.mxu3 %vm948_vm1, %v1134_v33 }
 0x441   : > { %v1207_v37 = vpop.xlane.xlu0 %1206 }
 0x442   : > { %1873 = vrcp.f32 %v1207_v37 }
 0x443   : > { %1875 = vrcp.f32 %v1945_v57 }
 0x448   : > { %v1874_v38 = vpop.eup %1873 }
 0x449   : > { %v1209_v39 = vmul.f32 %v1874_v38, %v1870_v30  ;;  %v1876_v58 = vpop.eup %1875 }
 0x44a   : > { %v1267_v59 = vmul.f32 32.0, %v1876_v58  ;;  %vm1271_vm3 = vweird.f32 %v1876_v58 }
 0x44b   : > { %1732 = vst.msk [vmem:[%s2242_s25 + $0x18] sm:$0xff] %vm948_vm1, %v1209_v39  ;;  %v1212_v40 = vpack.c.bf16 %v1209_v39, %v1209_v39 }
 0x44c   : > { %v1268_v60 = vsub.f32 1.0, %v1267_v59 }
 0x44d   : > { %1733 = vmatmul.msk.bf16.vlgmr.msrb.gmra.mxu2 %vm948_vm1, %v1212_v40 }
 0x44e   : > { %v1269_v61 = vmul.f32 %v1876_v58, %v1268_v60 }
 0x450   : > { %v1270_v63 = vadd.f32 %v1876_v58, %v1269_v61 }
 0x452   : > { %v2298_v0 = vsel %vm1271_vm3, %v1876_v58, %v1270_v63 }
 0x458   : > { %v1151_v41 = vpop.f32.mrf.mxu3 }
 0x459   : > { %v1155_v42 = vpack.c.bf16 %v1151_v41, %v1151_v41 }
 0x45b   : > { %1730 = vmatmul.msk.bf16.vlgmr.msrb.gmra.mxu0 %vm948_vm1, %v1155_v42 }
 0x460   : > { %v1153_v43 = vpop.f32.mrf.mxu3 }
 0x4d0   : > { %v1229_v44 = vpop.f32.mrf.mxu2 }
 0x4d1   : > { %v1233_v45 = vpack.c.bf16 %v1229_v44, %v1229_v44 }
 0x4d3   : > { %1735 = vmatmul.msk.bf16.vlgmr.msrb.gmra.mxu3 %vm948_vm1, %v1233_v45 }
 0x4d8   : > { %v1173_v46 = vpop.f32.mrf.mxu0  ;;  %v1231_v47 = vpop.f32.mrf.mxu2 }
 0x4d9   : > { %v1177_v48 = vadd.f32 %v1173_v46, %v1097_v18 }
 0x4e0   : > { %v1175_v49 = vpop.f32.mrf.mxu0 }
 0x556   : > { %v1251_v51 = vpop.f32.mrf.mxu3 }
 0x557   : > { %v1255_v52 = vadd.f32 %v1251_v51, %v1177_v48 }
 0x559   : > { %v1259_v53 = vadd.f32 %v1852_v50, %v1255_v52 }
 0x55b   : > { %v1262_v54 = vadd.f32 %v1259_v53, %v2117_v11 }
 0x55d   : > { %v1263_v55 = vsel %vm542_vm0, %v1262_v54, 0.0 }
 0x55e   : > { %v1253_v56 = vpop.f32.mrf.mxu3  ;;  %1264 = vadd.xlane.f32.xlu2 %v1263_v55 }
 0x5d1   : > { %v1265_v1 = vpop.xlane.xlu2 %1264 }
 0x5d2   : > { %v1273_v2 = vmul.f32 %v2298_v0, %v1265_v1 }
 0x5d4   : > { %v1274_v3 = vsub.f32 %v1262_v54, %v1273_v2 }
 0x5d6   : > { %v1275_v4 = vmul.f32 %v1274_v3, %v1274_v3 }
 0x5d8   : > { %v1276_v11 = vsel %vm542_vm0, %v1275_v4, 0.0 }
 0x5d9   : > { %1277 = vadd.xlane.f32.xlu0 %v1276_v11 }
 0x64c   : > { %v1278_v9 = vpop.xlane.xlu0 %1277 }
 0x64d   : > { %v1279_v10 = vmul.f32 %v1278_v9, %v2298_v0 }
 0x64f   : > { %v1280_v14 = vadd.f32 1e-05, %v1279_v10 }
 0x651   : > { %1877 = vrsqrt.f32 %v1280_v14  ;;  %vm1287_vm5 = vweird.f32 %v1280_v14 }
 0x657   : > { %v1878_v15 = vpop.eup %1877 }
 0x658   : > { %v1282_v16 = vmul.f32 %v1878_v15, %v1280_v14  ;;  %vm1288_vm4 = vweird.f32 %v1878_v15 }
 0x659   : > { %vm1289_vm6 = vmor %vm1287_vm5, %vm1288_vm4 }
 0x65a   : > { %v1283_v17 = vmul.f32 %v1878_v15, %v1282_v16 }
 0x65c   : > { %v1284_v18 = vmul.f32 0.5, %v1283_v17 }
 0x65e   : > { %v1285_v19 = vsub.f32 1.5, %v1284_v18 }
 0x660   : > { %v1286_v20 = vmul.f32 %v1878_v15, %v1285_v19 }
 0x662   : > { %v1290_v22 = vsel %vm1289_vm6, %v1878_v15, %v1286_v20 }
 0x663   : > { %v1291_v24 = vmul.f32 %v1290_v22, %v1274_v3 }
 0x665   : > { %v1295_v25 = vmul.f32 %v1853_v21, %v1291_v24 }
 0x667   : > { %v1299_v26 = vadd.f32 %v1854_v23, %v1295_v25 }
 0x669   : > { %v1300_v27 = vpack.c.bf16 %v1299_v26, %v1299_v26 }
 0x66b   : > { %1744 = vmatmul.msk.bf16.vlgmr.msra.gmra.mxu0 %vm542_vm0, %v1300_v27 }
 0x6e8   : > { %v1333_v30 = vpop.f32.mrf.mxu0 }
 0x6e9   : > { %v1334_v62 = vadd.f32 %v1855_v29, %v1333_v30 }
 0x6eb   : > { %v1337_v31 = vmax.f32 %v1334_v62, 0.0 }
 0x6ed   : > { %v1338_v32 = vpack.c.bf16 %v1337_v31, %v1337_v31 }
 0x6ef   : > { %1761 = vmatmul.msk.bf16.vlgmr.msra.gmra.mxu1 %vm1375_vm7, %v1338_v32 }
 0x6f0   : > { %v1335_v33 = vpop.f32.mrf.mxu0 }
 0x76c   : > { %v1388_v35 = vpop.f32.mrf.mxu1 }
 0x76d   : > { %v1389_v36 = vadd.f32 %v1856_v34, %v1388_v35 }
 0x76f   : > { %v1394_v37 = vadd.f32 %v1389_v36, %v1299_v26 }
 0x771   : > { %v1395_v12 = vsel %vm542_vm0, %v1394_v37, 0.0 }
 0x772   : > { %1396 = vadd.xlane.f32.xlu1 %v1395_v12 }
 0x774   : > { %v1390_v38 = vpop.f32.mrf.mxu1 }
 0x7e5   : > { %v1397_v39 = vpop.xlane.xlu1 %1396 }
 0x7e6   : > { %v1398_v40 = vmul.f32 %v1397_v39, %v2298_v0 }
 0x7e8   : > { %v1399_v41 = vsub.f32 %v1394_v37, %v1398_v40 }
 0x7ea   : > { %v1400_v42 = vmul.f32 %v1399_v41, %v1399_v41 }
 0x7ec   : > { %v1401_v43 = vsel %vm542_vm0, %v1400_v42, 0.0 }
 0x7ed   : > { %1402 = vadd.xlane.f32.xlu2 %v1401_v43 }
 0x7ee   : > { %1908 = shalt.err (!%p1905_p3)
}
 0x7ef   : > { %s1946_s17 = smov 128   ;;  %s1947_s25 = smov 8   ;;  %v1857_v53 = vld [vmem:[%s2395_s12] ss:$0 sm:$0xff] }
 0x7f0   : > { %1798 = dma.vmem_to_hbm [thread:$0]  (%p2066_p5), %s1447_s14, 512, %s1449_s20, %s1431_s27, %s1946_s17, %s1946_s17, %s1947_s25  }
 0x7f1   : > { %v1858_v55 = vld [vmem:[%s2396_s13] ss:$0 sm:$0xff]  ;;  %s2418_s14 = sld [smem:[#allocation13_spill]] }
 0x7f7   : > { %s517_s20 = scalar_lea.vmem %s2418_s14, %s2099_s21 }
 0x860   : > { %v1403_v44 = vpop.xlane.xlu2 %1402 }
 0x861   : > { %v1404_v45 = vmul.f32 %v1403_v44, %v2298_v0 }
 0x863   : > { %v1405_v46 = vadd.f32 1e-05, %v1404_v45 }
 0x865   : > { %1879 = vrsqrt.f32 %v1405_v46  ;;  %vm1412_vm9 = vweird.f32 %v1405_v46 }
 0x86b   : > { %v1880_v47 = vpop.eup %1879 }
 0x86c   : > { %v1407_v48 = vmul.f32 %v1880_v47, %v1405_v46  ;;  %vm1413_vm8 = vweird.f32 %v1880_v47 }
 0x86d   : > { %vm1414_vm10 = vmor %vm1412_vm9, %vm1413_vm8 }
 0x86e   : > { %v1408_v49 = vmul.f32 %v1880_v47, %v1407_v48 }
 0x870   : > { %v1409_v50 = vmul.f32 0.5, %v1408_v49 }
 0x872   : > { %v1410_v51 = vsub.f32 1.5, %v1409_v50 }
 0x874   : > { %v1411_v52 = vmul.f32 %v1880_v47, %v1410_v51 }
 0x876   : > { %v1415_v54 = vsel %vm1414_vm10, %v1880_v47, %v1411_v52 }
 0x877   : > { %v1416_v56 = vmul.f32 %v1415_v54, %v1399_v41 }
 0x879   : > { %v1420_v57 = vmul.f32 %v1857_v53, %v1416_v56 }
 0x87b   : > { %v1424_v58 = vadd.f32 %v1858_v55, %v1420_v57 }
 0x87d   : > { %1425 = vst.msk [vmem:[%s517_s20] sm:$0xff] %vm542_vm0, %v1424_v58 }
 0x87e PF: > { %s2419_s27 = sld [smem:[#allocation7_spill]] }
 0x87f   : > { %s2420_s26 = sld [smem:[#allocation5_spill]] }
 0x884   : > { %p1804_p4 = scmp.ge.s32.totalorder %s2419_s27, 2 }
 0x885   : > { %s1470_s16 = sand.u32 1, %s2420_s26  }
 0x886   : > { %p1801_p5 = pnand %p1804_p4, %p2070_p6  ;;  %s1471_s22 = scalar_lea.sflag [#allocation3], %s1470_s16 }
 0x888   : > { %p1802_p7 = pneg %p1801_p5 }
 0x88a   : > { %1926 = dma.done.wait (%p1802_p7), %s1471_s22, 512  }
 0x88b   : > { %1928 = vsyncadd (%p1802_p7), %s1471_s22, 4294966784  ;;  %s2422_s21 = sld [smem:[#allocation8_spill]]  ;;  %s2425_s18 = smov %s1935_s19 }
 0x88c   : > { %s2423_s29 = sld [smem:[#allocation6_spill]] }
 0x88d   : > { %s2424_s20 = sld [smem:[#allocation9_spill]] }
 0x891   : > { %p26_p8 = scmp.ge.s32.totalorder %s2422_s21, 4  }
 0x892   : > { %s2426_s19 = smov %s2423_s29 }
 0x893   :  { %28 = sbr.rel (!%p26_p8) target bundleno = 7 (0x7), region = 154 }
 0x898   :  { %1477 = vsyncpa [#allocation3], 1 }
 0x899   :  { %1479 = vsyncpa [#allocation3 + $0x1], 1 }

// kernel: transformer_forward.7
= control target key start
LH: loop header
LB: loop body
LE: loop exit
PB: predicated region body
PF: predicated region fallthrough
CT: control target
= control target key end

     0   :  { %s4146_s0 = inlined_call_operand.vmem [shape: f32[2,8,32], index: 0, kind: input, shape index: {}]   ;;  %s4147_s1 = inlined_call_operand.vmem [shape: f32[2,8,32], index: 1, kind: input, shape index: {}]   ;;  %s4148_s2 = inlined_call_operand.vmem [shape: f32[2,8,8], index: 2, kind: input, shape index: {}]   ;;  %s4149_s3 = inlined_call_operand.vmem [shape: f32[2,8,8], index: 3, kind: input, shape index: {}]   ;;  %s4150_s4 = inlined_call_operand.vmem [shape: bf16[12,32,8], index: 4, kind: input, shape index: {}]   ;;  %s4151_s5 = inlined_call_operand.vmem [shape: f32[12,1,8], index: 5, kind: input, shape index: {}]   ;;  %s4152_s6 = inlined_call_operand.vmem [shape: bf16[4,8,32], index: 6, kind: input, shape index: {}]   ;;  %s4153_s7 = inlined_call_operand.vmem [shape: f32[1,32], index: 7, kind: input, shape index: {}]   ;;  %s4154_s8 = inlined_call_operand.vmem [shape: f32[1,32], index: 8, kind: input, shape index: {}]   ;;  %s4155_s9 = inlined_call_operand.vmem [shape: f32[1,32], index: 9, kind: input, shape index: {}]   ;;  %s4156_s10 = inlined_call_operand.vmem [shape: bf16[4,32,8], index: 10, kind: input, shape index: {}]   ;;  %s4157_s11 = inlined_call_operand.vmem [shape: f32[4,1,8], index: 11, kind: input, shape index: {}]   ;;  %s4158_s12 = inlined_call_operand.vmem [shape: bf16[8,32,8], index: 12, kind: input, shape index: {}]   ;;  %s4159_s13 = inlined_call_operand.vmem [shape: f32[8,1,8], index: 13, kind: input, shape index: {}]   ;;  %s4160_s14 = inlined_call_operand.vmem [shape: bf16[4,8,32], index: 14, kind: input, shape index: {}]   ;;  %s4161_s15 = inlined_call_operand.vmem [shape: f32[1,32], index: 15, kind: input, shape index: {}]   ;;  %s4162_s16 = inlined_call_operand.vmem [shape: f32[1,32], index: 16, kind: input, shape index: {}]   ;;  %s4163_s17 = inlined_call_operand.vmem [shape: f32[1,32], index: 17, kind: input, shape index: {}]   ;;  %s4164_s18 = inlined_call_operand.vmem [shape: bf16[32,64], index: 18, kind: input, shape index: {}]   ;;  %s4165_s19 = inlined_call_operand.vmem [shape: f32[1,64], index: 19, kind: input, shape index: {}]   ;;  %s4166_s20 = inlined_call_operand.vmem [shape: bf16[64,32], index: 20, kind: input, shape index: {}]   ;;  %s4167_s21 = inlined_call_operand.vmem [shape: f32[1,32], index: 21, kind: input, shape index: {}]   ;;  %s4168_s22 = inlined_call_operand.vmem [shape: f32[1,32], index: 22, kind: input, shape index: {}]   ;;  %s4169_s23 = inlined_call_operand.vmem [shape: f32[1,32], index: 23, kind: input, shape index: {}]   ;;  %s4170_s24 = inlined_call_operand.vmem [shape: f32[2,8,32], index: 24, kind: output, shape index: {0}]   ;;  %s4171_s25 = inlined_call_operand.hbm [shape: f32[2,4,8,8], index: 25, kind: output, shape index: {1}]   ;;  %s4172_s26 = inlined_call_operand.hbm [shape: f32[2,4,8,8], index: 26, kind: output, shape index: {2}]  }
   0x1   :  { %4188 = sst [smem:[#allocation14_spill]] %s4146_s0 }
   0x2   :  { %4189 = sst [smem:[#allocation15_spill]] %s4147_s1 }
   0x3   :  { %4190 = sst [smem:[#allocation16_spill]] %s4148_s2 }
   0x4   :  { %4191 = sst [smem:[#allocation17_spill]] %s4149_s3 }
   0x5   :  { %4192 = sst [smem:[#allocation18_spill]] %s4150_s4 }
   0x6   :  { %4193 = sst [smem:[#allocation19_spill]] %s4151_s5 }
   0x7   :  { %4194 = sst [smem:[#allocation20_spill]] %s4152_s6 }
   0x8   :  { %4195 = sst [smem:[#allocation21_spill]] %s4153_s7 }
   0x9   :  { %4196 = sst [smem:[#allocation22_spill]] %s4154_s8 }
   0xa   :  { %4197 = sst [smem:[#allocation23_spill]] %s4155_s9 }
   0xb   :  { %4198 = sst [smem:[#allocation24_spill]] %s4156_s10 }
   0xc   :  { %4199 = sst [smem:[#allocation25_spill]] %s4157_s11 }
   0xd   :  { %4200 = sst [smem:[#allocation26_spill]] %s4158_s12 }
   0xe   :  { %4201 = sst [smem:[#allocation27_spill]] %s4159_s13 }
   0xf   :  { %4202 = sst [smem:[#allocation28_spill]] %s4168_s22 }
  0x10   :  { %4203 = sst [smem:[#allocation29_spill]] %s4169_s23 }
  0x11   :  { %4204 = sst [smem:[#allocation30_spill]] %s4170_s24 }
  0x12   :  { %32 = vsyncpa [#allocation3], 0 }
  0x13   :  { %34 = vsyncpa [#allocation3 + $0x1], 0 }
  0x14   :  { %35 = vsyncpa [#allocation5], 0 }
  0x15   :  { %37 = vsyncpa [#allocation5 + $0x1], 0  ;;  %s3553_s27 = smov 0   ;;  %s3555_s3 = smov 0  }
  0x16   :  { %s3557_s7 = smov 0   ;;  %s3559_s28 = smov 0  }
  0x17 LB: > { %4205 = sst [smem:[#allocation8_spill]] %s3401_s27  ;;  %s3574_s8 = sadd.s32 4294967295, %s3413_s28   ;;  %s3413_s28 = sphi %s3559_s28, %s4234_s28   ;;  %s3409_s7 = sphi %s3557_s7, %s4236_s7   ;;  %s3405_s3 = sphi %s3555_s3, %s4238_s3   ;;  %s3401_s27 = sphi %s3553_s27, %s4237_s27  }
  0x18   : > { %4206 = sst [smem:[#allocation9_spill]] %s3409_s7  ;;  %s2740_s4 = sadd.s32 4294967294, %s3413_s28  }
  0x19   : > { %4207 = sst [smem:[#allocation10_spill]] %s3413_s28  ;;  %s3578_s29 = sadd.s32 1, %s3413_s28  }
  0x1a   : > { %4208 = sst [smem:[#allocation11_spill]] %s3578_s29  ;;  %s600_s0 = sadd.s32 1, %s3409_s7 }
  0x1b   : > { %s597_s9 = ssub.s32 %s3413_s28, %s3578_s29  ;;  %p610_p0 = scmp.ne.s32.totalorder %s3409_s7, %s3405_s3 }
  0x1c   : > { %p598_p1 = scmp.eq.s32.totalorder %s597_s9, 0  ;;  %p611_p2 = scmp.eq.s32.totalorder %s3574_s8, 1 }
  0x1d   : > { %p616_p3 = scmp.ne.s32.totalorder %s3405_s3, %s3401_s27  ;;  %p617_p4 = scmp.eq.s32.totalorder %s2740_s4, 1 }
  0x1e   : > { %s3589_s30 = scalar_select %p598_p1, %s3409_s7, %s600_s0  }
  0x1f   : > { %p3591_p5 = por %p611_p2, %p610_p0  ;;  %p3595_p6 = por %p617_p4, %p616_p3 }
  0x20   : > { %4209 = sst [smem:[#allocation12_spill]] %s3589_s30  ;;  %p2743_p7 = scmp.ge.s32.totalorder %s3413_s28, 1 }
  0x21   : > { %s4211_s5 = scalar_select %p3595_p6, 1, 0 }
  0x22   : > { %p749_p8 = scmp.lt.s32.totalorder %s3413_s28, 3 }
  0x23   : > { %4212 = sst [smem:[#allocation13_spill]] %s4211_s5 }
  0x24   : > { %p750_p9 = pnand %p2743_p7, %p749_p8 }
  0x25   : > { %s4213_s1 = sld [smem:[#allocation18_spill]] (!%p750_p9)  ;;  %p839_p10 = scmp.lt.s32.totalorder (!%p750_p9), %s3574_s8, 1 }
  0x26   : > { %753 = sbr.rel (%p750_p9) target bundleno = 3798 (0xed6), region = 116  ;;  %s4214_s27 = sld [smem:[#allocation14_spill]] (!%p750_p9) }
  0x27   : > { %s4215_s4 = sld [smem:[#allocation19_spill]] (!%p750_p9)  ;;  %s3765_s0 = sand.u32 (!%p750_p9), 1, %s3405_s3  }
  0x28   : > { %s4216_s9 = sld [smem:[#allocation16_spill]] (!%p750_p9)  ;;  %s4183_s30 = sshll.u32 (!%p750_p9), %s3765_s0, 5 }
  0x29   : > { %s3770_s22 = scalar_lea.vmem (!%p750_p9), [#allocation2], %s4183_s30  ;;  %s4218_s23 = sld [smem:[#allocation21_spill]] (!%p750_p9) }
  0x2a   : > { %s4220_s12 = sld [smem:[#allocation26_spill]] (!%p750_p9)  ;;  %s3196_s29 = sshll.u32 (!%p750_p9), %s3574_s8, 5 }
  0x2b   : > { %v3143_v0 = vld [vmem:[%s4213_s1 + $0x8] sm:$0xff]  ;;  %v3145_v1 = vld [vmem:[%s4213_s1 + $0x18] sm:$0xff]  ;;  %v3142_v2 = vld [vmem:[%s4213_s1] sm:$0xff]  ;;  %s840_s5 = scalar_select %p839_p10, %s3574_s8, 1  ;;  %vm884_vm0 = vcmask 261120   ;;  %vm1291_vm1 = vcmask 64512  }
  0x2c   : > { %894 = vmatpush.bf16.msra.mxu0 %v3143_v0  ;;  %929 = vmatpush.bf16.msra.mxu1 %v3145_v1  ;;  %v3144_v3 = vld [vmem:[%s4213_s1 + $0x10] sm:$0xff]  ;;  %v3147_v4 = vld [vmem:[%s4213_s1 + $0x28] sm:$0xff]  ;;  %v3153_v6 = vld [vmem:[%s4213_s1 + $0x58] sm:$0xff]  ;;  %vm1328_vm2 = vcmask 1043456   ;;  %s4221_s7 = sld [smem:[#allocation22_spill]]  ;;  %vm2489_vm10 = vcmask 523264  }
  0x2d   : > { %v3151_v5 = vld [vmem:[%s4213_s1 + $0x48] sm:$0xff]  ;;  %s3624_s24 = sshll.u32 %s840_s5, 3  ;;  %964 = vmatpush.bf16.msra.mxu2 %v3147_v4  ;;  %v3146_v7 = vld [vmem:[%s4213_s1 + $0x20] sm:$0xff]  ;;  %v3152_v10 = vld [vmem:[%s4213_s1 + $0x50] sm:$0xff]  ;;  %s4223_s30 = sld [smem:[#allocation15_spill]] }
  0x2e   : > { %v3155_v8 = vld [vmem:[%s4213_s1 + $0x68] sm:$0xff]  ;;  %s842_s28 = scalar_lea.vmem %s4214_s27, %s3624_s24  ;;  %v3150_v9 = vld [vmem:[%s4213_s1 + $0x40] sm:$0xff]  ;;  %v3161_v51 = vld [vmem:[%s4213_s1 + $0x98] sm:$0xff]  ;;  %s850_s10 = scalar_lea.vmem %s4216_s9, %s3624_s24 }
  0x2f   : > { %v3642_v11 = vld [vmem:[%s842_s28] sm:$0xff]  ;;  %v3159_v12 = vld [vmem:[%s4213_s1 + $0x88] sm:$0xff]  ;;  %v3160_v52 = vld [vmem:[%s4213_s1 + $0x90] sm:$0xff]  ;;  %s4219_s9 = sld [smem:[#allocation24_spill]]  ;;  %s4227_s28 = sshll.u32 %s3765_s0, 5 }
  0x30   : > { %895 = vmatpush.bf16.msra.mxu0 %v3142_v2  ;;  %930 = vmatpush.bf16.msra.mxu1 %v3144_v3  ;;  %v3649_v13 = vpack.c.bf16 %v3642_v11, %v3642_v11  ;;  %v3154_v14 = vld [vmem:[%s4213_s1 + $0x60] sm:$0xff]  ;;  %v3163_v16 = vld [vmem:[%s4213_s1 + $0xa8] sm:$0xff]  ;;  %s4222_s27 = sld [smem:[#allocation23_spill]]  ;;  %s4000_s5 = scalar_lea.vmem [#allocation4], %s4227_s28 }
  0x31   : > { %965 = vmatpush.bf16.msra.mxu2 %v3146_v7  ;;  %v3158_v15 = vld [vmem:[%s4213_s1 + $0x80] sm:$0xff]  ;;  %v3251_v53 = vld [vmem:[%s4215_s4 + $0x8] ss:$0 sm:$0xff]  ;;  %s4224_s13 = sld [smem:[#allocation27_spill]]  ;;  %s2564_s28 = scalar_lea.hbm %s4171_s25, %s3196_s29 }
  0x32   : > { %v3162_v17 = vld [vmem:[%s4213_s1 + $0xa0] sm:$0xff]  ;;  %s4225_s11 = sld [smem:[#allocation25_spill]]  ;;  %s3339_s6 = scalar_lea.hbm %s4171_s25, 64 }
  0x33   : > { %2759 = vmatmul.msk.bf16.vlgmr.msra.gmra.mxu0 %vm884_vm0, %v3649_v13  ;;  %2773 = vmatmul.msk.bf16.vlgmr.msra.gmra.mxu1 %vm884_vm0, %v3649_v13  ;;  %v3247_v23 = vld [vmem:[%s4215_s4 + $0x4] ss:$0 sm:$0xff]  ;;  %v3248_v24 = vld [vmem:[%s4215_s4 + $0x5] ss:$0 sm:$0xff]  ;;  %v3246_v27 = vld [vmem:[%s4215_s4 + $0x1] ss:$0 sm:$0xff] }
  0x34   : > { %1034 = vmatpush.bf16.msrb.mxu0 %v3151_v5  ;;  %1069 = vmatpush.bf16.msrb.mxu1 %v3153_v6  ;;  %v3245_v31 = vld [vmem:[%s4215_s4] ss:$0 sm:$0xff]  ;;  %v3250_v37 = vld [vmem:[%s4215_s4 + $0x6] ss:$0 sm:$0xff]  ;;  %v3249_v47 = vld [vmem:[%s4215_s4 + $0x2] ss:$0 sm:$0xff] }
  0x35   : > { %1104 = vmatpush.bf16.msrb.mxu2 %v3155_v8  ;;  %v1286_v61 = vld [vmem:[%s850_s10] sm:$0xff]  ;;  %s4217_s10 = sld [smem:[#allocation20_spill]] }
  0x36   : > { %2787 = vmatmul.msk.bf16.vlgmr.msra.gmra.mxu2 %vm884_vm0, %v3649_v13  ;;  %v3719_v62 = vmul.f32 -1e+09, %v1286_v61 }
  0x38   : > { %1035 = vmatpush.bf16.msrb.mxu0 %v3150_v9  ;;  %1070 = vmatpush.bf16.msrb.mxu1 %v3152_v10 }
  0x39   : > { %1105 = vmatpush.bf16.msrb.mxu2 %v3154_v14  ;;  %v3148_v14 = vld [vmem:[%s4213_s1 + $0x30] sm:$0xff] }
  0x3c   : > { %1174 = vmatpush.bf16.msra.mxu0 %v3159_v12  ;;  %1209 = vmatpush.bf16.msra.mxu1 %v3161_v51  ;;  %v3149_v12 = vld [vmem:[%s4213_s1 + $0x38] sm:$0xff]  ;;  %v3255_v51 = vld [vmem:[%s4215_s4 + $0x7] ss:$0 sm:$0xff] }
  0x3d   : > { %1244 = vmatpush.bf16.msra.mxu2 %v3163_v16  ;;  %999 = vmatpush.bf16.msra.mxu3 %v3149_v12  ;;  %v3156_v16 = vld [vmem:[%s4213_s1 + $0x70] sm:$0xff] }
  0x40   : > { %1175 = vmatpush.bf16.msra.mxu0 %v3158_v15  ;;  %1210 = vmatpush.bf16.msra.mxu1 %v3160_v52  ;;  %v3157_v15 = vld [vmem:[%s4213_s1 + $0x78] sm:$0xff] }
  0x41   : > { %1245 = vmatpush.bf16.msra.mxu2 %v3162_v17  ;;  %1000 = vmatpush.bf16.msra.mxu3 %v3148_v14  ;;  %v3165_v17 = vld [vmem:[%s4213_s1 + $0xb8] sm:$0xff] }
  0x43   : > { %2815 = vmatmul.msk.bf16.vlgmr.msrb.gmra.mxu0 %vm884_vm0, %v3649_v13  ;;  %2829 = vmatmul.msk.bf16.vlgmr.msrb.gmra.mxu1 %vm884_vm0, %v3649_v13 }
  0x44   : > { %2801 = vmatmul.msk.bf16.vlgmr.msra.gmra.mxu3 %vm884_vm0, %v3649_v13 }
  0x45   : > { %1139 = vmatpush.bf16.msrb.mxu3 %v3157_v15 }
  0x46   : > { %2843 = vmatmul.msk.bf16.vlgmr.msrb.gmra.mxu2 %vm884_vm0, %v3649_v13 }
  0x49   : > { %1140 = vmatpush.bf16.msrb.mxu3 %v3156_v16 }
  0x4d   : > { %1279 = vmatpush.bf16.msra.mxu3 %v3165_v17 }
  0x53   : > { %2871 = vmatmul.msk.bf16.vlgmr.msra.gmra.mxu0 %vm884_vm0, %v3649_v13  ;;  %2885 = vmatmul.msk.bf16.vlgmr.msra.gmra.mxu1 %vm884_vm0, %v3649_v13 }
  0x54   : > { %2857 = vmatmul.msk.bf16.vlgmr.msrb.gmra.mxu3 %vm884_vm0, %v3649_v13 }
  0x56   : > { %2899 = vmatmul.msk.bf16.vlgmr.msra.gmra.mxu2 %vm884_vm0, %v3649_v13 }
  0xb0   : > { %v897_v18 = vpop.f32.mrf.mxu0  ;;  %v932_v19 = vpop.f32.mrf.mxu1 }
  0xb1   : > { %v933_v34 = vadd.f32 %v3246_v27, %v932_v19  ;;  %v898_v38 = vadd.f32 %v3245_v31, %v897_v18  ;;  %v3253_v31 = vld [vmem:[%s4215_s4 + $0x9] ss:$0 sm:$0xff] }
  0xb3   : > { %v1347_v41 = vpack.c.bf16 %v933_v34, %v933_v34  ;;  %v1289_v44 = vpack.c.bf16 %v898_v38, %v898_v38 }
  0xb8   : > { %v899_v20 = vpop.f32.mrf.mxu0  ;;  %v934_v21 = vpop.f32.mrf.mxu1 }
  0xb9   : > { %v967_v22 = vpop.f32.mrf.mxu2 }
  0xba   : > { %v968_v49 = vadd.f32 %v3249_v47, %v967_v22 }
  0xbc   : > { %v1443_v50 = vpack.c.bf16 %v968_v49, %v968_v49 }
  0xc0   : > { %v1037_v25 = vpop.f32.mrf.mxu0  ;;  %v1072_v26 = vpop.f32.mrf.mxu1 }
  0xc1   : > { %v1038_v28 = vadd.f32 %v3247_v23, %v1037_v25  ;;  %v1073_v29 = vadd.f32 %v3248_v24, %v1072_v26  ;;  %v969_v30 = vpop.f32.mrf.mxu2 }
  0xc3   : > { %v1290_v32 = vpack.c.bf16 %v1038_v28, %v1038_v28  ;;  %v1348_v33 = vpack.c.bf16 %v1073_v29, %v1073_v29  ;;  %v3164_v28 = vld [vmem:[%s4213_s1 + $0xb0] sm:$0xff]  ;;  %v3252_v29 = vld [vmem:[%s4215_s4 + $0xa] ss:$0 sm:$0xff]  ;;  %s846_s1 = scalar_lea.vmem %s4223_s30, %s3624_s24  ;;  %s4226_s30 = sld [smem:[#allocation17_spill]] }
  0xc4   : > { %1280 = vmatpush.bf16.msra.mxu3 %v3164_v28 }
  0xc5   : > { %v1296_v35 = vsel %vm1291_vm1, %v1290_v32, 0  ;;  %v1353_v36 = vsel %vm1291_vm1, %v1348_v33, 0 }
  0xc6   : > { %1305 = vmatpush.bf16.xpose.msrb.mxu0 %v1296_v35  ;;  %1362 = vmatpush.bf16.xpose.msrb.mxu2 %v1353_v36 }
  0xc7   : > { %2913 = vmatmul.msk.bf16.vlgmr.msra.gmra.mxu3 %vm884_vm0, %v3649_v13 }
  0xc8   : > { %v1039_v39 = vpop.f32.mrf.mxu0  ;;  %v1074_v40 = vpop.f32.mrf.mxu1 }
  0xc9   : > { %v1107_v42 = vpop.f32.mrf.mxu2  ;;  %v1002_v39 = vpop.f32.mrf.mxu3 }
  0xca   : > { %v1108_v43 = vadd.f32 %v3250_v37, %v1107_v42 }
  0xcc   : > { %v1444_v45 = vpack.c.bf16 %v1108_v43, %v1108_v43 }
  0xcd   : > { %2914 = vmatmul.msk.bf16.vlgmr.msrb.gmra.mxu0 %vm1291_vm1, %v1289_v44  ;;  %2916 = vmatmul.msk.bf16.vlgmr.msrb.gmra.mxu2 %vm1291_vm1, %v1347_v41 }
  0xce   : > { %v1449_v46 = vsel %vm1291_vm1, %v1444_v45, 0 }
  0xcf   : > { %1458 = vmatpush.bf16.xpose.msra.mxu2 %v1449_v46 }
  0xd0   : > { %v1177_v54 = vpop.f32.mrf.mxu0  ;;  %v1212_v33 = vpop.f32.mrf.mxu1 }
  0xd1   : > { %v1109_v48 = vpop.f32.mrf.mxu2  ;;  %v1178_v55 = vadd.f32 %v3251_v53, %v1177_v54  ;;  %v1213_v34 = vadd.f32 %v3253_v31, %v1212_v33  ;;  %v1004_v43 = vpop.f32.mrf.mxu3 }
  0xd3   : > { %v1324_v56 = vpack.c.bf16 %v1178_v55, %v1178_v55  ;;  %v1382_v35 = vpack.c.bf16 %v1213_v34, %v1213_v34  ;;  %v1346_v55 = vld [vmem:[%s4217_s10] sm:$0xf]  ;;  %v2925_v34 = vld [vmem:[%s4217_s10 + $0x8] sm:$0xf] }
  0xd5   : > { %v1330_v57 = vsel %vm1328_vm2, %v1324_v56, 0  ;;  %v1387_v37 = vsel %vm1328_vm2, %v1382_v35, 0  ;;  %v1428_v56 = vsel %vm1328_vm2, %v1346_v55, 0  ;;  %v1505_v35 = vsel %vm1328_vm2, %v2925_v34, 0 }
  0xd6   : > { %1339 = vmatpush.bf16.msrb.mxu1 %v1330_v57  ;;  %1396 = vmatpush.bf16.msrb.mxu3 %v1387_v37  ;;  %v3256_v57 = vld [vmem:[%s4215_s4 + $0xb] ss:$0 sm:$0xff] }
  0xd8   : > { %v1179_v58 = vpop.f32.mrf.mxu0  ;;  %v1214_v13 = vpop.f32.mrf.mxu1 }
  0xd9   : > { %v1247_v59 = vpop.f32.mrf.mxu2  ;;  %v1142_v48 = vpop.f32.mrf.mxu3 }
  0xda   : > { %v1248_v30 = vadd.f32 %v3252_v29, %v1247_v59  ;;  %v1143_v52 = vadd.f32 %v3255_v51, %v1142_v48  ;;  %1437 = vmatpush.bf16.msra.mxu1 %v1428_v56 }
  0xdc   : > { %v1478_v32 = vpack.c.bf16 %v1248_v30, %v1248_v30  ;;  %v1522_v53 = vpack.c.bf16 %v1143_v52, %v1143_v52 }
  0xdd   : > { %2922 = vmatmul.msk.bf16.vlgmr.msra.gmra.mxu2 %vm1291_vm1, %v1443_v50 }
  0xde   : > { %v1483_v36 = vsel %vm1328_vm2, %v1478_v32, 0  ;;  %v1527_v54 = vsel %vm1291_vm1, %v1522_v53, 0 }
  0xdf   : > { %1492 = vmatpush.bf16.msra.mxu3 %v1483_v36  ;;  %v2930_v36 = vld [vmem:[%s4217_s10 + $0xc] sm:$0xf] }
  0xe0   : > { %v1583_v13 = vsel %vm1328_vm2, %v2930_v36, 0  ;;  %v862_v36 = vld [vmem:[%s846_s1] sm:$0xff]  ;;  %s854_s1 = scalar_lea.vmem %s4226_s30, %s3624_s24 }
  0xe1   : > { %v1249_v60 = vpop.f32.mrf.mxu2  ;;  %v1144_v50 = vpop.f32.mrf.mxu3 }
  0xe2   : > { %v3257_v50 = vld [vmem:[%s4218_s23] ss:$0 sm:$0xff]  ;;  %s2565_s23 = sshll.u32 %s3770_s22, 4  ;;  %s2566_s23 = int_to_ptr.vmem [resolvable:$true] %s2565_s23 }
 0x14a   : > { %v1307_v63 = vpop.f32.mrf.mxu0  ;;  %v1282_v58 = vpop.f32.mrf.mxu3 }
 0x14b   : > { %v1308_v0 = vadd.f32 %v1307_v63, %v3719_v62  ;;  %v1283_v59 = vadd.f32 %v3256_v57, %v1282_v58  ;;  %v3415_v57 = vmov 32.0  }
 0x14d   : > { %v1311_v1 = vsel %vm1291_vm1, %v1308_v0, -inf  ;;  %v1556_v60 = vpack.c.bf16 %v1283_v59, %v1283_v59 }
 0x14e   : > { %1312 = vmax.xlane.f32.xlu0 %v1311_v1 }
 0x14f   : > { %v1561_v61 = vsel %vm1328_vm2, %v1556_v60, 0 }
 0x150   : > { %v1364_v2 = vpop.f32.mrf.mxu2  ;;  %1570 = vmatpush.bf16.msrb.mxu2 %v1561_v61 }
 0x151   : > { %v1365_v3 = vadd.f32 %v1364_v2, %v3719_v62 }
 0x152   : > { %v1309_v4 = vpop.f32.mrf.mxu0  ;;  %v1284_v63 = vpop.f32.mrf.mxu3 }
 0x153   : > { %v1368_v5 = vsel %vm1291_vm1, %v1365_v3, -inf }
 0x154   : > { %1369 = vmax.xlane.f32.xlu1 %v1368_v5  ;;  %v3254_v5 = vld [vmem:[%s4215_s4 + $0x3] ss:$0 sm:$0xff]  ;;  %s2581_s4 = scalar_lea.hbm %s4172_s26, %s3196_s29 }
 0x158   : > { %v1366_v6 = vpop.f32.mrf.mxu2 }
 0x160   : > { %v1460_v7 = vpop.f32.mrf.mxu2 }
 0x161   : > { %v3726_v8 = vadd.f32 %v1460_v7, %v3719_v62  ;;  %v1003_v7 = vadd.f32 %v3254_v5, %v1002_v39  ;;  %v3167_v5 = vld [vmem:[%s4219_s9 + $0x8] sm:$0xff] }
 0x163   : > { %v1464_v9 = vsel %vm1291_vm1, %v3726_v8, -inf }
 0x164   : > { %1465 = vmax.xlane.f32.xlu2 %v1464_v9 }
 0x168   : > { %v1462_v10 = vpop.f32.mrf.mxu2 }
 0x169   : > { %v1521_v10 = vpack.c.bf16 %v1003_v7, %v1003_v7  ;;  %v3171_v7 = vld [vmem:[%s4219_s9 + $0x28] sm:$0xff] }
 0x16a   : > { %1743 = vmatpush.bf16.msra.mxu2 %v3171_v7 }
 0x1c1   : > { %v1313_v18 = vpop.xlane.xlu0 %1312 }
 0x1c2   : > { %v1314_v19 = vsub.f32 %v1308_v0, %v1313_v18  ;;  %v2919_v0 = vld [vmem:[%s4217_s10 + $0x4] sm:$0xf] }
 0x1c3   : > { %v1409_v1 = vsel %vm1328_vm2, %v2919_v0, 0 }
 0x1c4   : > { %v1315_v20 = vmul.f32 1.442695, %v1314_v19  ;;  %1418 = vmatpush.bf16.msra.mxu0 %v1409_v1 }
 0x1c6   : > { %3279 = vpow2.f32 %v1315_v20 }
 0x1c7   : > { %v1370_v21 = vpop.xlane.xlu1 %1369 }
 0x1c8   : > { %v1371_v22 = vsub.f32 %v1365_v3, %v1370_v21  ;;  %1514 = vmatpush.bf16.msrb.mxu0 %v1505_v35 }
 0x1ca   : > { %v1372_v23 = vmul.f32 1.442695, %v1371_v22 }
 0x1cc   : > { %v3280_v24 = vpop.eup %3279  ;;  %3281 = vpow2.f32 %v1372_v23 }
 0x1cd   : > { %v1317_v25 = vsel %vm1291_vm1, %v3280_v24, 0.0 }
 0x1ce   : > { %1318 = vadd.xlane.f32.xlu0 %v1317_v25 }
 0x1d2   : > { %v3282_v26 = vpop.eup %3281 }
 0x1d3   : > { %v1374_v27 = vsel %vm1291_vm1, %v3282_v26, 0.0 }
 0x1d4   : > { %1375 = vadd.xlane.f32.xlu2 %v1374_v27 }
 0x1d7   : > { %v1466_v38 = vpop.xlane.xlu2 %1465 }
 0x1d8   : > { %v1467_v16 = vsub.f32 %v3726_v8, %v1466_v38 }
 0x1da   : > { %v1468_v19 = vmul.f32 1.442695, %v1467_v16 }
 0x241   : > { %v1319_v40 = vpop.xlane.xlu0 %1318 }
 0x242   : > { %3283 = vrcp.f32 %v1319_v40 }
 0x247   : > { %v1376_v41 = vpop.xlane.xlu2 %1375 }
 0x248   : > { %v3284_v42 = vpop.eup %3283  ;;  %3285 = vrcp.f32 %v1376_v41 }
 0x249   : > { %v1321_v44 = vmul.f32 %v3284_v42, %v3280_v24  ;;  %3287 = vpow2.f32 %v1468_v19 }
 0x24b   : > { %1322 = vst.msk [vmem:[%s3770_s22] sm:$0xff] %vm1291_vm1, %v1321_v44  ;;  %v1323_v45 = vpack.c.bf16 %v1321_v44, %v1321_v44 }
 0x24d   : > { %2915 = vmatmul.msk.bf16.vlgmr.msrb.gmra.mxu1 %vm1291_vm1, %v1323_v45 }
 0x24e   : > { %v3286_v46 = vpop.eup %3285  ;;  %1536 = vmatpush.bf16.xpose.msrb.mxu1 %v1527_v54 }
 0x24f   : > { %v1378_v47 = vmul.f32 %v3286_v46, %v3282_v26  ;;  %v3288_v24 = vpop.eup %3287 }
 0x250   : > { %v1470_v26 = vsel %vm1291_vm1, %v3288_v24, 0.0 }
 0x251   : > { %2917 = vst.msk [vmem:[%s3770_s22 + $0x8] sm:$0xff] %vm1291_vm1, %v1378_v47  ;;  %v1381_v49 = vpack.c.bf16 %v1378_v47, %v1378_v47 }
 0x253   : > { %2918 = vmatmul.msk.bf16.vlgmr.msrb.gmra.mxu3 %vm1291_vm1, %v1381_v49 }
 0x254   : > { %1592 = vmatpush.bf16.msrb.mxu3 %v1583_v13  ;;  %v3183_v13 = vld [vmem:[%s4220_s12 + $0x48] sm:$0xff] }
 0x2ca   : > { %v1341_v2 = vpop.f32.mrf.mxu1 }
 0x2cb   : > { %v1345_v3 = vpack.c.bf16 %v1341_v2, %v1341_v2 }
 0x2cd   : > { %2921 = vmatmul.msk.bf16.vlgmr.msra.gmra.mxu1 %vm1291_vm1, %v1345_v3 }
 0x2d2   : > { %v1343_v4 = vpop.f32.mrf.mxu1 }
 0x2d6   : > { %v1398_v6 = vpop.f32.mrf.mxu3 }
 0x2d7   : > { %v1402_v9 = vpack.c.bf16 %v1398_v6, %v1398_v6  ;;  %v3169_v6 = vld [vmem:[%s4219_s9 + $0x18] sm:$0xff] }
 0x2d8   : > { %1708 = vmatpush.bf16.msra.mxu1 %v3169_v6 }
 0x2d9   : > { %2920 = vmatmul.msk.bf16.vlgmr.msra.gmra.mxu0 %vm1291_vm1, %v1402_v9  ;;  %v3173_v9 = vld [vmem:[%s4219_s9 + $0x38] sm:$0xff] }
 0x2da   : > { %1673 = vmatpush.bf16.msra.mxu0 %v3167_v5 }
 0x2dd   : > { %2927 = vmatmul.msk.bf16.vlgmr.msrb.gmra.mxu1 %vm1291_vm1, %v1521_v10  ;;  %v3166_v10 = vld [vmem:[%s4219_s9] sm:$0xff] }
 0x2de   : > { %v1400_v12 = vpop.f32.mrf.mxu3  ;;  %1674 = vmatpush.bf16.msra.mxu0 %v3166_v10 }
 0x2df   : > { %v3168_v12 = vld [vmem:[%s4219_s9 + $0x10] sm:$0xff] }
 0x2e0   : > { %1709 = vmatpush.bf16.msra.mxu1 %v3168_v12  ;;  %v3262_v12 = vld [vmem:[%s4225_s11 + $0x2] ss:$0 sm:$0xff] }
 0x34a   : > { %v1439_v14 = vpop.f32.mrf.mxu1 }
 0x352   : > { %v1441_v15 = vpop.f32.mrf.mxu1 }
 0x353   : > { %v3172_v15 = vld [vmem:[%s4219_s9 + $0x30] sm:$0xff] }
 0x356   : > { %v1420_v17 = vpop.f32.mrf.mxu0 }
 0x357   : > { %v1440_v18 = vadd.f32 %v1439_v14, %v1420_v17  ;;  %v3170_v14 = vld [vmem:[%s4219_s9 + $0x20] sm:$0xff]  ;;  %v3175_v17 = vld [vmem:[%s4220_s12 + $0x8] sm:$0xff]  ;;  %s2545_s9 = scalar_lea.sflag [#allocation3], %s3765_s0 }
 0x358   : > { %1744 = vmatpush.bf16.msra.mxu2 %v3170_v14 }
 0x35a   : > { %v1538_v20 = vpop.f32.mrf.mxu1 }
 0x35b   : > { %v1539_v21 = vadd.f32 %v1538_v20, %v3719_v62  ;;  %v3174_v20 = vld [vmem:[%s4220_s12] sm:$0xff] }
 0x35d   : > { %v1542_v22 = vsel %vm1291_vm1, %v1539_v21, -inf }
 0x35e   : > { %1543 = vmax.xlane.f32.xlu1 %v1542_v22  ;;  %v1422_v23 = vpop.f32.mrf.mxu0 }
 0x362   : > { %v1540_v25 = vpop.f32.mrf.mxu1 }
 0x366   : > { %1471 = vadd.xlane.f32.xlu1 %v1470_v26  ;;  %v3179_v26 = vld [vmem:[%s4220_s12 + $0x28] sm:$0xff] }
 0x3d1   : > { %v1544_v27 = vpop.xlane.xlu1 %1543 }
 0x3d2   : > { %v1545_v28 = vsub.f32 %v1539_v21, %v1544_v27  ;;  %v3176_v21 = vld [vmem:[%s4220_s12 + $0x10] sm:$0xff] }
 0x3d4   : > { %v1546_v8 = vmul.f32 1.442695, %v1545_v28  ;;  %v3178_v28 = vld [vmem:[%s4220_s12 + $0x20] sm:$0xff] }
 0x3d6   : > { %3289 = vpow2.f32 %v1546_v8 }
 0x3d9   : > { %v1472_v29 = vpop.xlane.xlu1 %1471 }
 0x3da   : > { %3291 = vrcp.f32 %v1472_v29 }
 0x3dc   : > { %v3290_v30 = vpop.eup %3289 }
 0x3dd   : > { %v1548_v62 = vsel %vm1291_vm1, %v3290_v30, 0.0 }
 0x3de   : > { %1549 = vadd.xlane.f32.xlu0 %v1548_v62 }
 0x3e0   : > { %v3292_v31 = vpop.eup %3291 }
 0x3e1   : > { %v1474_v32 = vmul.f32 %v3292_v31, %v3288_v24  ;;  %v3259_v31 = vld [vmem:[%s4222_s27] ss:$0 sm:$0xff] }
 0x3e3   : > { %2923 = vst.msk [vmem:[%s3770_s22 + $0x10] sm:$0xff] %vm1291_vm1, %v1474_v32  ;;  %v1477_v33 = vpack.c.bf16 %v1474_v32, %v1474_v32 }
 0x3e5   : > { %2924 = vmatmul.msk.bf16.vlgmr.msra.gmra.mxu3 %vm1291_vm1, %v1477_v33 }
 0x3e6   : > { %1778 = vmatpush.bf16.msra.mxu3 %v3173_v9 }
 0x3ea   : > { %1779 = vmatpush.bf16.msra.mxu3 %v3172_v15 }
 0x451   : > { %v1550_v37 = vpop.xlane.xlu0 %1549 }
 0x452   : > { %3293 = vrcp.f32 %v1550_v37  ;;  %v3891_v37 = vpack.c.bf16 %v862_v36, %v862_v36 }
 0x453   : > { %3295 = vrcp.f32 %v3415_v57 }
 0x458   : > { %v3294_v38 = vpop.eup %3293 }
 0x459   : > { %v1552_v39 = vmul.f32 %v3294_v38, %v3290_v30  ;;  %v3296_v58 = vpop.eup %3295  ;;  %v3258_v30 = vld [vmem:[%s4221_s7] ss:$0 sm:$0xff]  ;;  %s2567_s7 = sshll.u32 %s2564_s28, 4  ;;  %s2568_s7 = int_to_ptr.hbm [resolvable:$true] %s2567_s7 }
 0x45a   : > { %v1610_v59 = vmul.f32 32.0, %v3296_v58  ;;  %vm1614_vm3 = vweird.f32 %v3296_v58  ;;  %v3182_v38 = vld [vmem:[%s4220_s12 + $0x40] sm:$0xff]  ;;  %s3333_s10 = sshra.s32 %s2568_s7, 4  ;;  %s3334_s10 = int_to_ptr.hbm [resolvable:$true] %s3333_s10 }
 0x45b   : > { %2928 = vst.msk [vmem:[%s3770_s22 + $0x18] sm:$0xff] %vm1291_vm1, %v1552_v39  ;;  %v1555_v40 = vpack.c.bf16 %v1552_v39, %v1552_v39  ;;  %v3187_v39 = vld [vmem:[%s4220_s12 + $0x68] sm:$0xff]  ;;  %p3340_p0 = scmp.lt.s32.totalorder %s3334_s10, %s4171_s25 }
 0x45c   : > { %v1611_v60 = vsub.f32 1.0, %v1610_v59  ;;  %v3266_v59 = vld [vmem:[%s4224_s13 + $0x2] ss:$0 sm:$0xff] }
 0x45d   : > { %2929 = vmatmul.msk.bf16.vlgmr.msrb.gmra.mxu2 %vm1291_vm1, %v1555_v40  ;;  %v3186_v40 = vld [vmem:[%s4220_s12 + $0x60] sm:$0xff] }
 0x45e   : > { %v1612_v61 = vmul.f32 %v3296_v58, %v1611_v60  ;;  %1884 = vmatpush.bf16.msrb.mxu2 %v3179_v26  ;;  %v2066_v26 = vld [vmem:[%s854_s1] sm:$0xff] }
 0x460   : > { %v1613_v63 = vadd.f32 %v3296_v58, %v1612_v61 }
 0x462   : > { %v3826_v0 = vsel %vm1614_vm3, %v3296_v58, %v1613_v63  ;;  %1885 = vmatpush.bf16.msrb.mxu2 %v3178_v28 }
 0x468   : > { %v1494_v41 = vpop.f32.mrf.mxu3 }
 0x469   : > { %v1498_v42 = vpack.c.bf16 %v1494_v41, %v1494_v41 }
 0x46b   : > { %2926 = vmatmul.msk.bf16.vlgmr.msrb.gmra.mxu0 %vm1291_vm1, %v1498_v42 }
 0x46c   : > { %1814 = vmatpush.bf16.msrb.mxu0 %v3175_v17  ;;  %v3184_v17 = vld [vmem:[%s4220_s12 + $0x50] sm:$0xff] }
 0x470   : > { %v1496_v43 = vpop.f32.mrf.mxu3  ;;  %1815 = vmatpush.bf16.msrb.mxu0 %v3174_v20 }
 0x4e0   : > { %v1572_v44 = vpop.f32.mrf.mxu2 }
 0x4e1   : > { %v1576_v45 = vpack.c.bf16 %v1572_v44, %v1572_v44 }
 0x4e3   : > { %2931 = vmatmul.msk.bf16.vlgmr.msrb.gmra.mxu3 %vm1291_vm1, %v1576_v45 }
 0x4e8   : > { %v1516_v46 = vpop.f32.mrf.mxu0  ;;  %v1574_v47 = vpop.f32.mrf.mxu2 }
 0x4e9   : > { %v1520_v48 = vadd.f32 %v1516_v46, %v1440_v18  ;;  %v3177_v18 = vld [vmem:[%s4220_s12 + $0x18] sm:$0xff]  ;;  %v3264_v47 = vld [vmem:[%s4224_s13] ss:$0 sm:$0xff] }
 0x4ea   : > { %1849 = vmatpush.bf16.msrb.mxu1 %v3177_v18  ;;  %v3267_v18 = vld [vmem:[%s4224_s13 + $0x4] ss:$0 sm:$0xff] }
 0x4ee   : > { %1850 = vmatpush.bf16.msrb.mxu1 %v3176_v21 }
 0x4f0   : > { %v1518_v49 = vpop.f32.mrf.mxu0 }
 0x566   : > { %v1594_v51 = vpop.f32.mrf.mxu3 }
 0x567   : > { %v1598_v52 = vadd.f32 %v1594_v51, %v1520_v48  ;;  %v3265_v48 = vld [vmem:[%s4224_s13 + $0x1] ss:$0 sm:$0xff] }
 0x569   : > { %v1602_v53 = vadd.f32 %v3257_v50, %v1598_v52 }
 0x56b   : > { %v1605_v54 = vadd.f32 %v1602_v53, %v3642_v11 }
 0x56d   : > { %v1606_v55 = vsel %vm884_vm0, %v1605_v54, 0.0 }
 0x56e   : > { %v1596_v56 = vpop.f32.mrf.mxu3  ;;  %1607 = vadd.xlane.f32.xlu2 %v1606_v55  ;;  %v3260_v55 = vld [vmem:[%s4225_s11] ss:$0 sm:$0xff] }
 0x56f   : > { %v3261_v56 = vld [vmem:[%s4225_s11 + $0x1] ss:$0 sm:$0xff] }
 0x5e1   : > { %v1608_v1 = vpop.xlane.xlu2 %1607 }
 0x5e2   : > { %v1616_v2 = vmul.f32 %v3826_v0, %v1608_v1 }
 0x5e4   : > { %v1617_v3 = vsub.f32 %v1605_v54, %v1616_v2 }
 0x5e6   : > { %v1618_v4 = vmul.f32 %v1617_v3, %v1617_v3 }
 0x5e8   : > { %v1619_v11 = vsel %vm884_vm0, %v1618_v4, 0.0 }
 0x5e9   : > { %1620 = vadd.xlane.f32.xlu0 %v1619_v11 }
 0x65c   : > { %v1621_v16 = vpop.xlane.xlu0 %1620 }
 0x65d   : > { %v1622_v19 = vmul.f32 %v1621_v16, %v3826_v0  ;;  %v3185_v16 = vld [vmem:[%s4220_s12 + $0x58] sm:$0xff] }
 0x65f   : > { %v1623_v22 = vadd.f32 1e-05, %v1622_v19 }
 0x661   : > { %3297 = vrsqrt.f32 %v1623_v22  ;;  %vm1630_vm5 = vweird.f32 %v1623_v22 }
 0x667   : > { %v3298_v23 = vpop.eup %3297 }
 0x668   : > { %v1625_v24 = vmul.f32 %v3298_v23, %v1623_v22  ;;  %vm1631_vm4 = vweird.f32 %v3298_v23 }
 0x669   : > { %vm1632_vm6 = vmor %vm1630_vm5, %vm1631_vm4 }
 0x66a   : > { %v1626_v25 = vmul.f32 %v3298_v23, %v1625_v24 }
 0x66c   : > { %v1627_v27 = vmul.f32 0.5, %v1626_v25 }
 0x66e   : > { %v1628_v8 = vsub.f32 1.5, %v1627_v27  ;;  %v3957_v27 = vmul.f32 -1e+09, %v2066_v26 }
 0x670   : > { %v1629_v29 = vmul.f32 %v3298_v23, %v1628_v8 }
 0x672   : > { %v1633_v62 = vsel %vm1632_vm6, %v3298_v23, %v1629_v29 }
 0x673   : > { %v1634_v32 = vmul.f32 %v1633_v62, %v1617_v3 }
 0x675   : > { %v1638_v33 = vmul.f32 %v3258_v30, %v1634_v32 }
 0x677   : > { %v3879_v34 = vadd.f32 %v3259_v31, %v1638_v33 }
 0x679   : > { %v1643_v35 = vpack.c.bf16 %v3879_v34, %v3879_v34 }
 0x67b   : > { %2940 = vmatmul.msk.bf16.vlgmr.msra.gmra.mxu0 %vm884_vm0, %v1643_v35  ;;  %2954 = vmatmul.msk.bf16.vlgmr.msra.gmra.mxu1 %vm884_vm0, %v1643_v35 }
 0x67c   : > { %2968 = vmatmul.msk.bf16.vlgmr.msra.gmra.mxu2 %vm884_vm0, %v1643_v35  ;;  %2982 = vmatmul.msk.bf16.vlgmr.msra.gmra.mxu3 %vm884_vm0, %v1643_v35 }
 0x67d   : > { %1954 = vmatpush.bf16.msra.mxu0 %v3183_v13  ;;  %2024 = vmatpush.bf16.msra.mxu2 %v3187_v39  ;;  %v3181_v13 = vld [vmem:[%s4220_s12 + $0x38] sm:$0xff] }
 0x67e   : > { %1989 = vmatpush.bf16.msra.mxu1 %v3185_v16  ;;  %1919 = vmatpush.bf16.msrb.mxu3 %v3181_v13  ;;  %v3189_v39 = vld [vmem:[%s4220_s12 + $0x78] sm:$0xff] }
 0x681   : > { %1955 = vmatpush.bf16.msra.mxu0 %v3182_v38  ;;  %2025 = vmatpush.bf16.msra.mxu2 %v3186_v40  ;;  %v3180_v38 = vld [vmem:[%s4220_s12 + $0x30] sm:$0xff] }
 0x682   : > { %1990 = vmatpush.bf16.msra.mxu1 %v3184_v17  ;;  %1920 = vmatpush.bf16.msrb.mxu3 %v3180_v38  ;;  %v3188_v40 = vld [vmem:[%s4220_s12 + $0x70] sm:$0xff]  ;;  %v3263_v38 = vld [vmem:[%s4225_s11 + $0x3] ss:$0 sm:$0xff]  ;;  %s3335_s11 = scalar_lea.hbm %s3334_s10, 32 }
 0x683   : > { %p3336_p11 = scmp.ne.s32.totalorder %s3334_s10, %s3335_s11  ;;  %p3341_p1 = scmp.lt.s32.totalorder %s3339_s6, %s3335_s11 }
 0x685   : > { %p3337_p12 = pnand %p3336_p11, %p3591_p5  ;;  %p3342_p2 = por %p3341_p1, %p3340_p0 }
 0x686   : > { %2059 = vmatpush.bf16.msra.mxu3 %v3189_v39 }
 0x687   : > { %p3338_p13 = pneg %p3337_p12 }
 0x689   : > { %p3343_p3 = pnand %p3342_p2, %p3338_p13 }
 0x68a   : > { %2060 = vmatpush.bf16.msra.mxu3 %v3188_v40 }
 0x68b   : > { %2991 = vmatmul.msk.bf16.vlgmr.msrb.gmra.mxu0 %vm884_vm0, %v3891_v37  ;;  %3005 = vmatmul.msk.bf16.vlgmr.msrb.gmra.mxu1 %vm884_vm0, %v3891_v37 }
 0x68c   : > { %3019 = vmatmul.msk.bf16.vlgmr.msrb.gmra.mxu2 %vm884_vm0, %v3891_v37  ;;  %3033 = vmatmul.msk.bf16.vlgmr.msrb.gmra.mxu3 %vm884_vm0, %v3891_v37 }
 0x69b   : > { %3047 = vmatmul.msk.bf16.vlgmr.msra.gmra.mxu0 %vm884_vm0, %v3891_v37  ;;  %3061 = vmatmul.msk.bf16.vlgmr.msra.gmra.mxu1 %vm884_vm0, %v3891_v37 }
 0x69c   : > { %3075 = vmatmul.msk.bf16.vlgmr.msra.gmra.mxu2 %vm884_vm0, %v3891_v37  ;;  %3089 = vmatmul.msk.bf16.vlgmr.msra.gmra.mxu3 %vm884_vm0, %v3891_v37 }
 0x6f8   : > { %v1676_v41 = vpop.f32.mrf.mxu0  ;;  %v1711_v42 = vpop.f32.mrf.mxu1 }
 0x6f9   : > { %v1677_v63 = vadd.f32 %v3260_v55, %v1676_v41  ;;  %v1712_v1 = vadd.f32 %v3261_v56, %v1711_v42  ;;  %v3269_v56 = vld [vmem:[%s4224_s13 + $0x5] ss:$0 sm:$0xff] }
 0x6fb   : > { %v2069_v6 = vpack.c.bf16 %v1677_v63, %v1677_v63  ;;  %v2125_v7 = vpack.c.bf16 %v1712_v1, %v1712_v1  ;;  %v2124_v1 = vld [vmem:[%s4160_s14] sm:$0xf] }
 0x6ff   : > { %v1746_v43 = vpop.f32.mrf.mxu2  ;;  %v3915_v44 = vpop.f32.mrf.mxu3 }
 0x700   : > { %v1678_v45 = vpop.f32.mrf.mxu0  ;;  %v1713_v46 = vpop.f32.mrf.mxu1  ;;  %v1747_v14 = vadd.f32 %v3262_v12, %v1746_v43 }
 0x702   : > { %v2221_v15 = vpack.c.bf16 %v1747_v14, %v1747_v14 }
 0x707   : > { %v1748_v49 = vpop.f32.mrf.mxu2  ;;  %v1783_v50 = vpop.f32.mrf.mxu3 }
 0x708   : > { %v1817_v51 = vpop.f32.mrf.mxu0  ;;  %v1852_v52 = vpop.f32.mrf.mxu1 }
 0x709   : > { %v1818_v53 = vadd.f32 %v3264_v47, %v1817_v51  ;;  %v1853_v54 = vadd.f32 %v3265_v48, %v1852_v52 }
 0x70b   : > { %v2070_v57 = vpack.c.bf16 %v1818_v53, %v1818_v53  ;;  %v2126_v58 = vpack.c.bf16 %v1853_v54, %v1853_v54  ;;  %v3268_v54 = vld [vmem:[%s4224_s13 + $0x6] ss:$0 sm:$0xff] }
 0x70d   : > { %v2075_v60 = vsel %vm1291_vm1, %v2070_v57, 0  ;;  %v2131_v61 = vsel %vm1291_vm1, %v2126_v58, 0 }
 0x70e   : > { %2084 = vmatpush.bf16.xpose.msrb.mxu0 %v2075_v60  ;;  %2140 = vmatpush.bf16.xpose.msrb.mxu2 %v2131_v61 }
 0x70f   : > { %v1887_v2 = vpop.f32.mrf.mxu2 }
 0x710   : > { %v1819_v3 = vpop.f32.mrf.mxu0  ;;  %v1888_v4 = vadd.f32 %v3266_v59, %v1887_v2  ;;  %v1854_v11 = vpop.f32.mrf.mxu1  ;;  %v2206_v2 = vsel %vm1328_vm2, %v2124_v1, 0 }
 0x711   : > { %v3270_v3 = vld [vmem:[%s4224_s13 + $0x3] ss:$0 sm:$0xff]  ;;  %v1922_v11 = vpop.f32.mrf.mxu3 }
 0x712   : > { %v2222_v5 = vpack.c.bf16 %v1888_v4, %v1888_v4 }
 0x714   : > { %v2227_v9 = vsel %vm1291_vm1, %v2222_v5, 0  ;;  %v1923_v5 = vadd.f32 %v3270_v3, %v1922_v11  ;;  %v3106_v3 = vld [vmem:[%s4160_s14 + $0xc] sm:$0xf] }
 0x715   : > { %3090 = vmatmul.msk.bf16.vlgmr.msrb.gmra.mxu0 %vm1291_vm1, %v2069_v6  ;;  %3092 = vmatmul.msk.bf16.vlgmr.msrb.gmra.mxu2 %vm1291_vm1, %v2125_v7 }
 0x716   : > { %2236 = vmatpush.bf16.xpose.msra.mxu2 %v2227_v9  ;;  %v2300_v7 = vpack.c.bf16 %v1923_v5, %v1923_v5 }
 0x717   : > { %v1889_v10 = vpop.f32.mrf.mxu2 }
 0x718   : > { %v1957_v19 = vpop.f32.mrf.mxu0  ;;  %v1992_v37 = vpop.f32.mrf.mxu1  ;;  %v2305_v17 = vsel %vm1291_vm1, %v2300_v7, 0 }
 0x719   : > { %v1958_v20 = vadd.f32 %v3267_v18, %v1957_v19  ;;  %v1993_v58 = vadd.f32 %v3269_v56, %v1992_v37 }
 0x71b   : > { %v2103_v21 = vpack.c.bf16 %v1958_v20, %v1958_v20  ;;  %v2160_v59 = vpack.c.bf16 %v1993_v58, %v1993_v58 }
 0x71d   : > { %v2108_v22 = vsel %vm1328_vm2, %v2103_v21, 0  ;;  %v2165_v61 = vsel %vm1328_vm2, %v2160_v59, 0  ;;  %v3271_v21 = vld [vmem:[%s4224_s13 + $0x7] ss:$0 sm:$0xff] }
 0x71e   : > { %2117 = vmatpush.bf16.msrb.mxu1 %v2108_v22  ;;  %2174 = vmatpush.bf16.msrb.mxu3 %v2165_v61 }
 0x71f   : > { %v2027_v24 = vpop.f32.mrf.mxu2 }
 0x720   : > { %v1959_v23 = vpop.f32.mrf.mxu0  ;;  %v2028_v55 = vadd.f32 %v3268_v54, %v2027_v24  ;;  %v1994_v63 = vpop.f32.mrf.mxu1 }
 0x722   : > { %v2256_v57 = vpack.c.bf16 %v2028_v55, %v2028_v55  ;;  %2215 = vmatpush.bf16.msra.mxu1 %v2206_v2 }
 0x724   : > { %v2261_v60 = vsel %vm1328_vm2, %v2256_v57, 0 }
 0x725   : > { %3098 = vmatmul.msk.bf16.vlgmr.msra.gmra.mxu2 %vm1291_vm1, %v2221_v15  ;;  %2270 = vmatpush.bf16.msra.mxu3 %v2261_v60  ;;  %v1924_v15 = vpop.f32.mrf.mxu3 }
 0x727   : > { %v2029_v25 = vpop.f32.mrf.mxu2 }
 0x72d   : > { %v2062_v23 = vpop.f32.mrf.mxu3 }
 0x72e   : > { %v2063_v24 = vadd.f32 %v3271_v21, %v2062_v23 }
 0x792   : > { %v2086_v28 = vpop.f32.mrf.mxu0 }
 0x793   : > { %v2087_v8 = vadd.f32 %v2086_v28, %v3957_v27  ;;  %v2334_v28 = vpack.c.bf16 %v2063_v24, %v2063_v24 }
 0x795   : > { %v2090_v29 = vsel %vm1291_vm1, %v2087_v8, -inf }
 0x796   : > { %2091 = vmax.xlane.f32.xlu1 %v2090_v29  ;;  %v2064_v29 = vpop.f32.mrf.mxu3 }
 0x798   : > { %v2142_v30 = vpop.f32.mrf.mxu2 }
 0x799   : > { %v2143_v62 = vadd.f32 %v2142_v30, %v3957_v27  ;;  %v3095_v30 = vld [vmem:[%s4160_s14 + $0x4] sm:$0xf] }
 0x79a   : > { %v2088_v31 = vpop.f32.mrf.mxu0 }
 0x79b   : > { %v2146_v32 = vsel %vm1291_vm1, %v2143_v62, -inf }
 0x79c   : > { %2147 = vmax.xlane.f32.xlu0 %v2146_v32 }
 0x7a0   : > { %v2144_v33 = vpop.f32.mrf.mxu2 }
 0x7a8   : > { %v2238_v35 = vpop.f32.mrf.mxu2 }
 0x7a9   : > { %v2239_v50 = vadd.f32 %v2238_v35, %v3957_v27 }
 0x7ab   : > { %v2242_v53 = vsel %vm1291_vm1, %v2239_v50, -inf }
 0x7b0   : > { %v2240_v36 = vpop.f32.mrf.mxu2 }
 0x809   : > { %v2092_v41 = vpop.xlane.xlu1 %2091 }
 0x80a   : > { %v2093_v42 = vsub.f32 %v2087_v8, %v2092_v41  ;;  %v2339_v8 = vsel %vm1328_vm2, %v2334_v28, 0  ;;  %v1782_v41 = vadd.f32 %v3263_v38, %v3915_v44  ;;  %v3195_v28 = vld [vmem:[%s4166_s20 + $0x18] sm:$0xff]  ;;  %v3273_v38 = vld [vmem:[%s4162_s16] ss:$0 sm:$0xff] }
 0x80b   : > { %2348 = vmatpush.bf16.msrb.mxu2 %v2339_v8 }
 0x80c   : > { %v2094_v43 = vmul.f32 1.442695, %v2093_v42 }
 0x80e   : > { %3299 = vpow2.f32 %v2094_v43  ;;  %v2299_v43 = vpack.c.bf16 %v1782_v41, %v1782_v41 }
 0x80f   : > { %v2148_v45 = vpop.xlane.xlu0 %2147 }
 0x810   : > { %v2149_v46 = vsub.f32 %v2143_v62, %v2148_v45  ;;  %v2187_v62 = vsel %vm1328_vm2, %v3095_v30, 0  ;;  %v3194_v30 = vld [vmem:[%s4166_s20 + $0x10] sm:$0xff] }
 0x811   : > { %2196 = vmatpush.bf16.msra.mxu0 %v2187_v62 }
 0x812   : > { %v2150_v47 = vmul.f32 1.442695, %v2149_v46  ;;  %v3101_v46 = vld [vmem:[%s4160_s14 + $0x8] sm:$0xf] }
 0x814   : > { %v3300_v48 = vpop.eup %3299  ;;  %3301 = vpow2.f32 %v2150_v47  ;;  %v2283_v47 = vsel %vm1328_vm2, %v3101_v46, 0  ;;  %v3193_v46 = vld [vmem:[%s4166_s20 + $0x8] sm:$0xff] }
 0x815   : > { %v2096_v49 = vsel %vm1291_vm1, %v3300_v48, 0.0  ;;  %2292 = vmatpush.bf16.msrb.mxu0 %v2283_v47  ;;  %v3192_v47 = vld [vmem:[%s4166_s20] sm:$0xff] }
 0x816   : > { %2097 = vadd.xlane.f32.xlu2 %v2096_v49 }
 0x81a   : > { %v3302_v51 = vpop.eup %3301 }
 0x81b   : > { %v2152_v52 = vsel %vm1291_vm1, %v3302_v51, 0.0 }
 0x81c   : > { %2153 = vadd.xlane.f32.xlu0 %v2152_v52 }
 0x81e   : > { %2243 = vmax.xlane.f32.xlu2 %v2242_v53 }
 0x889   : > { %v2098_v4 = vpop.xlane.xlu2 %2097 }
 0x88a   : > { %3303 = vrcp.f32 %v2098_v4  ;;  %v2361_v4 = vsel %vm1328_vm2, %v3106_v3, 0 }
 0x88f   : > { %v2154_v6 = vpop.xlane.xlu0 %2153 }
 0x890   : > { %v3304_v9 = vpop.eup %3303  ;;  %3305 = vrcp.f32 %v2154_v6 }
 0x891   : > { %v2100_v10 = vmul.f32 %v3304_v9, %v3300_v48  ;;  %v2244_v12 = vpop.xlane.xlu2 %2243 }
 0x892   : > { %v2245_v14 = vsub.f32 %v2239_v50, %v2244_v12 }
 0x893   : > { %2101 = vst.msk [vmem:[%s4000_s5] sm:$0xff] %vm1291_vm1, %v2100_v10  ;;  %v2102_v16 = vpack.c.bf16 %v2100_v10, %v2100_v10 }
 0x894   : > { %v2246_v18 = vmul.f32 1.442695, %v2245_v14  ;;  %v3272_v14 = vld [vmem:[%s4161_s15] ss:$0 sm:$0xff] }
 0x895   : > { %3091 = vmatmul.msk.bf16.vlgmr.msrb.gmra.mxu1 %vm1291_vm1, %v2102_v16 }
 0x896   : > { %v3306_v19 = vpop.eup %3305  ;;  %3307 = vpow2.f32 %v2246_v18  ;;  %2314 = vmatpush.bf16.xpose.msrb.mxu1 %v2305_v17 }
 0x897   : > { %v2156_v20 = vmul.f32 %v3306_v19, %v3302_v51 }
 0x899   : > { %3093 = vst.msk [vmem:[%s4000_s5 + $0x8] sm:$0xff] %vm1291_vm1, %v2156_v20  ;;  %v2159_v22 = vpack.c.bf16 %v2156_v20, %v2156_v20 }
 0x89b   : > { %3094 = vmatmul.msk.bf16.vlgmr.msrb.gmra.mxu3 %vm1291_vm1, %v2159_v22 }
 0x89c   : > { %v3308_v25 = vpop.eup %3307  ;;  %2370 = vmatpush.bf16.msrb.mxu3 %v2361_v4 }
 0x89d   : > { %v2248_v26 = vsel %vm1291_vm1, %v3308_v25, 0.0 }
 0x89e   : > { %2249 = vadd.xlane.f32.xlu2 %v2248_v26  ;;  %v3191_v26 = vld [vmem:[%s4164_s18 + $0x8] sm:$0xff] }
 0x911   : > { %v2250_v31 = vpop.xlane.xlu2 %2249 }
 0x912   : > { %3309 = vrcp.f32 %v2250_v31  ;;  %v2119_v32 = vpop.f32.mrf.mxu1 }
 0x913   : > { %v2123_v33 = vpack.c.bf16 %v2119_v32, %v2119_v32 }
 0x915   : > { %3097 = vmatmul.msk.bf16.vlgmr.msra.gmra.mxu1 %vm1291_vm1, %v2123_v33 }
 0x916   : > { %2497 = vmatpush.bf16.msra.mxu1 %v3195_v28 }
 0x918   : > { %v3310_v35 = vpop.eup %3309 }
 0x919   : > { %v2252_v36 = vmul.f32 %v3310_v35, %v3308_v25 }
 0x91a   : > { %v2121_v13 = vpop.f32.mrf.mxu1  ;;  %2498 = vmatpush.bf16.msra.mxu1 %v3194_v30 }
 0x91b   : > { %3099 = vst.msk [vmem:[%s4000_s5 + $0x10] sm:$0xff] %vm1291_vm1, %v2252_v36  ;;  %v2255_v39 = vpack.c.bf16 %v2252_v36, %v2252_v36 }
 0x91d   : > { %3100 = vmatmul.msk.bf16.vlgmr.msra.gmra.mxu3 %vm1291_vm1, %v2255_v39 }
 0x91e   : > { %v2176_v40 = vpop.f32.mrf.mxu3  ;;  %2499 = vmatpush.bf16.msra.mxu1 %v3193_v46 }
 0x91f   : > { %v2180_v42 = vpack.c.bf16 %v2176_v40, %v2176_v40  ;;  %v3274_v40 = vld [vmem:[%s4163_s17] ss:$0 sm:$0xff] }
 0x921   : > { %3096 = vmatmul.msk.bf16.vlgmr.msra.gmra.mxu0 %vm1291_vm1, %v2180_v42 }
 0x922   : > { %2444 = vmatpush.bf16.msra.mxu0 %v3191_v26  ;;  %2500 = vmatpush.bf16.msra.mxu1 %v3192_v47 }
 0x925   : > { %3103 = vmatmul.msk.bf16.vlgmr.msrb.gmra.mxu1 %vm1291_vm1, %v2299_v43 }
 0x926   : > { %v2178_v45 = vpop.f32.mrf.mxu3 }
 0x992   : > { %v2217_v48 = vpop.f32.mrf.mxu1 }
 0x99a   : > { %v2219_v49 = vpop.f32.mrf.mxu1 }
 0x99e   : > { %v2198_v50 = vpop.f32.mrf.mxu0 }
 0x99f   : > { %v2218_v51 = vadd.f32 %v2217_v48, %v2198_v50  ;;  %v3275_v48 = vld [vmem:[%s4165_s19] ss:$0 sm:$0xff] }
 0x9a0   : > { %v2272_v52 = vpop.f32.mrf.mxu3 }
 0x9a1   : > { %v2276_v44 = vpack.c.bf16 %v2272_v52, %v2272_v52 }
 0x9a2   : > { %v2316_v53 = vpop.f32.mrf.mxu1 }
 0x9a3   : > { %v2317_v54 = vadd.f32 %v2316_v53, %v3957_v27  ;;  %3102 = vmatmul.msk.bf16.vlgmr.msrb.gmra.mxu0 %vm1291_vm1, %v2276_v44  ;;  %v3276_v53 = vld [vmem:[%s4167_s21] ss:$0 sm:$0xff] }
 0x9a5   : > { %v2320_v55 = vsel %vm1291_vm1, %v2317_v54, -inf }
 0x9a6   : > { %v2200_v56 = vpop.f32.mrf.mxu0  ;;  %2321 = vmax.xlane.f32.xlu1 %v2320_v55 }
 0x9a8   : > { %v2274_v57 = vpop.f32.mrf.mxu3 }
 0x9aa   : > { %v2318_v37 = vpop.f32.mrf.mxu1 }
 0xa19   : > { %v2322_v58 = vpop.xlane.xlu1 %2321 }
 0xa1a   : > { %v2323_v59 = vsub.f32 %v2317_v54, %v2322_v58 }
 0xa1c   : > { %v2324_v60 = vmul.f32 1.442695, %v2323_v59 }
 0xa1e   : > { %3311 = vpow2.f32 %v2324_v60 }
 0xa20   : > { %v2294_v61 = vpop.f32.mrf.mxu0 }
 0xa21   : > { %v2298_v63 = vadd.f32 %v2294_v61, %v2218_v51 }
 0xa24   : > { %v3312_v1 = vpop.eup %3311 }
 0xa25   : > { %v2326_v2 = vsel %vm1291_vm1, %v3312_v1, 0.0 }
 0xa26   : > { %2327 = vadd.xlane.f32.xlu1 %v2326_v2 }
 0xa28   : > { %v2296_v27 = vpop.f32.mrf.mxu0 }
 0xa99   : > { %v2328_v11 = vpop.xlane.xlu1 %2327 }
 0xa9a   : > { %3313 = vrcp.f32 %v2328_v11 }
 0xaa0   : > { %v3314_v5 = vpop.eup %3313 }
 0xaa1   : > { %v2330_v6 = vmul.f32 %v3314_v5, %v3312_v1 }
 0xaa3   : > { %3104 = vst.msk [vmem:[%s4000_s5 + $0x18] sm:$0xff] %vm1291_vm1, %v2330_v6  ;;  %v2333_v7 = vpack.c.bf16 %v2330_v6, %v2330_v6 }
 0xaa5   : > { %3105 = vmatmul.msk.bf16.vlgmr.msrb.gmra.mxu2 %vm1291_vm1, %v2333_v7 }
 0xb28   : > { %v2350_v9 = vpop.f32.mrf.mxu2 }
 0xb29   : > { %v2354_v10 = vpack.c.bf16 %v2350_v9, %v2350_v9 }
 0xb2b   : > { %3107 = vmatmul.msk.bf16.vlgmr.msrb.gmra.mxu3 %vm1291_vm1, %v2354_v10 }
 0xb30   : > { %v2352_v12 = vpop.f32.mrf.mxu2 }
 0xbae   : > { %v2372_v15 = vpop.f32.mrf.mxu3 }
 0xbaf   : > { %v2376_v16 = vadd.f32 %v2372_v15, %v2298_v63 }
 0xbb1   : > { %v2380_v17 = vadd.f32 %v3272_v14, %v2376_v16 }
 0xbb3   : > { %v2383_v18 = vadd.f32 %v2380_v17, %v3879_v34  ;;  %v3190_v34 = vld [vmem:[%s4164_s18] sm:$0xff] }
 0xbb4   : > { %2445 = vmatpush.bf16.msra.mxu0 %v3190_v34 }
 0xbb5   : > { %v2384_v19 = vsel %vm884_vm0, %v2383_v18, 0.0 }
 0xbb6   : > { %2385 = vadd.xlane.f32.xlu0 %v2384_v19  ;;  %v2374_v20 = vpop.f32.mrf.mxu3 }
 0xc29   : > { %v2386_v21 = vpop.xlane.xlu0 %2385 }
 0xc2a   : > { %v2387_v22 = vmul.f32 %v2386_v21, %v3826_v0 }
 0xc2c   : > { %v2388_v23 = vsub.f32 %v2383_v18, %v2387_v22 }
 0xc2e   : > { %v2389_v24 = vmul.f32 %v2388_v23, %v2388_v23 }
 0xc30   : > { %v2390_v25 = vsel %vm884_vm0, %v2389_v24, 0.0 }
 0xc31   : > { %2391 = vadd.xlane.f32.xlu1 %v2390_v25 }
 0xca4   : > { %v2392_v8 = vpop.xlane.xlu1 %2391 }
 0xca5   : > { %v2393_v29 = vmul.f32 %v2392_v8, %v3826_v0 }
 0xca7   : > { %v2394_v62 = vadd.f32 1e-05, %v2393_v29 }
 0xca9   : > { %3315 = vrsqrt.f32 %v2394_v62  ;;  %vm2401_vm8 = vweird.f32 %v2394_v62 }
 0xcaf   : > { %v3316_v31 = vpop.eup %3315 }
 0xcb0   : > { %v2396_v32 = vmul.f32 %v3316_v31, %v2394_v62  ;;  %vm2402_vm7 = vweird.f32 %v3316_v31 }
 0xcb1   : > { %vm2403_vm9 = vmor %vm2401_vm8, %vm2402_vm7 }
 0xcb2   : > { %v2397_v33 = vmul.f32 %v3316_v31, %v2396_v32 }
 0xcb4   : > { %v2398_v35 = vmul.f32 0.5, %v2397_v33 }
 0xcb6   : > { %v2399_v36 = vsub.f32 1.5, %v2398_v35 }
 0xcb8   : > { %v2400_v13 = vmul.f32 %v3316_v31, %v2399_v36 }
 0xcba   : > { %v2404_v39 = vsel %vm2403_vm9, %v3316_v31, %v2400_v13 }
 0xcbb   : > { %v2405_v41 = vmul.f32 %v2404_v39, %v2388_v23 }
 0xcbd   : > { %v2409_v42 = vmul.f32 %v3273_v38, %v2405_v41 }
 0xcbf   : > { %v2413_v43 = vadd.f32 %v3274_v40, %v2409_v42 }
 0xcc1   : > { %v2414_v45 = vpack.c.bf16 %v2413_v43, %v2413_v43 }
 0xcc3   : > { %3116 = vmatmul.msk.bf16.vlgmr.msra.gmra.mxu0 %vm884_vm0, %v2414_v45 }
 0xd40   : > { %v2447_v49 = vpop.f32.mrf.mxu0 }
 0xd41   : > { %v2448_v50 = vadd.f32 %v3275_v48, %v2447_v49 }
 0xd43   : > { %v2451_v51 = vmax.f32 %v2448_v50, 0.0 }
 0xd45   : > { %v2452_v52 = vpack.c.bf16 %v2451_v51, %v2451_v51 }
 0xd47   : > { %3133 = vmatmul.msk.bf16.vlgmr.msra.gmra.mxu1 %vm2489_vm10, %v2452_v52 }
 0xd48   : > { %v2449_v44 = vpop.f32.mrf.mxu0 }
 0xdc4   : > { %v2502_v54 = vpop.f32.mrf.mxu1 }
 0xdc5   : > { %v2503_v55 = vadd.f32 %v3276_v53, %v2502_v54 }
 0xdc7   : > { %v2508_v56 = vadd.f32 %v2503_v55, %v2413_v43 }
 0xdc9   : > { %v2509_v57 = vsel %vm884_vm0, %v2508_v56, 0.0 }
 0xdca   : > { %2510 = vadd.xlane.f32.xlu2 %v2509_v57 }
 0xdcc   : > { %v2504_v37 = vpop.f32.mrf.mxu1 }
 0xe3d   : > { %v2511_v58 = vpop.xlane.xlu2 %2510 }
 0xe3e   : > { %v2512_v59 = vmul.f32 %v2511_v58, %v3826_v0 }
 0xe40   : > { %v2513_v60 = vsub.f32 %v2508_v56, %v2512_v59 }
 0xe42   : > { %v2514_v61 = vmul.f32 %v2513_v60, %v2513_v60 }
 0xe44   : > { %v2515_v63 = vsel %vm884_vm0, %v2514_v61, 0.0 }
 0xe45   : > { %2516 = vadd.xlane.f32.xlu0 %v2515_v63 }
 0xe46   : > { %3346 = shalt.err (!%p3343_p3)
}
 0xe47   : > { %s3416_s22 = smov 128   ;;  %s3417_s29 = smov 8  }
 0xe48   : > { %3198 = dma.vmem_to_hbm [thread:$0]  (%p3591_p5), %s2566_s23, 512, %s2568_s7, %s2545_s9, %s3416_s22, %s3416_s22, %s3417_s29  }
 0xe49   : > { %s2582_s28 = sshll.u32 %s4000_s5, 4  ;;  %s2584_s30 = sshll.u32 %s2581_s4, 4  ;;  %s2583_s28 = int_to_ptr.vmem [resolvable:$true] %s2582_s28  ;;  %s2585_s30 = int_to_ptr.hbm [resolvable:$true] %s2584_s30 }
 0xe4a   : > { %s2550_s12 = scalar_lea.sflag [#allocation5], %s3765_s0  ;;  %s3361_s1 = sshra.s32 %s2585_s30, 4  ;;  %s3362_s1 = int_to_ptr.hbm [resolvable:$true] %s3361_s1 }
 0xe4b   : > { %s3363_s13 = scalar_lea.hbm %s3362_s1, 32  ;;  %s3367_s8 = scalar_lea.hbm %s4172_s26, 64 }
 0xe4c   : > { %p3364_p4 = scmp.ne.s32.totalorder %s3362_s1, %s3363_s13  ;;  %p3368_p9 = scmp.lt.s32.totalorder %s3362_s1, %s4172_s26 }
 0xe4d   : > { %p3369_p10 = scmp.lt.s32.totalorder %s3367_s8, %s3363_s13 }
 0xe4e   : > { %p3365_p7 = pnand %p3364_p4, %p3591_p5 }
 0xe4f   : > { %p3370_p11 = por %p3369_p10, %p3368_p9 }
 0xe50   : > { %p3366_p8 = pneg %p3365_p7 }
 0xe52   : > { %p3371_p12 = pnand %p3370_p11, %p3366_p8 }
 0xe54   : > { %3374 = shalt.err (!%p3371_p12)
}
 0xe55   : > { %3199 = dma.vmem_to_hbm [thread:$0]  (%p3591_p5), %s2583_s28, 512, %s2585_s30, %s2550_s12, %s3416_s22, %s3416_s22, %s3417_s29  }
 0xe56   : > { %s4228_s5 = sld [smem:[#allocation28_spill]] }
 0xe57   : > { %s4229_s23 = sld [smem:[#allocation29_spill]] }
 0xe58   : > { %s4230_s29 = sld [smem:[#allocation30_spill]] }
 0xe5c   : > { %v3277_v9 = vld [vmem:[%s4228_s5] ss:$0 sm:$0xff] }
 0xe5e   : > { %s858_s28 = scalar_lea.vmem %s4230_s29, %s3624_s24 }
 0xeb8   : > { %v2517_v1 = vpop.xlane.xlu0 %2516 }
 0xeb9   : > { %v2518_v2 = vmul.f32 %v2517_v1, %v3826_v0  ;;  %v3278_v0 = vld [vmem:[%s4229_s23] ss:$0 sm:$0xff] }
 0xebb   : > { %v2519_v27 = vadd.f32 1e-05, %v2518_v2 }
 0xebd   : > { %3317 = vrsqrt.f32 %v2519_v27  ;;  %vm2526_vm12 = vweird.f32 %v2519_v27 }
 0xec3   : > { %v3318_v3 = vpop.eup %3317 }
 0xec4   : > { %v2521_v4 = vmul.f32 %v3318_v3, %v2519_v27  ;;  %vm2527_vm11 = vweird.f32 %v3318_v3 }
 0xec5   : > { %vm2528_vm13 = vmor %vm2526_vm12, %vm2527_vm11 }
 0xec6   : > { %v2522_v11 = vmul.f32 %v3318_v3, %v2521_v4 }
 0xec8   : > { %v2523_v5 = vmul.f32 0.5, %v2522_v11 }
 0xeca   : > { %v2524_v6 = vsub.f32 1.5, %v2523_v5 }
 0xecc   : > { %v2525_v7 = vmul.f32 %v3318_v3, %v2524_v6 }
 0xece   : > { %v2529_v10 = vsel %vm2528_vm13, %v3318_v3, %v2525_v7 }
 0xecf   : > { %v2530_v12 = vmul.f32 %v2529_v10, %v2513_v60 }
 0xed1   : > { %v2534_v14 = vmul.f32 %v3277_v9, %v2530_v12 }
 0xed3   : > { %v2538_v15 = vadd.f32 %v3278_v0, %v2534_v14 }
 0xed5   : > { %2539 = vst.msk [vmem:[%s858_s28] sm:$0xff] %vm884_vm0, %v2538_v15 }
 0xed6 PF: > { %s4231_s30 = sld [smem:[#allocation10_spill]] }
 0xed7   : > { %s4232_s12 = sld [smem:[#allocation8_spill]] }
 0xedc   : > { %p3209_p5 = scmp.ge.s32.totalorder %s4231_s30, 2 }
 0xedd   : > { %s2606_s13 = sand.u32 1, %s4232_s12  }
 0xede   : > { %p3203_p13 = pnand %p3209_p5, %p3595_p6  ;;  %s2607_s11 = scalar_lea.sflag [#allocation3], %s2606_s13 }
 0xee0   : > { %p3204_p0 = pneg %p3203_p13 }
 0xee2   : > { %3392 = dma.done.wait (%p3204_p0), %s2607_s11, 512  }
 0xee3   : > { %3394 = vsyncadd (%p3204_p0), %s2607_s11, 4294966784  ;;  %s2617_s10 = scalar_lea.sflag [#allocation5], %s2606_s13 }
 0xee4   : > { %3396 = dma.done.wait (%p3204_p0), %s2617_s10, 512  }
 0xee5   : > { %3398 = vsyncadd (%p3204_p0), %s2617_s10, 4294966784  ;;  %s4234_s28 = sld [smem:[#allocation11_spill]]  ;;  %s4237_s27 = smov %s3405_s3 }
 0xee6   : > { %s4235_s24 = sld [smem:[#allocation9_spill]] }
 0xee7   : > { %s4236_s7 = sld [smem:[#allocation12_spill]] }
 0xeeb   : > { %p40_p1 = scmp.ge.s32.totalorder %s4234_s28, 4  }
 0xeec   : > { %s4238_s3 = smov %s4235_s24 }
 0xeed   :  { %42 = sbr.rel (!%p40_p1) target bundleno = 23 (0x17), region = 243 }
 0xef2   :  { %2623 = vsyncpa [#allocation3], 1 }
 0xef3   :  { %2625 = vsyncpa [#allocation3 + $0x1], 1 }
 0xef4   :  { %2626 = vsyncpa [#allocation5], 1 }
 0xef5   :  { %2628 = vsyncpa [#allocation5 + $0x1], 1 }

</bundles_post_ra>
